<compile_context>
chip_gen: v7x
topology: tpu7x:2x2x1
jax: 0.10.0
libtpu: 0.0.40
codegen_flags: <defaults>
</compile_context>

<pallas_src>
import functools

import jax
import jax.numpy as jnp
from jax.experimental import pallas as pl
from jax.experimental.pallas import tpu as pltpu


TM = 128     # row tile (multiple of 8; full MXU height on v5e, amortizes grid overhead)
TK = 128     # K tile for the dense-adjacency aggregation
DPAD = 128   # all channel dims padded to one lane-dense 128-wide slab

# Static per-layer (activation, act_first) configs for the fused chains.
_MLP3_CFG      = (("relu", False), ("relu", False), ("none", False))   # plain 3-layer MLP
_MLP3_RELU_CFG = (("relu", False), ("relu", False), ("relu", False))   # MLP followed by relu
_MLP3_BN_CFG   = (("relu", False), ("relu", False), ("relu", True))    # MLP, relu, then BN (fused)
_LIN_SIG_CFG   = (("sigmoid", False),)                                  # Linear + sigmoid


def _round_up(a, b):
    return ((a + b - 1) // b) * b


def _apply_act(y, act):
    if act == "relu":
        return jnp.maximum(y, 0.0)
    if act == "sigmoid":
        return jax.nn.sigmoid(y)
    return y


# ----------------------------------------------------------------------------
# Kernel 1: fused multi-layer Linear/BN/act chain.
#   x_ref : (TM, DPAD)           activation row tile (f32)
#   w_ref : (L, DPAD, DPAD)      stacked bf16 weights, resident (constant map)
#   ep_ref: (L, 3, DPAD)         stacked f32 epilogues [bias, scale, shift]
#   o_ref : (TM, DPAD)           output row tile
# ----------------------------------------------------------------------------
def _mlp_chain_kernel(x_ref, w_ref, ep_ref, o_ref, *, acts, act_firsts):
    h = x_ref[...].astype(jnp.float32)
    for i in range(len(acts)):
        w = w_ref[i]                     # (DPAD, DPAD) bf16, resident in VMEM
        ep = ep_ref[i]                   # (3, DPAD) f32
        y = jnp.dot(h.astype(jnp.bfloat16), w,
                    preferred_element_type=jnp.float32)
        y = y + ep[0:1, :]               # bias
        if act_firsts[i]:
            y = _apply_act(y, acts[i])
            y = y * ep[1:2, :] + ep[2:3, :]
        else:
            y = y * ep[1:2, :] + ep[2:3, :]
            y = _apply_act(y, acts[i])
        h = y
    o_ref[...] = h.astype(o_ref.dtype)


def mlp_chain(x_pad, w_stack, ep_stack, cfg, out_dtype=jnp.float32):
    """Run a fused L-layer chain over row-tiled, lane-padded activations."""
    n_pad = x_pad.shape[0]
    L = w_stack.shape[0]
    acts = tuple(c[0] for c in cfg)
    act_firsts = tuple(c[1] for c in cfg)
    kern = functools.partial(_mlp_chain_kernel, acts=acts, act_firsts=act_firsts)
    return pl.pallas_call(
        kern,
        out_shape=jax.ShapeDtypeStruct((n_pad, DPAD), out_dtype),
        grid=(n_pad // TM,),
        in_specs=[
            pl.BlockSpec((TM, DPAD), lambda i: (i, 0)),       # activation row tile
            pl.BlockSpec((L, DPAD, DPAD), lambda i: (0, 0, 0)),  # all weights resident
            pl.BlockSpec((L, 3, DPAD), lambda i: (0, 0, 0)),     # all epilogues resident
        ],
        out_specs=pl.BlockSpec((TM, DPAD), lambda i: (i, 0)),
        compiler_params=pltpu.CompilerParams(dimension_semantics=("parallel",)),
    )(x_pad, w_stack, ep_stack)


# ----------------------------------------------------------------------------
# Kernel 2: fused GCNConv + folded BatchNorm.
#   out = ((A @ x) @ W + b) * scale + shift, K-tiled over the node dimension
#   with an f32 accumulator scratch; epilogue only at the last K step.
# ----------------------------------------------------------------------------
def _gcn_kernel(a_ref, x_ref, w_ref, ep_ref, o_ref, acc_ref):
    k = pl.program_id(1)

    @pl.when(k == 0)
    def _():
        acc_ref[...] = jnp.zeros_like(acc_ref)

    acc_ref[...] += jnp.dot(a_ref[...], x_ref[...],
                            preferred_element_type=jnp.float32)

    @pl.when(k == pl.num_programs(1) - 1)
    def _():
        ep = ep_ref[...]
        y = jnp.dot(acc_ref[...].astype(jnp.bfloat16), w_ref[...],
                    preferred_element_type=jnp.float32)
        y = y + ep[0:1, :]
        y = y * ep[1:2, :] + ep[2:3, :]
        o_ref[...] = y.astype(o_ref.dtype)


def gcn_conv(A_bf16, x_bf16, w_pad, ep):
    n_pad = A_bf16.shape[0]
    grid = (n_pad // TM, n_pad // TK)
    cost = pl.CostEstimate(
        flops=2 * n_pad * n_pad * DPAD + 2 * n_pad * DPAD * DPAD,
        transcendentals=0,
        bytes_accessed=n_pad * n_pad * 2 + n_pad * DPAD * 2
        + DPAD * DPAD * 2 + n_pad * DPAD * 4,
    )
    return pl.pallas_call(
        _gcn_kernel,
        out_shape=jax.ShapeDtypeStruct((n_pad, DPAD), jnp.float32),
        grid=grid,
        in_specs=[
            pl.BlockSpec((TM, TK), lambda i, k: (i, k)),      # adjacency tile
            pl.BlockSpec((TK, DPAD), lambda i, k: (k, 0)),    # node-feature K tile
            pl.BlockSpec((DPAD, DPAD), lambda i, k: (0, 0)),  # weight, resident
            pl.BlockSpec((3, DPAD), lambda i, k: (0, 0)),     # bias / BN scale / shift
        ],
        out_specs=pl.BlockSpec((TM, DPAD), lambda i, k: (i, 0)),
        scratch_shapes=[pltpu.VMEM((TM, DPAD), jnp.float32)],
        compiler_params=pltpu.CompilerParams(
            dimension_semantics=("parallel", "arbitrary")),
        cost_estimate=cost,
    )(A_bf16, x_bf16, w_pad, ep)


# ----------------------------------------------------------------------------
# Parameter init (deterministic, PyTorch-default-like), pre-packed into
# lane-padded, stacked kernel-ready arrays (no per-call padding).
# ----------------------------------------------------------------------------
def _init_linear(key, din, dout):
    k1, k2 = jax.random.split(key)
    bound = 1.0 / jnp.sqrt(jnp.float32(din))
    w = jax.random.uniform(k1, (din, dout), jnp.float32, -bound, bound)
    b = jax.random.uniform(k2, (dout,), jnp.float32, -bound, bound)
    return w, b


def _bn_fold(gamma, beta, mean, var, eps=1e-5):
    scale = gamma * jax.lax.rsqrt(var + eps)
    shift = beta - mean * scale
    return scale, shift


def _init_bn(key, dim):
    k1, k2 = jax.random.split(key)
    gamma = 1.0 + 0.1 * jax.random.normal(k1, (dim,), jnp.float32)
    beta = 0.1 * jax.random.normal(k2, (dim,), jnp.float32)
    mean = jnp.zeros((dim,), jnp.float32)
    var = jnp.ones((dim,), jnp.float32)
    return _bn_fold(gamma, beta, mean, var)


def _pad_w(w):
    din, dout = w.shape
    wp = jnp.zeros((DPAD, DPAD), jnp.float32).at[:din, :dout].set(w)
    return wp.astype(jnp.bfloat16)


def _pad_vec(v, fill):
    return jnp.full((DPAD,), fill, jnp.float32).at[:v.shape[0]].set(v)


def _pack_epilogue(b, sc, sh):
    # padded channels: bias 0, scale 1, shift 0  -> stay exactly zero
    return jnp.stack([_pad_vec(b, 0.0), _pad_vec(sc, 1.0), _pad_vec(sh, 0.0)])


def _pack_chain(layers):
    ws = jnp.stack([_pad_w(w) for (w, b, sc, sh) in layers])
    eps = jnp.stack([_pack_epilogue(b, sc, sh) for (w, b, sc, sh) in layers])
    return {"w": ws, "ep": eps}


def init_params(key):
    ks = iter(jax.random.split(key, 24))
    p = {}

    def mlp_stack(key, din, hid, dout, last_scale=None, last_shift=None):
        # torch_geometric MLP: [Linear, BN, ReLU] x 2, plain Linear last.
        dims = [din, hid, hid, dout]
        keys = jax.random.split(key, 6)
        layers = []
        for i in range(3):
            w, b = _init_linear(keys[2 * i], dims[i], dims[i + 1])
            if i < 2:
                sc, sh = _init_bn(keys[2 * i + 1], dims[i + 1])
            elif last_scale is not None:
                sc, sh = last_scale, last_shift          # external BN fused in
            else:
                sc = jnp.ones((dims[i + 1],), jnp.float32)
                sh = jnp.zeros((dims[i + 1],), jnp.float32)
            layers.append((w, b, sc, sh))
        return _pack_chain(layers)

    bn1_1 = _init_bn(next(ks), 7)
    bn1_2 = _init_bn(next(ks), 16)
    bn1_3 = _init_bn(next(ks), 16)
    bn1_4 = _init_bn(next(ks), 32)

    p["mlp1_1"] = mlp_stack(next(ks), 4, 64, 3)
    p["mlp1_2"] = mlp_stack(next(ks), 7, 64, 16, bn1_2[0], bn1_2[1])   # +bn1_2 fused
    p["mlp1_3"] = mlp_stack(next(ks), 16, 64, 32, bn1_4[0], bn1_4[1])  # +bn1_4 fused
    p["mlp1_4"] = mlp_stack(next(ks), 4, 64, 1)

    w, b = _init_linear(next(ks), 7, 7)
    p["gcn1"] = {"w": _pad_w(w), "ep": _pack_epilogue(b, bn1_1[0], bn1_1[1])}
    w, b = _init_linear(next(ks), 16, 16)
    p["gcn2"] = {"w": _pad_w(w), "ep": _pack_epilogue(b, bn1_3[0], bn1_3[1])}

    w, b = _init_linear(next(ks), 32, 1)
    p["lin1_1"] = _pack_chain(
        [(w, b, jnp.ones((1,), jnp.float32), jnp.zeros((1,), jnp.float32))])

    # bn1_5 / mlp1_5 / mlp1_6 / SelfAttention are defined in __init__ but never
    # used in Net.forward, so they are not instantiated here.
    return p


# ----------------------------------------------------------------------------
# Graph glue (plain JAX): dense GCN-normalized adjacency, built directly at
# the padded node count (padded nodes have zero rows/cols) and stored bf16.
# ----------------------------------------------------------------------------
def gcn_norm_dense(edge_index, edge_weight, num_nodes, n_pad):
    src, dst = edge_index[0], edge_index[1]
    loop = jnp.arange(num_nodes, dtype=src.dtype)
    src_all = jnp.concatenate([src, loop])
    dst_all = jnp.concatenate([dst, loop])
    w = jnp.concatenate([edge_weight.astype(jnp.float32),
                         jnp.ones((num_nodes,), jnp.float32)])
    deg = jnp.zeros((n_pad,), jnp.float32).at[dst_all].add(w)
    dinv = jnp.where(deg > 0, jax.lax.rsqrt(deg), 0.0)
    norm = dinv[src_all] * w * dinv[dst_all]
    A = jnp.zeros((n_pad, n_pad), jnp.float32).at[dst_all, src_all].add(norm)
    return A.astype(jnp.bfloat16)


# ----------------------------------------------------------------------------
# Forward pass
# ----------------------------------------------------------------------------
def net_forward(params, x, edge_index):
    n = x.shape[0]
    e = edge_index.shape[1]
    n_pad = _round_up(n, TM)
    e_pad = _round_up(e, TM)
    src, dst = edge_index[0], edge_index[1]

    # Pad node features ONCE to a lane-dense (n_pad, 128) slab.  Padded weight
    # rows are zero, so feeding all 7 channels to the 4-input MLP is exact.
    x_pad = jnp.zeros((n_pad, DPAD), jnp.float32).at[:n, :7].set(x[:, :7])

    # registration_dis = mlp1_1(x[:, 0:4])  -> per-node displacement [N, 3]
    disp = mlp_chain(x_pad, params["mlp1_1"]["w"], params["mlp1_1"]["ep"], _MLP3_CFG)

    # TODO(synk): `registration` is defined outside the module; approximated as
    # the per-edge residual between the displaced source position and the
    # target position, giving one [E, 3] feature per edge.
    reg3 = jnp.abs(x[src, 0:3] + disp[src, 0:3] - x[dst, 0:3])        # [E, 3]
    reg4 = jnp.concatenate([reg3, x[dst, 3:4]], axis=1)               # [E, 4]
    reg_pad = jnp.zeros((e_pad, DPAD), jnp.float32).at[:e, :4].set(reg4)

    # mlp1_4 then relu -> edge weights [E]
    ew = mlp_chain(reg_pad, params["mlp1_4"]["w"], params["mlp1_4"]["ep"],
                   _MLP3_RELU_CFG)[:e, 0]

    A = gcn_norm_dense(edge_index, ew, n, n_pad)                      # (n_pad, n_pad) bf16

    # conv1_1 + bn1_1 (fused epilogue)
    h = gcn_conv(A, x_pad.astype(jnp.bfloat16),
                 params["gcn1"]["w"], params["gcn1"]["ep"])
    # mlp1_2, relu, bn1_2 (all fused); output bf16 to feed the next aggregation
    h = mlp_chain(h, params["mlp1_2"]["w"], params["mlp1_2"]["ep"],
                  _MLP3_BN_CFG, out_dtype=jnp.bfloat16)
    # conv1_2 + bn1_3 (fused epilogue)
    h = gcn_conv(A, h, params["gcn2"]["w"], params["gcn2"]["ep"])
    # mlp1_3, relu, bn1_4 (all fused)
    h = mlp_chain(h, params["mlp1_3"]["w"], params["mlp1_3"]["ep"], _MLP3_BN_CFG)
    # sigmoid(lin1_1(h)) -> [N, 1]
    out = mlp_chain(h, params["lin1_1"]["w"], params["lin1_1"]["ep"], _LIN_SIG_CFG)
    return out[:n, :1]


# ----------------------------------------------------------------------------
if __name__ == "__main__":
    key = jax.random.PRNGKey(0)
    k_param, k_x, k_e = jax.random.split(key, 3)

    N, E = 16, 32
    x = jax.random.normal(k_x, (N, 7), jnp.float32)                   # data.x
    edge_index = jax.random.randint(k_e, (2, E), 0, N, jnp.int32)     # data.edge_index

    params = init_params(k_param)

    fwd = jax.jit(net_forward)
    out = fwd(params, x, edge_index)
    out = jax.block_until_ready(out)

    assert out.shape == (N, 1)
    assert bool(jnp.all(jnp.isfinite(out)))
    assert bool(jnp.all((out >= 0.0) & (out <= 1.0)))
    print("KERNEL_OK")
</pallas_src>

<mosaic_0001>
module attributes {stable_mosaic.version = 11 : i64} {
  func.func private @main(%arg0: i32) attributes {dimension_semantics = [#tpu.dimension_semantics<core_parallel>], iteration_bounds = array<i64: 2>, tpu.core_type = #tpu.core_type<sc_scalar_subcore>, window_params = []} {
    return
  }
}

module attributes {stable_mosaic.version = 11 : i64} {
  func.func private @main(%arg0: i32) attributes {dimension_semantics = [#tpu.dimension_semantics<core_parallel>], iteration_bounds = array<i64: 2>, tpu.core_type = #tpu.core_type<sc_scalar_subcore>, window_params = []} {
    return
  }
}

module attributes {stable_mosaic.version = 11 : i64} {
  func.func @_mlp_chain_kernel(%arg0: i32, %arg1: memref<128x128xf32, #tpu.memory_space<vmem>>, %arg2: memref<3x128x128xbf16, #tpu.memory_space<vmem>>, %arg3: memref<3x3x128xf32, #tpu.memory_space<vmem>>, %arg4: memref<128x128xf32, #tpu.memory_space<vmem>>) attributes {dimension_semantics = [#tpu.dimension_semantics<parallel>], iteration_bounds = array<i64: 1>, scalar_prefetch = 0 : i64, scratch_operands = 0 : i64, tpu.core_type = #tpu.core_type<tc>, window_params = [{transform_indices = @transform_0, window_bounds = array<i64: 128, 128>}, {pipeline_mode = #tpu.pipeline_mode<synchronous>, transform_indices = @transform_1, window_bounds = array<i64: 3, 128, 128>}, {pipeline_mode = #tpu.pipeline_mode<synchronous>, transform_indices = @transform_2, window_bounds = array<i64: 3, 3, 128>}, {transform_indices = @transform_3, window_bounds = array<i64: 128, 128>}]} {
    %c0 = arith.constant 0 : index
    %c0_0 = arith.constant 0 : index
    %0 = vector.load %arg1[%c0, %c0_0] : memref<128x128xf32, #tpu.memory_space<vmem>>, vector<128x128xf32>
    %c0_1 = arith.constant 0 : index
    %c0_2 = arith.constant 0 : index
    %c0_3 = arith.constant 0 : index
    %1 = vector.load %arg2[%c0_1, %c0_2, %c0_3] : memref<3x128x128xbf16, #tpu.memory_space<vmem>>, vector<1x128x128xbf16>
    %2 = vector.shape_cast %1 : vector<1x128x128xbf16> to vector<128x128xbf16>
    %c0_4 = arith.constant 0 : index
    %c0_5 = arith.constant 0 : index
    %c0_6 = arith.constant 0 : index
    %3 = vector.load %arg3[%c0_4, %c0_5, %c0_6] : memref<3x3x128xf32, #tpu.memory_space<vmem>>, vector<1x3x128xf32>
    %4 = vector.shape_cast %3 : vector<1x3x128xf32> to vector<3x128xf32>
    %5 = arith.truncf %0 : vector<128x128xf32> to vector<128x128xbf16>
    %cst = arith.constant dense<0.000000e+00> : vector<128x128xf32>
    %6 = tpu.matmul %5, %2, %cst {dimension_numbers = #tpu.dot_dimension_numbers<[1], [0], [0], [1], [0, 0, 1, 1], [], []>} : vector<128x128xbf16>, vector<128x128xbf16>, vector<128x128xf32> -> vector<128x128xf32>
    %7 = vector.extract_strided_slice %4 {offsets = [0, 0], sizes = [1, 128], strides = [1, 1]} : vector<3x128xf32> to vector<1x128xf32>
    %8 = vector.broadcast %7 : vector<1x128xf32> to vector<128x128xf32>
    %9 = arith.addf %6, %8 : vector<128x128xf32>
    %10 = vector.extract_strided_slice %4 {offsets = [1, 0], sizes = [1, 128], strides = [1, 1]} : vector<3x128xf32> to vector<1x128xf32>
    %11 = vector.broadcast %10 : vector<1x128xf32> to vector<128x128xf32>
    %12 = arith.mulf %9, %11 : vector<128x128xf32>
    %13 = vector.extract_strided_slice %4 {offsets = [2, 0], sizes = [1, 128], strides = [1, 1]} : vector<3x128xf32> to vector<1x128xf32>
    %14 = vector.broadcast %13 : vector<1x128xf32> to vector<128x128xf32>
    %15 = arith.addf %12, %14 : vector<128x128xf32>
    %cst_7 = arith.constant 0.000000e+00 : f32
    %16 = vector.broadcast %cst_7 : f32 to vector<128x128xf32>
    %17 = arith.maximumf %15, %16 : vector<128x128xf32>
    %c1 = arith.constant 1 : index
    %c0_8 = arith.constant 0 : index
    %c0_9 = arith.constant 0 : index
    %18 = vector.load %arg2[%c1, %c0_8, %c0_9] : memref<3x128x128xbf16, #tpu.memory_space<vmem>>, vector<1x128x128xbf16>
    %19 = vector.shape_cast %18 : vector<1x128x128xbf16> to vector<128x128xbf16>
    %c1_10 = arith.constant 1 : index
    %c0_11 = arith.constant 0 : index
    %c0_12 = arith.constant 0 : index
    %20 = vector.load %arg3[%c1_10, %c0_11, %c0_12] : memref<3x3x128xf32, #tpu.memory_space<vmem>>, vector<1x3x128xf32>
    %21 = vector.shape_cast %20 : vector<1x3x128xf32> to vector<3x128xf32>
    %22 = arith.truncf %17 : vector<128x128xf32> to vector<128x128xbf16>
    %cst_13 = arith.constant dense<0.000000e+00> : vector<128x128xf32>
    %23 = tpu.matmul %22, %19, %cst_13 {dimension_numbers = #tpu.dot_dimension_numbers<[1], [0], [0], [1], [0, 0, 1, 1], [], []>} : vector<128x128xbf16>, vector<128x128xbf16>, vector<128x128xf32> -> vector<128x128xf32>
    %24 = vector.extract_strided_slice %21 {offsets = [0, 0], sizes = [1, 128], strides = [1, 1]} : vector<3x128xf32> to vector<1x128xf32>
    %25 = vector.broadcast %24 : vector<1x128xf32> to vector<128x128xf32>
    %26 = arith.addf %23, %25 : vector<128x128xf32>
    %27 = vector.extract_strided_slice %21 {offsets = [1, 0], sizes = [1, 128], strides = [1, 1]} : vector<3x128xf32> to vector<1x128xf32>
    %28 = vector.broadcast %27 : vector<1x128xf32> to vector<128x128xf32>
    %29 = arith.mulf %26, %28 : vector<128x128xf32>
    %30 = vector.extract_strided_slice %21 {offsets = [2, 0], sizes = [1, 128], strides = [1, 1]} : vector<3x128xf32> to vector<1x128xf32>
    %31 = vector.broadcast %30 : vector<1x128xf32> to vector<128x128xf32>
    %32 = arith.addf %29, %31 : vector<128x128xf32>
    %cst_14 = arith.constant 0.000000e+00 : f32
    %33 = vector.broadcast %cst_14 : f32 to vector<128x128xf32>
    %34 = arith.maximumf %32, %33 : vector<128x128xf32>
    %c2 = arith.constant 2 : index
    %c0_15 = arith.constant 0 : index
    %c0_16 = arith.constant 0 : index
    %35 = vector.load %arg2[%c2, %c0_15, %c0_16] : memref<3x128x128xbf16, #tpu.memory_space<vmem>>, vector<1x128x128xbf16>
    %36 = vector.shape_cast %35 : vector<1x128x128xbf16> to vector<128x128xbf16>
    %c2_17 = arith.constant 2 : index
    %c0_18 = arith.constant 0 : index
    %c0_19 = arith.constant 0 : index
    %37 = vector.load %arg3[%c2_17, %c0_18, %c0_19] : memref<3x3x128xf32, #tpu.memory_space<vmem>>, vector<1x3x128xf32>
    %38 = vector.shape_cast %37 : vector<1x3x128xf32> to vector<3x128xf32>
    %39 = arith.truncf %34 : vector<128x128xf32> to vector<128x128xbf16>
    %cst_20 = arith.constant dense<0.000000e+00> : vector<128x128xf32>
    %40 = tpu.matmul %39, %36, %cst_20 {dimension_numbers = #tpu.dot_dimension_numbers<[1], [0], [0], [1], [0, 0, 1, 1], [], []>} : vector<128x128xbf16>, vector<128x128xbf16>, vector<128x128xf32> -> vector<128x128xf32>
    %41 = vector.extract_strided_slice %38 {offsets = [0, 0], sizes = [1, 128], strides = [1, 1]} : vector<3x128xf32> to vector<1x128xf32>
    %42 = vector.broadcast %41 : vector<1x128xf32> to vector<128x128xf32>
    %43 = arith.addf %40, %42 : vector<128x128xf32>
    %44 = vector.extract_strided_slice %38 {offsets = [1, 0], sizes = [1, 128], strides = [1, 1]} : vector<3x128xf32> to vector<1x128xf32>
    %45 = vector.broadcast %44 : vector<1x128xf32> to vector<128x128xf32>
    %46 = arith.mulf %43, %45 : vector<128x128xf32>
    %47 = vector.extract_strided_slice %38 {offsets = [2, 0], sizes = [1, 128], strides = [1, 1]} : vector<3x128xf32> to vector<1x128xf32>
    %48 = vector.broadcast %47 : vector<1x128xf32> to vector<128x128xf32>
    %49 = arith.addf %46, %48 : vector<128x128xf32>
    %c0_21 = arith.constant 0 : index
    %c0_22 = arith.constant 0 : index
    %50 = vector.load %arg4[%c0_21, %c0_22] : memref<128x128xf32, #tpu.memory_space<vmem>>, vector<128x128xf32>
    tpu.vector_store %arg4[%c0_21, %c0_22], %49 {strides = array<i32>} : memref<128x128xf32, #tpu.memory_space<vmem>>, vector<128x128xf32>,
    return
  }
  func.func @transform_0(%arg0: i32) -> (i32, i32) {
    %c0_i32 = arith.constant 0 : i32
    %c0_i32_0 = arith.constant 0 : i32
    return %arg0, %c0_i32 : i32, i32
  }
  func.func @transform_1(%arg0: i32) -> (i32, i32, i32) {
    %c0_i32 = arith.constant 0 : i32
    %c0_i32_0 = arith.constant 0 : i32
    %c0_i32_1 = arith.constant 0 : i32
    %c0_i32_2 = arith.constant 0 : i32
    return %c0_i32, %c0_i32_0, %c0_i32_1 : i32, i32, i32
  }
  func.func @transform_2(%arg0: i32) -> (i32, i32, i32) {
    %c0_i32 = arith.constant 0 : i32
    %c0_i32_0 = arith.constant 0 : i32
    %c0_i32_1 = arith.constant 0 : i32
    %c0_i32_2 = arith.constant 0 : i32
    return %c0_i32, %c0_i32_0, %c0_i32_1 : i32, i32, i32
  }
  func.func @transform_3(%arg0: i32) -> (i32, i32) {
    %c0_i32 = arith.constant 0 : i32
    %c0_i32_0 = arith.constant 0 : i32
    return %arg0, %c0_i32 : i32, i32
  }
}

module attributes {stable_mosaic.version = 11 : i64} {
  func.func @_mlp_chain_kernel(%arg0: i32, %arg1: memref<128x128xf32, #tpu.memory_space<vmem>>, %arg2: memref<3x128x128xbf16, #tpu.memory_space<vmem>>, %arg3: memref<3x3x128xf32, #tpu.memory_space<vmem>>, %arg4: memref<128x128xf32, #tpu.memory_space<vmem>>) attributes {dimension_semantics = [#tpu.dimension_semantics<parallel>], iteration_bounds = array<i64: 1>, scalar_prefetch = 0 : i64, scratch_operands = 0 : i64, tpu.core_type = #tpu.core_type<tc>, window_params = [{transform_indices = @transform_0, window_bounds = array<i64: 128, 128>}, {pipeline_mode = #tpu.pipeline_mode<synchronous>, transform_indices = @transform_1, window_bounds = array<i64: 3, 128, 128>}, {pipeline_mode = #tpu.pipeline_mode<synchronous>, transform_indices = @transform_2, window_bounds = array<i64: 3, 3, 128>}, {transform_indices = @transform_3, window_bounds = array<i64: 128, 128>}]} {
    %c0 = arith.constant 0 : index
    %c0_0 = arith.constant 0 : index
    %0 = vector.load %arg1[%c0, %c0_0] : memref<128x128xf32, #tpu.memory_space<vmem>>, vector<128x128xf32>
    %c0_1 = arith.constant 0 : index
    %c0_2 = arith.constant 0 : index
    %c0_3 = arith.constant 0 : index
    %1 = vector.load %arg2[%c0_1, %c0_2, %c0_3] : memref<3x128x128xbf16, #tpu.memory_space<vmem>>, vector<1x128x128xbf16>
    %2 = vector.shape_cast %1 : vector<1x128x128xbf16> to vector<128x128xbf16>
    %c0_4 = arith.constant 0 : index
    %c0_5 = arith.constant 0 : index
    %c0_6 = arith.constant 0 : index
    %3 = vector.load %arg3[%c0_4, %c0_5, %c0_6] : memref<3x3x128xf32, #tpu.memory_space<vmem>>, vector<1x3x128xf32>
    %4 = vector.shape_cast %3 : vector<1x3x128xf32> to vector<3x128xf32>
    %5 = arith.truncf %0 : vector<128x128xf32> to vector<128x128xbf16>
    %cst = arith.constant dense<0.000000e+00> : vector<128x128xf32>
    %6 = tpu.matmul %5, %2, %cst {dimension_numbers = #tpu.dot_dimension_numbers<[1], [0], [0], [1], [0, 0, 1, 1], [], []>} : vector<128x128xbf16>, vector<128x128xbf16>, vector<128x128xf32> -> vector<128x128xf32>
    %7 = vector.extract_strided_slice %4 {offsets = [0, 0], sizes = [1, 128], strides = [1, 1]} : vector<3x128xf32> to vector<1x128xf32>
    %8 = vector.broadcast %7 : vector<1x128xf32> to vector<128x128xf32>
    %9 = arith.addf %6, %8 : vector<128x128xf32>
    %10 = vector.extract_strided_slice %4 {offsets = [1, 0], sizes = [1, 128], strides = [1, 1]} : vector<3x128xf32> to vector<1x128xf32>
    %11 = vector.broadcast %10 : vector<1x128xf32> to vector<128x128xf32>
    %12 = arith.mulf %9, %11 : vector<128x128xf32>
    %13 = vector.extract_strided_slice %4 {offsets = [2, 0], sizes = [1, 128], strides = [1, 1]} : vector<3x128xf32> to vector<1x128xf32>
    %14 = vector.broadcast %13 : vector<1x128xf32> to vector<128x128xf32>
    %15 = arith.addf %12, %14 : vector<128x128xf32>
    %cst_7 = arith.constant 0.000000e+00 : f32
    %16 = vector.broadcast %cst_7 : f32 to vector<128x128xf32>
    %17 = arith.maximumf %15, %16 : vector<128x128xf32>
    %c1 = arith.constant 1 : index
    %c0_8 = arith.constant 0 : index
    %c0_9 = arith.constant 0 : index
    %18 = vector.load %arg2[%c1, %c0_8, %c0_9] : memref<3x128x128xbf16, #tpu.memory_space<vmem>>, vector<1x128x128xbf16>
    %19 = vector.shape_cast %18 : vector<1x128x128xbf16> to vector<128x128xbf16>
    %c1_10 = arith.constant 1 : index
    %c0_11 = arith.constant 0 : index
    %c0_12 = arith.constant 0 : index
    %20 = vector.load %arg3[%c1_10, %c0_11, %c0_12] : memref<3x3x128xf32, #tpu.memory_space<vmem>>, vector<1x3x128xf32>
    %21 = vector.shape_cast %20 : vector<1x3x128xf32> to vector<3x128xf32>
    %22 = arith.truncf %17 : vector<128x128xf32> to vector<128x128xbf16>
    %cst_13 = arith.constant dense<0.000000e+00> : vector<128x128xf32>
    %23 = tpu.matmul %22, %19, %cst_13 {dimension_numbers = #tpu.dot_dimension_numbers<[1], [0], [0], [1], [0, 0, 1, 1], [], []>} : vector<128x128xbf16>, vector<128x128xbf16>, vector<128x128xf32> -> vector<128x128xf32>
    %24 = vector.extract_strided_slice %21 {offsets = [0, 0], sizes = [1, 128], strides = [1, 1]} : vector<3x128xf32> to vector<1x128xf32>
    %25 = vector.broadcast %24 : vector<1x128xf32> to vector<128x128xf32>
    %26 = arith.addf %23, %25 : vector<128x128xf32>
    %27 = vector.extract_strided_slice %21 {offsets = [1, 0], sizes = [1, 128], strides = [1, 1]} : vector<3x128xf32> to vector<1x128xf32>
    %28 = vector.broadcast %27 : vector<1x128xf32> to vector<128x128xf32>
    %29 = arith.mulf %26, %28 : vector<128x128xf32>
    %30 = vector.extract_strided_slice %21 {offsets = [2, 0], sizes = [1, 128], strides = [1, 1]} : vector<3x128xf32> to vector<1x128xf32>
    %31 = vector.broadcast %30 : vector<1x128xf32> to vector<128x128xf32>
    %32 = arith.addf %29, %31 : vector<128x128xf32>
    %cst_14 = arith.constant 0.000000e+00 : f32
    %33 = vector.broadcast %cst_14 : f32 to vector<128x128xf32>
    %34 = arith.maximumf %32, %33 : vector<128x128xf32>
    %c2 = arith.constant 2 : index
    %c0_15 = arith.constant 0 : index
    %c0_16 = arith.constant 0 : index
    %35 = vector.load %arg2[%c2, %c0_15, %c0_16] : memref<3x128x128xbf16, #tpu.memory_space<vmem>>, vector<1x128x128xbf16>
    %36 = vector.shape_cast %35 : vector<1x128x128xbf16> to vector<128x128xbf16>
    %c2_17 = arith.constant 2 : index
    %c0_18 = arith.constant 0 : index
    %c0_19 = arith.constant 0 : index
    %37 = vector.load %arg3[%c2_17, %c0_18, %c0_19] : memref<3x3x128xf32, #tpu.memory_space<vmem>>, vector<1x3x128xf32>
    %38 = vector.shape_cast %37 : vector<1x3x128xf32> to vector<3x128xf32>
    %39 = arith.truncf %34 : vector<128x128xf32> to vector<128x128xbf16>
    %cst_20 = arith.constant dense<0.000000e+00> : vector<128x128xf32>
    %40 = tpu.matmul %39, %36, %cst_20 {dimension_numbers = #tpu.dot_dimension_numbers<[1], [0], [0], [1], [0, 0, 1, 1], [], []>} : vector<128x128xbf16>, vector<128x128xbf16>, vector<128x128xf32> -> vector<128x128xf32>
    %41 = vector.extract_strided_slice %38 {offsets = [0, 0], sizes = [1, 128], strides = [1, 1]} : vector<3x128xf32> to vector<1x128xf32>
    %42 = vector.broadcast %41 : vector<1x128xf32> to vector<128x128xf32>
    %43 = arith.addf %40, %42 : vector<128x128xf32>
    %44 = vector.extract_strided_slice %38 {offsets = [1, 0], sizes = [1, 128], strides = [1, 1]} : vector<3x128xf32> to vector<1x128xf32>
    %45 = vector.broadcast %44 : vector<1x128xf32> to vector<128x128xf32>
    %46 = arith.mulf %43, %45 : vector<128x128xf32>
    %47 = vector.extract_strided_slice %38 {offsets = [2, 0], sizes = [1, 128], strides = [1, 1]} : vector<3x128xf32> to vector<1x128xf32>
    %48 = vector.broadcast %47 : vector<1x128xf32> to vector<128x128xf32>
    %49 = arith.addf %46, %48 : vector<128x128xf32>
    %cst_21 = arith.constant 0.000000e+00 : f32
    %50 = vector.broadcast %cst_21 : f32 to vector<128x128xf32>
    %51 = arith.maximumf %49, %50 : vector<128x128xf32>
    %c0_22 = arith.constant 0 : index
    %c0_23 = arith.constant 0 : index
    %52 = vector.load %arg4[%c0_22, %c0_23] : memref<128x128xf32, #tpu.memory_space<vmem>>, vector<128x128xf32>
    tpu.vector_store %arg4[%c0_22, %c0_23], %51 {strides = array<i32>} : memref<128x128xf32, #tpu.memory_space<vmem>>, vector<128x128xf32>,
    return
  }
  func.func @transform_0(%arg0: i32) -> (i32, i32) {
    %c0_i32 = arith.constant 0 : i32
    %c0_i32_0 = arith.constant 0 : i32
    return %arg0, %c0_i32 : i32, i32
  }
  func.func @transform_1(%arg0: i32) -> (i32, i32, i32) {
    %c0_i32 = arith.constant 0 : i32
    %c0_i32_0 = arith.constant 0 : i32
    %c0_i32_1 = arith.constant 0 : i32
    %c0_i32_2 = arith.constant 0 : i32
    return %c0_i32, %c0_i32_0, %c0_i32_1 : i32, i32, i32
  }
  func.func @transform_2(%arg0: i32) -> (i32, i32, i32) {
    %c0_i32 = arith.constant 0 : i32
    %c0_i32_0 = arith.constant 0 : i32
    %c0_i32_1 = arith.constant 0 : i32
    %c0_i32_2 = arith.constant 0 : i32
    return %c0_i32, %c0_i32_0, %c0_i32_1 : i32, i32, i32
  }
  func.func @transform_3(%arg0: i32) -> (i32, i32) {
    %c0_i32 = arith.constant 0 : i32
    %c0_i32_0 = arith.constant 0 : i32
    return %arg0, %c0_i32 : i32, i32
  }
}

module attributes {stable_mosaic.version = 11 : i64} {
  func.func @_mlp_chain_kernel(%arg0: i32, %arg1: memref<128x128xf32, #tpu.memory_space<vmem>>, %arg2: memref<3x128x128xbf16, #tpu.memory_space<vmem>>, %arg3: memref<3x3x128xf32, #tpu.memory_space<vmem>>, %arg4: memref<128x128xbf16, #tpu.memory_space<vmem>>) attributes {dimension_semantics = [#tpu.dimension_semantics<parallel>], iteration_bounds = array<i64: 1>, scalar_prefetch = 0 : i64, scratch_operands = 0 : i64, tpu.core_type = #tpu.core_type<tc>, window_params = [{transform_indices = @transform_0, window_bounds = array<i64: 128, 128>}, {pipeline_mode = #tpu.pipeline_mode<synchronous>, transform_indices = @transform_1, window_bounds = array<i64: 3, 128, 128>}, {pipeline_mode = #tpu.pipeline_mode<synchronous>, transform_indices = @transform_2, window_bounds = array<i64: 3, 3, 128>}, {transform_indices = @transform_3, window_bounds = array<i64: 128, 128>}]} {
    %c0 = arith.constant 0 : index
    %c0_0 = arith.constant 0 : index
    %0 = vector.load %arg1[%c0, %c0_0] : memref<128x128xf32, #tpu.memory_space<vmem>>, vector<128x128xf32>
    %c0_1 = arith.constant 0 : index
    %c0_2 = arith.constant 0 : index
    %c0_3 = arith.constant 0 : index
    %1 = vector.load %arg2[%c0_1, %c0_2, %c0_3] : memref<3x128x128xbf16, #tpu.memory_space<vmem>>, vector<1x128x128xbf16>
    %2 = vector.shape_cast %1 : vector<1x128x128xbf16> to vector<128x128xbf16>
    %c0_4 = arith.constant 0 : index
    %c0_5 = arith.constant 0 : index
    %c0_6 = arith.constant 0 : index
    %3 = vector.load %arg3[%c0_4, %c0_5, %c0_6] : memref<3x3x128xf32, #tpu.memory_space<vmem>>, vector<1x3x128xf32>
    %4 = vector.shape_cast %3 : vector<1x3x128xf32> to vector<3x128xf32>
    %5 = arith.truncf %0 : vector<128x128xf32> to vector<128x128xbf16>
    %cst = arith.constant dense<0.000000e+00> : vector<128x128xf32>
    %6 = tpu.matmul %5, %2, %cst {dimension_numbers = #tpu.dot_dimension_numbers<[1], [0], [0], [1], [0, 0, 1, 1], [], []>} : vector<128x128xbf16>, vector<128x128xbf16>, vector<128x128xf32> -> vector<128x128xf32>
    %7 = vector.extract_strided_slice %4 {offsets = [0, 0], sizes = [1, 128], strides = [1, 1]} : vector<3x128xf32> to vector<1x128xf32>
    %8 = vector.broadcast %7 : vector<1x128xf32> to vector<128x128xf32>
    %9 = arith.addf %6, %8 : vector<128x128xf32>
    %10 = vector.extract_strided_slice %4 {offsets = [1, 0], sizes = [1, 128], strides = [1, 1]} : vector<3x128xf32> to vector<1x128xf32>
    %11 = vector.broadcast %10 : vector<1x128xf32> to vector<128x128xf32>
    %12 = arith.mulf %9, %11 : vector<128x128xf32>
    %13 = vector.extract_strided_slice %4 {offsets = [2, 0], sizes = [1, 128], strides = [1, 1]} : vector<3x128xf32> to vector<1x128xf32>
    %14 = vector.broadcast %13 : vector<1x128xf32> to vector<128x128xf32>
    %15 = arith.addf %12, %14 : vector<128x128xf32>
    %cst_7 = arith.constant 0.000000e+00 : f32
    %16 = vector.broadcast %cst_7 : f32 to vector<128x128xf32>
    %17 = arith.maximumf %15, %16 : vector<128x128xf32>
    %c1 = arith.constant 1 : index
    %c0_8 = arith.constant 0 : index
    %c0_9 = arith.constant 0 : index
    %18 = vector.load %arg2[%c1, %c0_8, %c0_9] : memref<3x128x128xbf16, #tpu.memory_space<vmem>>, vector<1x128x128xbf16>
    %19 = vector.shape_cast %18 : vector<1x128x128xbf16> to vector<128x128xbf16>
    %c1_10 = arith.constant 1 : index
    %c0_11 = arith.constant 0 : index
    %c0_12 = arith.constant 0 : index
    %20 = vector.load %arg3[%c1_10, %c0_11, %c0_12] : memref<3x3x128xf32, #tpu.memory_space<vmem>>, vector<1x3x128xf32>
    %21 = vector.shape_cast %20 : vector<1x3x128xf32> to vector<3x128xf32>
    %22 = arith.truncf %17 : vector<128x128xf32> to vector<128x128xbf16>
    %cst_13 = arith.constant dense<0.000000e+00> : vector<128x128xf32>
    %23 = tpu.matmul %22, %19, %cst_13 {dimension_numbers = #tpu.dot_dimension_numbers<[1], [0], [0], [1], [0, 0, 1, 1], [], []>} : vector<128x128xbf16>, vector<128x128xbf16>, vector<128x128xf32> -> vector<128x128xf32>
    %24 = vector.extract_strided_slice %21 {offsets = [0, 0], sizes = [1, 128], strides = [1, 1]} : vector<3x128xf32> to vector<1x128xf32>
    %25 = vector.broadcast %24 : vector<1x128xf32> to vector<128x128xf32>
    %26 = arith.addf %23, %25 : vector<128x128xf32>
    %27 = vector.extract_strided_slice %21 {offsets = [1, 0], sizes = [1, 128], strides = [1, 1]} : vector<3x128xf32> to vector<1x128xf32>
    %28 = vector.broadcast %27 : vector<1x128xf32> to vector<128x128xf32>
    %29 = arith.mulf %26, %28 : vector<128x128xf32>
    %30 = vector.extract_strided_slice %21 {offsets = [2, 0], sizes = [1, 128], strides = [1, 1]} : vector<3x128xf32> to vector<1x128xf32>
    %31 = vector.broadcast %30 : vector<1x128xf32> to vector<128x128xf32>
    %32 = arith.addf %29, %31 : vector<128x128xf32>
    %cst_14 = arith.constant 0.000000e+00 : f32
    %33 = vector.broadcast %cst_14 : f32 to vector<128x128xf32>
    %34 = arith.maximumf %32, %33 : vector<128x128xf32>
    %c2 = arith.constant 2 : index
    %c0_15 = arith.constant 0 : index
    %c0_16 = arith.constant 0 : index
    %35 = vector.load %arg2[%c2, %c0_15, %c0_16] : memref<3x128x128xbf16, #tpu.memory_space<vmem>>, vector<1x128x128xbf16>
    %36 = vector.shape_cast %35 : vector<1x128x128xbf16> to vector<128x128xbf16>
    %c2_17 = arith.constant 2 : index
    %c0_18 = arith.constant 0 : index
    %c0_19 = arith.constant 0 : index
    %37 = vector.load %arg3[%c2_17, %c0_18, %c0_19] : memref<3x3x128xf32, #tpu.memory_space<vmem>>, vector<1x3x128xf32>
    %38 = vector.shape_cast %37 : vector<1x3x128xf32> to vector<3x128xf32>
    %39 = arith.truncf %34 : vector<128x128xf32> to vector<128x128xbf16>
    %cst_20 = arith.constant dense<0.000000e+00> : vector<128x128xf32>
    %40 = tpu.matmul %39, %36, %cst_20 {dimension_numbers = #tpu.dot_dimension_numbers<[1], [0], [0], [1], [0, 0, 1, 1], [], []>} : vector<128x128xbf16>, vector<128x128xbf16>, vector<128x128xf32> -> vector<128x128xf32>
    %41 = vector.extract_strided_slice %38 {offsets = [0, 0], sizes = [1, 128], strides = [1, 1]} : vector<3x128xf32> to vector<1x128xf32>
    %42 = vector.broadcast %41 : vector<1x128xf32> to vector<128x128xf32>
    %43 = arith.addf %40, %42 : vector<128x128xf32>
    %cst_21 = arith.constant 0.000000e+00 : f32
    %44 = vector.broadcast %cst_21 : f32 to vector<128x128xf32>
    %45 = arith.maximumf %43, %44 : vector<128x128xf32>
    %46 = vector.extract_strided_slice %38 {offsets = [1, 0], sizes = [1, 128], strides = [1, 1]} : vector<3x128xf32> to vector<1x128xf32>
    %47 = vector.broadcast %46 : vector<1x128xf32> to vector<128x128xf32>
    %48 = arith.mulf %45, %47 : vector<128x128xf32>
    %49 = vector.extract_strided_slice %38 {offsets = [2, 0], sizes = [1, 128], strides = [1, 1]} : vector<3x128xf32> to vector<1x128xf32>
    %50 = vector.broadcast %49 : vector<1x128xf32> to vector<128x128xf32>
    %51 = arith.addf %48, %50 : vector<128x128xf32>
    %52 = arith.truncf %51 : vector<128x128xf32> to vector<128x128xbf16>
    %c0_22 = arith.constant 0 : index
    %c0_23 = arith.constant 0 : index
    %53 = vector.load %arg4[%c0_22, %c0_23] : memref<128x128xbf16, #tpu.memory_space<vmem>>, vector<128x128xbf16>
    tpu.vector_store %arg4[%c0_22, %c0_23], %52 {strides = array<i32>} : memref<128x128xbf16, #tpu.memory_space<vmem>>, vector<128x128xbf16>,
    return
  }
  func.func @transform_0(%arg0: i32) -> (i32, i32) {
    %c0_i32 = arith.constant 0 : i32
    %c0_i32_0 = arith.constant 0 : i32
    return %arg0, %c0_i32 : i32, i32
  }
  func.func @transform_1(%arg0: i32) -> (i32, i32, i32) {
    %c0_i32 = arith.constant 0 : i32
    %c0_i32_0 = arith.constant 0 : i32
    %c0_i32_1 = arith.constant 0 : i32
    %c0_i32_2 = arith.constant 0 : i32
    return %c0_i32, %c0_i32_0, %c0_i32_1 : i32, i32, i32
  }
  func.func @transform_2(%arg0: i32) -> (i32, i32, i32) {
    %c0_i32 = arith.constant 0 : i32
    %c0_i32_0 = arith.constant 0 : i32
    %c0_i32_1 = arith.constant 0 : i32
    %c0_i32_2 = arith.constant 0 : i32
    return %c0_i32, %c0_i32_0, %c0_i32_1 : i32, i32, i32
  }
  func.func @transform_3(%arg0: i32) -> (i32, i32) {
    %c0_i32 = arith.constant 0 : i32
    %c0_i32_0 = arith.constant 0 : i32
    return %arg0, %c0_i32 : i32, i32
  }
}

module attributes {stable_mosaic.version = 11 : i64} {
  func.func @_gcn_kernel(%arg0: i32, %arg1: i32, %arg2: memref<128x128xbf16, #tpu.memory_space<vmem>>, %arg3: memref<128x128xbf16, #tpu.memory_space<vmem>>, %arg4: memref<128x128xbf16, #tpu.memory_space<vmem>>, %arg5: memref<3x128xf32, #tpu.memory_space<vmem>>, %arg6: memref<128x128xf32, #tpu.memory_space<vmem>>, %arg7: memref<128x128xf32, #tpu.memory_space<vmem>>) attributes {dimension_semantics = [#tpu.dimension_semantics<parallel>, #tpu.dimension_semantics<arbitrary>], iteration_bounds = array<i64: 1, 1>, scalar_prefetch = 0 : i64, scratch_operands = 1 : i64, tpu.core_type = #tpu.core_type<tc>, window_params = [{transform_indices = @transform_0, window_bounds = array<i64: 128, 128>}, {transform_indices = @transform_1, window_bounds = array<i64: 128, 128>}, {pipeline_mode = #tpu.pipeline_mode<synchronous>, transform_indices = @transform_2, window_bounds = array<i64: 128, 128>}, {pipeline_mode = #tpu.pipeline_mode<synchronous>, transform_indices = @transform_3, window_bounds = array<i64: 3, 128>}, {transform_indices = @transform_4, window_bounds = array<i64: 128, 128>}]} {
    %c0_i32 = arith.constant 0 : i32
    %0 = arith.cmpi eq, %arg1, %c0_i32 : i32
    %1 = arith.extui %0 : i1 to i32
    %c0_i32_0 = arith.constant 0 : i32
    %2 = arith.cmpi ne, %1, %c0_i32_0 : i32
    scf.if %2 {
      %cst_10 = arith.constant 0.000000e+00 : f32
      %12 = vector.broadcast %cst_10 : f32 to vector<128x128xf32>
      %c0_11 = arith.constant 0 : index
      %c0_12 = arith.constant 0 : index
      %13 = vector.load %arg7[%c0_11, %c0_12] : memref<128x128xf32, #tpu.memory_space<vmem>>, vector<128x128xf32>
      tpu.vector_store %arg7[%c0_11, %c0_12], %12 {strides = array<i32>} : memref<128x128xf32, #tpu.memory_space<vmem>>, vector<128x128xf32>,
    } else {
    }
    %c0 = arith.constant 0 : index
    %c0_1 = arith.constant 0 : index
    %3 = vector.load %arg7[%c0, %c0_1] : memref<128x128xf32, #tpu.memory_space<vmem>>, vector<128x128xf32>
    %c0_2 = arith.constant 0 : index
    %c0_3 = arith.constant 0 : index
    %4 = vector.load %arg2[%c0_2, %c0_3] : memref<128x128xbf16, #tpu.memory_space<vmem>>, vector<128x128xbf16>
    %c0_4 = arith.constant 0 : index
    %c0_5 = arith.constant 0 : index
    %5 = vector.load %arg3[%c0_4, %c0_5] : memref<128x128xbf16, #tpu.memory_space<vmem>>, vector<128x128xbf16>
    %cst = arith.constant dense<0.000000e+00> : vector<128x128xf32>
    %6 = tpu.matmul %4, %5, %cst {dimension_numbers = #tpu.dot_dimension_numbers<[1], [0], [0], [1], [0, 0, 1, 1], [], []>} : vector<128x128xbf16>, vector<128x128xbf16>, vector<128x128xf32> -> vector<128x128xf32>
    %7 = arith.addf %3, %6 : vector<128x128xf32>
    %c0_6 = arith.constant 0 : index
    %c0_7 = arith.constant 0 : index
    %8 = vector.load %arg7[%c0_6, %c0_7] : memref<128x128xf32, #tpu.memory_space<vmem>>, vector<128x128xf32>
    tpu.vector_store %arg7[%c0_6, %c0_7], %7 {strides = array<i32>} : memref<128x128xf32, #tpu.memory_space<vmem>>, vector<128x128xf32>,
    %c0_i32_8 = arith.constant 0 : i32
    %9 = arith.cmpi eq, %arg1, %c0_i32_8 : i32
    %10 = arith.extui %9 : i1 to i32
    %c0_i32_9 = arith.constant 0 : i32
    %11 = arith.cmpi ne, %10, %c0_i32_9 : i32
    scf.if %11 {
      %c0_10 = arith.constant 0 : index
      %c0_11 = arith.constant 0 : index
      %12 = vector.load %arg5[%c0_10, %c0_11] : memref<3x128xf32, #tpu.memory_space<vmem>>, vector<3x128xf32>
      %c0_12 = arith.constant 0 : index
      %c0_13 = arith.constant 0 : index
      %13 = vector.load %arg7[%c0_12, %c0_13] : memref<128x128xf32, #tpu.memory_space<vmem>>, vector<128x128xf32>
      %14 = arith.truncf %13 : vector<128x128xf32> to vector<128x128xbf16>
      %c0_14 = arith.constant 0 : index
      %c0_15 = arith.constant 0 : index
      %15 = vector.load %arg4[%c0_14, %c0_15] : memref<128x128xbf16, #tpu.memory_space<vmem>>, vector<128x128xbf16>
      %cst_16 = arith.constant dense<0.000000e+00> : vector<128x128xf32>
      %16 = tpu.matmul %14, %15, %cst_16 {dimension_numbers = #tpu.dot_dimension_numbers<[1], [0], [0], [1], [0, 0, 1, 1], [], []>} : vector<128x128xbf16>, vector<128x128xbf16>, vector<128x128xf32> -> vector<128x128xf32>
      %17 = vector.extract_strided_slice %12 {offsets = [0, 0], sizes = [1, 128], strides = [1, 1]} : vector<3x128xf32> to vector<1x128xf32>
      %18 = vector.broadcast %17 : vector<1x128xf32> to vector<128x128xf32>
      %19 = arith.addf %16, %18 : vector<128x128xf32>
      %20 = vector.extract_strided_slice %12 {offsets = [1, 0], sizes = [1, 128], strides = [1, 1]} : vector<3x128xf32> to vector<1x128xf32>
      %21 = vector.broadcast %20 : vector<1x128xf32> to vector<128x128xf32>
      %22 = arith.mulf %19, %21 : vector<128x128xf32>
      %23 = vector.extract_strided_slice %12 {offsets = [2, 0], sizes = [1, 128], strides = [1, 1]} : vector<3x128xf32> to vector<1x128xf32>
      %24 = vector.broadcast %23 : vector<1x128xf32> to vector<128x128xf32>
      %25 = arith.addf %22, %24 : vector<128x128xf32>
      %c0_17 = arith.constant 0 : index
      %c0_18 = arith.constant 0 : index
      %26 = vector.load %arg6[%c0_17, %c0_18] : memref<128x128xf32, #tpu.memory_space<vmem>>, vector<128x128xf32>
      tpu.vector_store %arg6[%c0_17, %c0_18], %25 {strides = array<i32>} : memref<128x128xf32, #tpu.memory_space<vmem>>, vector<128x128xf32>,
    } else {
    }
    return
  }
  func.func @transform_0(%arg0: i32, %arg1: i32) -> (i32, i32) {
    %c0_i32 = arith.constant 0 : i32
    return %arg0, %arg1 : i32, i32
  }
  func.func @transform_1(%arg0: i32, %arg1: i32) -> (i32, i32) {
    %c0_i32 = arith.constant 0 : i32
    %c0_i32_0 = arith.constant 0 : i32
    return %arg1, %c0_i32 : i32, i32
  }
  func.func @transform_2(%arg0: i32, %arg1: i32) -> (i32, i32) {
    %c0_i32 = arith.constant 0 : i32
    %c0_i32_0 = arith.constant 0 : i32
    %c0_i32_1 = arith.constant 0 : i32
    return %c0_i32, %c0_i32_0 : i32, i32
  }
  func.func @transform_3(%arg0: i32, %arg1: i32) -> (i32, i32) {
    %c0_i32 = arith.constant 0 : i32
    %c0_i32_0 = arith.constant 0 : i32
    %c0_i32_1 = arith.constant 0 : i32
    return %c0_i32, %c0_i32_0 : i32, i32
  }
  func.func @transform_4(%arg0: i32, %arg1: i32) -> (i32, i32) {
    %c0_i32 = arith.constant 0 : i32
    %c0_i32_0 = arith.constant 0 : i32
    return %arg0, %c0_i32 : i32, i32
  }
}

module attributes {stable_mosaic.version = 11 : i64} {
  func.func @_mlp_chain_kernel(%arg0: i32, %arg1: memref<128x128xf32, #tpu.memory_space<vmem>>, %arg2: memref<3x128x128xbf16, #tpu.memory_space<vmem>>, %arg3: memref<3x3x128xf32, #tpu.memory_space<vmem>>, %arg4: memref<128x128xf32, #tpu.memory_space<vmem>>) attributes {dimension_semantics = [#tpu.dimension_semantics<parallel>], iteration_bounds = array<i64: 1>, scalar_prefetch = 0 : i64, scratch_operands = 0 : i64, tpu.core_type = #tpu.core_type<tc>, window_params = [{transform_indices = @transform_0, window_bounds = array<i64: 128, 128>}, {pipeline_mode = #tpu.pipeline_mode<synchronous>, transform_indices = @transform_1, window_bounds = array<i64: 3, 128, 128>}, {pipeline_mode = #tpu.pipeline_mode<synchronous>, transform_indices = @transform_2, window_bounds = array<i64: 3, 3, 128>}, {transform_indices = @transform_3, window_bounds = array<i64: 128, 128>}]} {
    %c0 = arith.constant 0 : index
    %c0_0 = arith.constant 0 : index
    %0 = vector.load %arg1[%c0, %c0_0] : memref<128x128xf32, #tpu.memory_space<vmem>>, vector<128x128xf32>
    %c0_1 = arith.constant 0 : index
    %c0_2 = arith.constant 0 : index
    %c0_3 = arith.constant 0 : index
    %1 = vector.load %arg2[%c0_1, %c0_2, %c0_3] : memref<3x128x128xbf16, #tpu.memory_space<vmem>>, vector<1x128x128xbf16>
    %2 = vector.shape_cast %1 : vector<1x128x128xbf16> to vector<128x128xbf16>
    %c0_4 = arith.constant 0 : index
    %c0_5 = arith.constant 0 : index
    %c0_6 = arith.constant 0 : index
    %3 = vector.load %arg3[%c0_4, %c0_5, %c0_6] : memref<3x3x128xf32, #tpu.memory_space<vmem>>, vector<1x3x128xf32>
    %4 = vector.shape_cast %3 : vector<1x3x128xf32> to vector<3x128xf32>
    %5 = arith.truncf %0 : vector<128x128xf32> to vector<128x128xbf16>
    %cst = arith.constant dense<0.000000e+00> : vector<128x128xf32>
    %6 = tpu.matmul %5, %2, %cst {dimension_numbers = #tpu.dot_dimension_numbers<[1], [0], [0], [1], [0, 0, 1, 1], [], []>} : vector<128x128xbf16>, vector<128x128xbf16>, vector<128x128xf32> -> vector<128x128xf32>
    %7 = vector.extract_strided_slice %4 {offsets = [0, 0], sizes = [1, 128], strides = [1, 1]} : vector<3x128xf32> to vector<1x128xf32>
    %8 = vector.broadcast %7 : vector<1x128xf32> to vector<128x128xf32>
    %9 = arith.addf %6, %8 : vector<128x128xf32>
    %10 = vector.extract_strided_slice %4 {offsets = [1, 0], sizes = [1, 128], strides = [1, 1]} : vector<3x128xf32> to vector<1x128xf32>
    %11 = vector.broadcast %10 : vector<1x128xf32> to vector<128x128xf32>
    %12 = arith.mulf %9, %11 : vector<128x128xf32>
    %13 = vector.extract_strided_slice %4 {offsets = [2, 0], sizes = [1, 128], strides = [1, 1]} : vector<3x128xf32> to vector<1x128xf32>
    %14 = vector.broadcast %13 : vector<1x128xf32> to vector<128x128xf32>
    %15 = arith.addf %12, %14 : vector<128x128xf32>
    %cst_7 = arith.constant 0.000000e+00 : f32
    %16 = vector.broadcast %cst_7 : f32 to vector<128x128xf32>
    %17 = arith.maximumf %15, %16 : vector<128x128xf32>
    %c1 = arith.constant 1 : index
    %c0_8 = arith.constant 0 : index
    %c0_9 = arith.constant 0 : index
    %18 = vector.load %arg2[%c1, %c0_8, %c0_9] : memref<3x128x128xbf16, #tpu.memory_space<vmem>>, vector<1x128x128xbf16>
    %19 = vector.shape_cast %18 : vector<1x128x128xbf16> to vector<128x128xbf16>
    %c1_10 = arith.constant 1 : index
    %c0_11 = arith.constant 0 : index
    %c0_12 = arith.constant 0 : index
    %20 = vector.load %arg3[%c1_10, %c0_11, %c0_12] : memref<3x3x128xf32, #tpu.memory_space<vmem>>, vector<1x3x128xf32>
    %21 = vector.shape_cast %20 : vector<1x3x128xf32> to vector<3x128xf32>
    %22 = arith.truncf %17 : vector<128x128xf32> to vector<128x128xbf16>
    %cst_13 = arith.constant dense<0.000000e+00> : vector<128x128xf32>
    %23 = tpu.matmul %22, %19, %cst_13 {dimension_numbers = #tpu.dot_dimension_numbers<[1], [0], [0], [1], [0, 0, 1, 1], [], []>} : vector<128x128xbf16>, vector<128x128xbf16>, vector<128x128xf32> -> vector<128x128xf32>
    %24 = vector.extract_strided_slice %21 {offsets = [0, 0], sizes = [1, 128], strides = [1, 1]} : vector<3x128xf32> to vector<1x128xf32>
    %25 = vector.broadcast %24 : vector<1x128xf32> to vector<128x128xf32>
    %26 = arith.addf %23, %25 : vector<128x128xf32>
    %27 = vector.extract_strided_slice %21 {offsets = [1, 0], sizes = [1, 128], strides = [1, 1]} : vector<3x128xf32> to vector<1x128xf32>
    %28 = vector.broadcast %27 : vector<1x128xf32> to vector<128x128xf32>
    %29 = arith.mulf %26, %28 : vector<128x128xf32>
    %30 = vector.extract_strided_slice %21 {offsets = [2, 0], sizes = [1, 128], strides = [1, 1]} : vector<3x128xf32> to vector<1x128xf32>
    %31 = vector.broadcast %30 : vector<1x128xf32> to vector<128x128xf32>
    %32 = arith.addf %29, %31 : vector<128x128xf32>
    %cst_14 = arith.constant 0.000000e+00 : f32
    %33 = vector.broadcast %cst_14 : f32 to vector<128x128xf32>
    %34 = arith.maximumf %32, %33 : vector<128x128xf32>
    %c2 = arith.constant 2 : index
    %c0_15 = arith.constant 0 : index
    %c0_16 = arith.constant 0 : index
    %35 = vector.load %arg2[%c2, %c0_15, %c0_16] : memref<3x128x128xbf16, #tpu.memory_space<vmem>>, vector<1x128x128xbf16>
    %36 = vector.shape_cast %35 : vector<1x128x128xbf16> to vector<128x128xbf16>
    %c2_17 = arith.constant 2 : index
    %c0_18 = arith.constant 0 : index
    %c0_19 = arith.constant 0 : index
    %37 = vector.load %arg3[%c2_17, %c0_18, %c0_19] : memref<3x3x128xf32, #tpu.memory_space<vmem>>, vector<1x3x128xf32>
    %38 = vector.shape_cast %37 : vector<1x3x128xf32> to vector<3x128xf32>
    %39 = arith.truncf %34 : vector<128x128xf32> to vector<128x128xbf16>
    %cst_20 = arith.constant dense<0.000000e+00> : vector<128x128xf32>
    %40 = tpu.matmul %39, %36, %cst_20 {dimension_numbers = #tpu.dot_dimension_numbers<[1], [0], [0], [1], [0, 0, 1, 1], [], []>} : vector<128x128xbf16>, vector<128x128xbf16>, vector<128x128xf32> -> vector<128x128xf32>
    %41 = vector.extract_strided_slice %38 {offsets = [0, 0], sizes = [1, 128], strides = [1, 1]} : vector<3x128xf32> to vector<1x128xf32>
    %42 = vector.broadcast %41 : vector<1x128xf32> to vector<128x128xf32>
    %43 = arith.addf %40, %42 : vector<128x128xf32>
    %cst_21 = arith.constant 0.000000e+00 : f32
    %44 = vector.broadcast %cst_21 : f32 to vector<128x128xf32>
    %45 = arith.maximumf %43, %44 : vector<128x128xf32>
    %46 = vector.extract_strided_slice %38 {offsets = [1, 0], sizes = [1, 128], strides = [1, 1]} : vector<3x128xf32> to vector<1x128xf32>
    %47 = vector.broadcast %46 : vector<1x128xf32> to vector<128x128xf32>
    %48 = arith.mulf %45, %47 : vector<128x128xf32>
    %49 = vector.extract_strided_slice %38 {offsets = [2, 0], sizes = [1, 128], strides = [1, 1]} : vector<3x128xf32> to vector<1x128xf32>
    %50 = vector.broadcast %49 : vector<1x128xf32> to vector<128x128xf32>
    %51 = arith.addf %48, %50 : vector<128x128xf32>
    %c0_22 = arith.constant 0 : index
    %c0_23 = arith.constant 0 : index
    %52 = vector.load %arg4[%c0_22, %c0_23] : memref<128x128xf32, #tpu.memory_space<vmem>>, vector<128x128xf32>
    tpu.vector_store %arg4[%c0_22, %c0_23], %51 {strides = array<i32>} : memref<128x128xf32, #tpu.memory_space<vmem>>, vector<128x128xf32>,
    return
  }
  func.func @transform_0(%arg0: i32) -> (i32, i32) {
    %c0_i32 = arith.constant 0 : i32
    %c0_i32_0 = arith.constant 0 : i32
    return %arg0, %c0_i32 : i32, i32
  }
  func.func @transform_1(%arg0: i32) -> (i32, i32, i32) {
    %c0_i32 = arith.constant 0 : i32
    %c0_i32_0 = arith.constant 0 : i32
    %c0_i32_1 = arith.constant 0 : i32
    %c0_i32_2 = arith.constant 0 : i32
    return %c0_i32, %c0_i32_0, %c0_i32_1 : i32, i32, i32
  }
  func.func @transform_2(%arg0: i32) -> (i32, i32, i32) {
    %c0_i32 = arith.constant 0 : i32
    %c0_i32_0 = arith.constant 0 : i32
    %c0_i32_1 = arith.constant 0 : i32
    %c0_i32_2 = arith.constant 0 : i32
    return %c0_i32, %c0_i32_0, %c0_i32_1 : i32, i32, i32
  }
  func.func @transform_3(%arg0: i32) -> (i32, i32) {
    %c0_i32 = arith.constant 0 : i32
    %c0_i32_0 = arith.constant 0 : i32
    return %arg0, %c0_i32 : i32, i32
  }
}

module attributes {stable_mosaic.version = 11 : i64} {
  func.func @_mlp_chain_kernel(%arg0: i32, %arg1: memref<128x128xf32, #tpu.memory_space<vmem>>, %arg2: memref<1x128x128xbf16, #tpu.memory_space<vmem>>, %arg3: memref<1x3x128xf32, #tpu.memory_space<vmem>>, %arg4: memref<128x128xf32, #tpu.memory_space<vmem>>) attributes {dimension_semantics = [#tpu.dimension_semantics<parallel>], iteration_bounds = array<i64: 1>, scalar_prefetch = 0 : i64, scratch_operands = 0 : i64, tpu.core_type = #tpu.core_type<tc>, window_params = [{transform_indices = @transform_0, window_bounds = array<i64: 128, 128>}, {pipeline_mode = #tpu.pipeline_mode<synchronous>, transform_indices = @transform_1, window_bounds = array<i64: 1, 128, 128>}, {pipeline_mode = #tpu.pipeline_mode<synchronous>, transform_indices = @transform_2, window_bounds = array<i64: 1, 3, 128>}, {transform_indices = @transform_3, window_bounds = array<i64: 128, 128>}]} {
    %c0 = arith.constant 0 : index
    %c0_0 = arith.constant 0 : index
    %0 = vector.load %arg1[%c0, %c0_0] : memref<128x128xf32, #tpu.memory_space<vmem>>, vector<128x128xf32>
    %c0_1 = arith.constant 0 : index
    %c0_2 = arith.constant 0 : index
    %c0_3 = arith.constant 0 : index
    %1 = vector.load %arg2[%c0_1, %c0_2, %c0_3] : memref<1x128x128xbf16, #tpu.memory_space<vmem>>, vector<1x128x128xbf16>
    %2 = vector.shape_cast %1 : vector<1x128x128xbf16> to vector<128x128xbf16>
    %c0_4 = arith.constant 0 : index
    %c0_5 = arith.constant 0 : index
    %c0_6 = arith.constant 0 : index
    %3 = vector.load %arg3[%c0_4, %c0_5, %c0_6] : memref<1x3x128xf32, #tpu.memory_space<vmem>>, vector<1x3x128xf32>
    %4 = vector.shape_cast %3 : vector<1x3x128xf32> to vector<3x128xf32>
    %5 = arith.truncf %0 : vector<128x128xf32> to vector<128x128xbf16>
    %cst = arith.constant dense<0.000000e+00> : vector<128x128xf32>
    %6 = tpu.matmul %5, %2, %cst {dimension_numbers = #tpu.dot_dimension_numbers<[1], [0], [0], [1], [0, 0, 1, 1], [], []>} : vector<128x128xbf16>, vector<128x128xbf16>, vector<128x128xf32> -> vector<128x128xf32>
    %7 = vector.extract_strided_slice %4 {offsets = [0, 0], sizes = [1, 128], strides = [1, 1]} : vector<3x128xf32> to vector<1x128xf32>
    %8 = vector.broadcast %7 : vector<1x128xf32> to vector<128x128xf32>
    %9 = arith.addf %6, %8 : vector<128x128xf32>
    %10 = vector.extract_strided_slice %4 {offsets = [1, 0], sizes = [1, 128], strides = [1, 1]} : vector<3x128xf32> to vector<1x128xf32>
    %11 = vector.broadcast %10 : vector<1x128xf32> to vector<128x128xf32>
    %12 = arith.mulf %9, %11 : vector<128x128xf32>
    %13 = vector.extract_strided_slice %4 {offsets = [2, 0], sizes = [1, 128], strides = [1, 1]} : vector<3x128xf32> to vector<1x128xf32>
    %14 = vector.broadcast %13 : vector<1x128xf32> to vector<128x128xf32>
    %15 = arith.addf %12, %14 : vector<128x128xf32>
    %16 = arith.negf %15 : vector<128x128xf32>
    %17 = math.exp %16 : vector<128x128xf32>
    %cst_7 = arith.constant 1.000000e+00 : f32
    %18 = vector.broadcast %cst_7 : f32 to vector<128x128xf32>
    %19 = arith.addf %18, %17 : vector<128x128xf32>
    %20 = arith.divf %18, %19 : vector<128x128xf32>
    %c0_8 = arith.constant 0 : index
    %c0_9 = arith.constant 0 : index
    %21 = vector.load %arg4[%c0_8, %c0_9] : memref<128x128xf32, #tpu.memory_space<vmem>>, vector<128x128xf32>
    tpu.vector_store %arg4[%c0_8, %c0_9], %20 {strides = array<i32>} : memref<128x128xf32, #tpu.memory_space<vmem>>, vector<128x128xf32>,
    return
  }
  func.func @transform_0(%arg0: i32) -> (i32, i32) {
    %c0_i32 = arith.constant 0 : i32
    %c0_i32_0 = arith.constant 0 : i32
    return %arg0, %c0_i32 : i32, i32
  }
  func.func @transform_1(%arg0: i32) -> (i32, i32, i32) {
    %c0_i32 = arith.constant 0 : i32
    %c0_i32_0 = arith.constant 0 : i32
    %c0_i32_1 = arith.constant 0 : i32
    %c0_i32_2 = arith.constant 0 : i32
    return %c0_i32, %c0_i32_0, %c0_i32_1 : i32, i32, i32
  }
  func.func @transform_2(%arg0: i32) -> (i32, i32, i32) {
    %c0_i32 = arith.constant 0 : i32
    %c0_i32_0 = arith.constant 0 : i32
    %c0_i32_1 = arith.constant 0 : i32
    %c0_i32_2 = arith.constant 0 : i32
    return %c0_i32, %c0_i32_0, %c0_i32_1 : i32, i32, i32
  }
  func.func @transform_3(%arg0: i32) -> (i32, i32) {
    %c0_i32 = arith.constant 0 : i32
    %c0_i32_0 = arith.constant 0 : i32
    return %arg0, %c0_i32 : i32, i32
  }
}

</mosaic_0001>

<bundles_post_ra>
// kernel: net_forward.7
= control target key start
LH: loop header
LB: loop body
LE: loop exit
PB: predicated region body
PF: predicated region fallthrough
CT: control target
= control target key end

     0   :  { %v56_v45 = vlaneseq  ;;  %s1375_s1 = inlined_call_operand.vmem [shape: bf16[3,128,128], index: 1, kind: input, shape index: {}]   ;;  %s1376_s0 = inlined_call_operand.vmem [shape: f32[128,128], index: 0, kind: input, shape index: {}]   ;;  %s1377_s2 = inlined_call_operand.vmem [shape: f32[3,3,128], index: 2, kind: input, shape index: {}]   ;;  %s1378_s3 = inlined_call_operand.vmem [shape: f32[128,128], index: 3, kind: output, shape index: {}]  }
   0x1   :  { %v947_v0 = vld [vmem:[%s1375_s1] sm:$0xff]   ;;  %v948_v1 = vld [vmem:[%s1375_s1 + $0x8] sm:$0xff]   ;;  %v949_v2 = vld [vmem:[%s1375_s1 + $0x10] sm:$0xff]  }
   0x2   :  { %835 = vmatprep.subr.bf16.mxu0 %v947_v0  ;;  %v950_v3 = vld [vmem:[%s1375_s1 + $0x18] sm:$0xff]   ;;  %v15_v4 = vld [vmem:[%s1376_s0] sm:$0xff]  ;;  %v16_v5 = vld [vmem:[%s1376_s0 + $0x8] sm:$0xff]  ;;  %v57_v46 = vshrl.u32 %v56_v45, 7 }
   0x3   :  { %836 = vmatpush3.bf16.msra.mxu0 %v947_v0  ;;  %v48_v6 = vpack.c.bf16 %v16_v5, %v15_v4  ;;  %v951_v7 = vld [vmem:[%s1375_s1 + $0x20] sm:$0xff]   ;;  %v956_v9 = vld [vmem:[%s1375_s1 + $0x48] sm:$0xff]   ;;  %v953_v11 = vld [vmem:[%s1375_s1 + $0x30] sm:$0xff]  }
   0x4   :  { %837 = vmatprep.subr.bf16.mxu0 %v948_v1  ;;  %v955_v8 = vld [vmem:[%s1375_s1 + $0x40] sm:$0xff]   ;;  %v952_v10 = vld [vmem:[%s1375_s1 + $0x28] sm:$0xff]   ;;  %v957_v12 = vld [vmem:[%s1375_s1 + $0x50] sm:$0xff]   ;;  %v1123_v47 = vsub.s32 0, %v57_v46  ;;  %v1128_v49 = vsub.s32 1, %v57_v46  ;;  %v1133_v51 = vsub.s32 2, %v57_v46 }
   0x5   :  { %851 = vmatprep.mubr.bf16.mxu0 %v48_v6  ;;  %867 = vmatprep.subr.bf16.mxu1 %v955_v8  ;;  %v958_v13 = vld [vmem:[%s1375_s1 + $0x58] sm:$0xff]   ;;  %v959_v15 = vld [vmem:[%s1375_s1 + $0x60] sm:$0xff]   ;;  %v17_v16 = vld [vmem:[%s1376_s0 + $0x10] sm:$0xff] }
   0x6   :  { %868 = vmatpush3.bf16.msra.mxu1 %v955_v8  ;;  %v954_v14 = vld [vmem:[%s1375_s1 + $0x38] sm:$0xff]   ;;  %v19_v18 = vld [vmem:[%s1376_s0 + $0x20] sm:$0xff]  ;;  %v20_v19 = vld [vmem:[%s1376_s0 + $0x28] sm:$0xff] }
   0x7   :  { %838 = vmatpush3.bf16.msra.mxu0 %v948_v1  ;;  %869 = vmatprep.subr.bf16.mxu1 %v956_v9  ;;  %v18_v17 = vld [vmem:[%s1376_s0 + $0x18] sm:$0xff]  ;;  %v50_v21 = vpack.c.bf16 %v20_v19, %v19_v18  ;;  %v21_v22 = vld [vmem:[%s1376_s0 + $0x30] sm:$0xff]  ;;  %v23_v24 = vld [vmem:[%s1376_s0 + $0x40] sm:$0xff] }
   0x8   :  { %839 = vmatprep.subr.bf16.mxu0 %v949_v2  ;;  %v49_v20 = vpack.c.bf16 %v18_v17, %v17_v16  ;;  %v22_v23 = vld [vmem:[%s1376_s0 + $0x38] sm:$0xff]  ;;  %v24_v25 = vld [vmem:[%s1376_s0 + $0x48] sm:$0xff]  ;;  %v25_v28 = vld [vmem:[%s1376_s0 + $0x50] sm:$0xff] }
   0x9   :  { %v51_v26 = vpack.c.bf16 %v22_v23, %v21_v22  ;;  %v52_v27 = vpack.c.bf16 %v24_v25, %v23_v24  ;;  %v26_v29 = vld [vmem:[%s1376_s0 + $0x58] sm:$0xff]  ;;  %v27_v30 = vld [vmem:[%s1376_s0 + $0x60] sm:$0xff]  ;;  %v28_v31 = vld [vmem:[%s1376_s0 + $0x68] sm:$0xff] }
   0xa   :  { %870 = vmatpush3.bf16.msra.mxu1 %v956_v9  ;;  %v53_v32 = vpack.c.bf16 %v26_v29, %v25_v28  ;;  %v54_v33 = vpack.c.bf16 %v28_v31, %v27_v30  ;;  %v29_v34 = vld [vmem:[%s1376_s0 + $0x70] sm:$0xff]  ;;  %v30_v35 = vld [vmem:[%s1376_s0 + $0x78] sm:$0xff]  ;;  %v960_v37 = vld [vmem:[%s1375_s1 + $0x68] sm:$0xff]  }
   0xb   :  { %840 = vmatpush3.bf16.msra.mxu0 %v949_v2  ;;  %871 = vmatprep.subr.bf16.mxu1 %v957_v12  ;;  %v55_v36 = vpack.c.bf16 %v30_v35, %v29_v34  ;;  %v961_v38 = vld [vmem:[%s1375_s1 + $0x70] sm:$0xff]   ;;  %v962_v39 = vld [vmem:[%s1375_s1 + $0x78] sm:$0xff]   ;;  %v1090_v40 = vld [vmem:[%s1375_s1 + $0x80] sm:$0xff]  }
   0xc   :  { %841 = vmatprep.subr.bf16.mxu0 %v950_v3  ;;  %v1095_v41 = vld [vmem:[%s1375_s1 + $0x88] sm:$0xff]   ;;  %v1104_v42 = vld [vmem:[%s1375_s1 + $0x90] sm:$0xff]   ;;  %v1111_v43 = vld [vmem:[%s1375_s1 + $0x98] sm:$0xff]  }
   0xd   :  { %v1118_v44 = vld [vmem:[%s1375_s1 + $0xa0] sm:$0xff]  }
   0xe   :  { %872 = vmatpush3.bf16.msra.mxu1 %v957_v12  ;;  %v47_v48 = vld [vmem:[%s1377_s2] sm:$0x7] }
   0xf   :  { %842 = vmatpush3.bf16.msra.mxu0 %v950_v3  ;;  %873 = vmatprep.subr.bf16.mxu1 %v958_v13  ;;  %v1131_v50 = vrot.slane %v47_v48, %v1123_v47  ;;  %v1136_v52 = vrot.slane %v47_v48, %v1128_v49  ;;  %v1140_v55 = vrot.slane %v47_v48, %v1133_v51 }
  0x10   :  { %843 = vmatprep.subr.bf16.mxu0 %v951_v7 }
  0x12   :  { %874 = vmatpush3.bf16.msra.mxu1 %v958_v13 }
  0x13   :  { %844 = vmatpush3.bf16.msra.mxu0 %v951_v7  ;;  %875 = vmatprep.subr.bf16.mxu1 %v959_v15 }
  0x14   :  { %845 = vmatprep.subr.bf16.mxu0 %v952_v10 }
  0x16   :  { %876 = vmatpush3.bf16.msra.mxu1 %v959_v15 }
  0x17   :  { %846 = vmatpush3.bf16.msra.mxu0 %v952_v10  ;;  %877 = vmatprep.subr.bf16.mxu1 %v960_v37 }
  0x18   :  { %847 = vmatprep.subr.bf16.mxu0 %v953_v11 }
  0x1a   :  { %878 = vmatpush3.bf16.msra.mxu1 %v960_v37 }
  0x1b   :  { %848 = vmatpush3.bf16.msra.mxu0 %v953_v11  ;;  %879 = vmatprep.subr.bf16.mxu1 %v961_v38 }
  0x1c   :  { %849 = vmatprep.subr.bf16.mxu0 %v954_v14 }
  0x1e   :  { %880 = vmatpush3.bf16.msra.mxu1 %v961_v38 }
  0x1f   :  { %850 = vmatpush3.bf16.msra.mxu0 %v954_v14  ;;  %881 = vmatprep.subr.bf16.mxu1 %v962_v39 }
  0x20   :  { %899 = vmatprep.subr.bf16.mxu0 %v1090_v40 }
  0x22   :  { %852 = vmatmul.mubr.bf16.vlgmr.msra.gmra.mrb[0].mxu0 %v49_v20  ;;  %882 = vmatpush3.bf16.msra.mxu1 %v962_v39 }
  0x23   :  { %855 = vmatprep.mubr.bf16.mxu0 %v50_v21  ;;  %931 = vmatprep.subr.bf16.mxu1 %v1090_v40 }
  0x24   :  { %900 = vmatpush3.bf16.msra.mxu0 %v1090_v40 }
  0x25   :  { %901 = vmatprep.subr.bf16.mxu0 %v1095_v41 }
  0x28   :  { %902 = vmatpush3.bf16.msra.mxu0 %v1095_v41 }
  0x29   :  { %903 = vmatprep.subr.bf16.mxu0 %v1104_v42 }
  0x2a   :  { %856 = vmatmul.mubr.bf16.gmra.mrb[4].mxu0 %v51_v26 }
  0x2b   :  { %859 = vmatprep.mubr.bf16.mxu0 %v52_v27 }
  0x2c   :  { %904 = vmatpush3.bf16.msra.mxu0 %v1104_v42 }
  0x2d   :  { %905 = vmatprep.subr.bf16.mxu0 %v1111_v43 }
  0x30   :  { %906 = vmatpush3.bf16.msra.mxu0 %v1111_v43 }
  0x31   :  { %907 = vmatprep.subr.bf16.mxu0 %v1118_v44 }
  0x32   :  { %860 = vmatmul.mubr.bf16.gmra.mrb[8].mxu0 %v53_v32 }
  0x33   :  { %863 = vmatprep.mubr.bf16.mxu0 %v54_v33 }
  0x34   :  { %908 = vmatpush3.bf16.msra.mxu0 %v1118_v44 }
  0x3a   :  { %864 = vmatmul.mubr.bf16.gmra.mrb[12].mxu0 %v55_v36 }
  0xf5   :  { %v853_v53 = vpop.f32.mrb[0].mxu0 }
  0xf6   :  { %v151_v54 = vadd.f32 %v853_v53, %v1131_v50  ;;  %v142_v56 = vpop.f32.mrb[1].mxu0 }
  0xf7   :  { %v143_v57 = vadd.f32 %v142_v56, %v1131_v50  ;;  %v854_v58 = vpop.f32.mrb[2].mxu0 }
  0xf8   :  { %v211_v59 = vmul.f32 %v1136_v52, %v151_v54  ;;  %v154_v60 = vadd.f32 %v854_v58, %v1131_v50  ;;  %v145_v61 = vpop.f32.mrb[3].mxu0 }
  0xf9   :  { %v209_v62 = vmul.f32 %v1136_v52, %v143_v57  ;;  %v146_v63 = vadd.f32 %v145_v61, %v1131_v50 }
  0xfa   :  { %v231_v0 = vadd.f32 %v1140_v55, %v211_v59  ;;  %v212_v1 = vmul.f32 %v1136_v52, %v154_v60 }
  0xfb   :  { %v210_v2 = vmul.f32 %v1136_v52, %v146_v63  ;;  %v229_v3 = vadd.f32 %v1140_v55, %v209_v62 }
  0xfc   :  { %v232_v4 = vadd.f32 %v1140_v55, %v212_v1  ;;  %v247_v7 = vmax.f32 %v231_v0, 0.0 }
  0xfd   :  { %v857_v5 = vpop.f32.mrb[4].mxu0  ;;  %v230_v6 = vadd.f32 %v1140_v55, %v210_v2  ;;  %v245_v13 = vmax.f32 %v229_v3, 0.0 }
  0xfe   :  { %v248_v8 = vmax.f32 %v232_v4, 0.0  ;;  %v167_v9 = vadd.f32 %v857_v5, %v1131_v50  ;;  %v158_v10 = vpop.f32.mrb[5].mxu0 }
  0xff   :  { %v159_v11 = vadd.f32 %v158_v10, %v1131_v50  ;;  %v858_v12 = vpop.f32.mrb[6].mxu0  ;;  %v246_v14 = vmax.f32 %v230_v6, 0.0 }
 0x100   :  { %v215_v15 = vmul.f32 %v1136_v52, %v167_v9  ;;  %v170_v16 = vadd.f32 %v858_v12, %v1131_v50  ;;  %v161_v17 = vpop.f32.mrb[7].mxu0  ;;  %v281_v18 = vpack.c.bf16 %v248_v8, %v247_v7 }
 0x101   :  { %v213_v19 = vmul.f32 %v1136_v52, %v159_v11  ;;  %v162_v20 = vadd.f32 %v161_v17, %v1131_v50  ;;  %v280_v21 = vpack.c.bf16 %v246_v14, %v245_v13 }
 0x102   :  { %v235_v22 = vadd.f32 %v1140_v55, %v215_v15  ;;  %v216_v23 = vmul.f32 %v1136_v52, %v170_v16 }
 0x103   :  { %v233_v24 = vadd.f32 %v1140_v55, %v213_v19  ;;  %v214_v25 = vmul.f32 %v1136_v52, %v162_v20  ;;  %883 = vmatprep.mubr.bf16.mxu1 %v280_v21  ;;  %v753_v20 = vld [vmem:[%s1377_s2 + $0x4] sm:$0x7] }
 0x104   :  { %v236_v26 = vadd.f32 %v1140_v55, %v216_v23  ;;  %884 = vmatmul.mubr.bf16.vlgmr.msra.gmra.mrb[0].mxu1 %v281_v18  ;;  %v251_v29 = vmax.f32 %v235_v22, 0.0  ;;  %v1211_v21 = vrot.slane %v753_v20, %v1123_v47  ;;  %v1214_v22 = vrot.slane %v753_v20, %v1128_v49 }
 0x105   :  { %v234_v27 = vadd.f32 %v1140_v55, %v214_v25  ;;  %v861_v28 = vpop.f32.mrb[8].mxu0  ;;  %939 = vmatpush3.bf16.msra.mxu1 %v1090_v40  ;;  %v249_v33 = vmax.f32 %v233_v24, 0.0  ;;  %v1218_v25 = vrot.slane %v753_v20, %v1133_v51 }
 0x106   :  { %v252_v30 = vmax.f32 %v236_v26, 0.0  ;;  %v183_v31 = vadd.f32 %v861_v28, %v1131_v50  ;;  %v174_v32 = vpop.f32.mrb[9].mxu0  ;;  %932 = vmatprep.subr.bf16.mxu1 %v1095_v41 }
 0x107   :  { %v250_v34 = vmax.f32 %v234_v27, 0.0  ;;  %v175_v35 = vadd.f32 %v174_v32, %v1131_v50  ;;  %v862_v36 = vpop.f32.mrb[10].mxu0 }
 0x108   :  { %v219_v37 = vmul.f32 %v1136_v52, %v183_v31  ;;  %v186_v38 = vadd.f32 %v862_v36, %v1131_v50  ;;  %v177_v39 = vpop.f32.mrb[11].mxu0  ;;  %v283_v45 = vpack.c.bf16 %v252_v30, %v251_v29 }
 0x109   :  { %v217_v40 = vmul.f32 %v1136_v52, %v175_v35  ;;  %v178_v46 = vadd.f32 %v177_v39, %v1131_v50  ;;  %v282_v48 = vpack.c.bf16 %v250_v34, %v249_v33  ;;  %940 = vmatpush3.bf16.msra.mxu1 %v1095_v41 }
 0x10a   :  { %v239_v53 = vadd.f32 %v1140_v55, %v219_v37  ;;  %v220_v54 = vmul.f32 %v1136_v52, %v186_v38  ;;  %933 = vmatprep.subr.bf16.mxu1 %v1104_v42 }
 0x10b   :  { %v237_v56 = vadd.f32 %v1140_v55, %v217_v40  ;;  %v218_v57 = vmul.f32 %v1136_v52, %v178_v46  ;;  %887 = vmatprep.mubr.bf16.mxu1 %v282_v48 }
 0x10c   :  { %v240_v58 = vadd.f32 %v1140_v55, %v220_v54  ;;  %888 = vmatmul.mubr.bf16.gmra.mrb[4].mxu1 %v283_v45  ;;  %v255_v41 = vmax.f32 %v239_v53, 0.0 }
 0x10d   :  { %v238_v59 = vadd.f32 %v1140_v55, %v218_v57  ;;  %v865_v60 = vpop.f32.mrb[12].mxu0  ;;  %941 = vmatpush3.bf16.msra.mxu1 %v1104_v42  ;;  %v253_v0 = vmax.f32 %v237_v56, 0.0 }
 0x10e   :  { %v256_v61 = vmax.f32 %v240_v58, 0.0  ;;  %v199_v62 = vadd.f32 %v865_v60, %v1131_v50  ;;  %v190_v63 = vpop.f32.mrb[13].mxu0  ;;  %934 = vmatprep.subr.bf16.mxu1 %v1111_v43 }
 0x10f   :  { %v254_v1 = vmax.f32 %v238_v59, 0.0  ;;  %v191_v2 = vadd.f32 %v190_v63, %v1131_v50  ;;  %v866_v3 = vpop.f32.mrb[14].mxu0 }
 0x110   :  { %v223_v4 = vmul.f32 %v1136_v52, %v199_v62  ;;  %v202_v5 = vadd.f32 %v866_v3, %v1131_v50  ;;  %v193_v6 = vpop.f32.mrb[15].mxu0  ;;  %v285_v7 = vpack.c.bf16 %v256_v61, %v255_v41 }
 0x111   :  { %v221_v42 = vmul.f32 %v1136_v52, %v191_v2  ;;  %v194_v8 = vadd.f32 %v193_v6, %v1131_v50  ;;  %v284_v9 = vpack.c.bf16 %v254_v1, %v253_v0  ;;  %942 = vmatpush3.bf16.msra.mxu1 %v1111_v43 }
 0x112   :  { %v243_v10 = vadd.f32 %v1140_v55, %v223_v4  ;;  %v224_v11 = vmul.f32 %v1136_v52, %v202_v5  ;;  %935 = vmatprep.subr.bf16.mxu1 %v1118_v44 }
 0x113   :  { %v241_v12 = vadd.f32 %v1140_v55, %v221_v42  ;;  %v222_v13 = vmul.f32 %v1136_v52, %v194_v8  ;;  %891 = vmatprep.mubr.bf16.mxu1 %v284_v9  ;;  %v968_v52 = vld [vmem:[%s1375_s1 + $0xa8] sm:$0xff]  }
 0x114   :  { %v244_v14 = vadd.f32 %v1140_v55, %v224_v11  ;;  %892 = vmatmul.mubr.bf16.gmra.mrb[8].mxu1 %v285_v7  ;;  %v259_v50 = vmax.f32 %v243_v10, 0.0  ;;  %909 = vmatprep.subr.bf16.mxu0 %v968_v52 }
 0x115   :  { %v242_v15 = vadd.f32 %v1140_v55, %v222_v13  ;;  %943 = vmatpush3.bf16.msra.mxu1 %v1118_v44  ;;  %v257_v16 = vmax.f32 %v241_v12, 0.0  ;;  %910 = vmatpush3.bf16.msra.mxu0 %v968_v52  ;;  %v969_v44 = vld [vmem:[%s1375_s1 + $0xb0] sm:$0xff]   ;;  %v970_v55 = vld [vmem:[%s1375_s1 + $0xb8] sm:$0xff]  }
 0x116   :  { %v260_v43 = vmax.f32 %v244_v14, 0.0  ;;  %936 = vmatprep.subr.bf16.mxu1 %v968_v52  ;;  %911 = vmatprep.subr.bf16.mxu0 %v969_v44 }
 0x117   :  { %v258_v17 = vmax.f32 %v242_v15, 0.0 }
 0x118   :  { %v287_v18 = vpack.c.bf16 %v260_v43, %v259_v50 }
 0x119   :  { %v286_v19 = vpack.c.bf16 %v258_v17, %v257_v16  ;;  %944 = vmatpush3.bf16.msra.mxu1 %v968_v52  ;;  %912 = vmatpush3.bf16.msra.mxu0 %v969_v44 }
 0x11a   :  { %937 = vmatprep.subr.bf16.mxu1 %v969_v44  ;;  %913 = vmatprep.subr.bf16.mxu0 %v970_v55 }
 0x11b   :  { %895 = vmatprep.mubr.bf16.mxu1 %v286_v19 }
 0x11c   :  { %896 = vmatmul.mubr.bf16.gmra.mrb[12].mxu1 %v287_v18 }
 0x11d   :  { %945 = vmatpush3.bf16.msra.mxu1 %v969_v44  ;;  %914 = vmatpush3.bf16.msra.mxu0 %v970_v55 }
 0x11e   :  { %938 = vmatprep.subr.bf16.mxu1 %v970_v55 }
 0x121   :  { %946 = vmatpush3.bf16.msra.mxu1 %v970_v55 }
 0x1d7   :  { %v885_v23 = vpop.f32.mrb[0].mxu1 }
 0x1d8   :  { %v383_v24 = vadd.f32 %v885_v23, %v1211_v21  ;;  %v374_v26 = vpop.f32.mrb[1].mxu1 }
 0x1d9   :  { %v375_v27 = vadd.f32 %v374_v26, %v1211_v21  ;;  %v886_v28 = vpop.f32.mrb[2].mxu1 }
 0x1da   :  { %v443_v29 = vmul.f32 %v1214_v22, %v383_v24  ;;  %v386_v30 = vadd.f32 %v886_v28, %v1211_v21  ;;  %v377_v31 = vpop.f32.mrb[3].mxu1 }
 0x1db   :  { %v441_v32 = vmul.f32 %v1214_v22, %v375_v27  ;;  %v378_v33 = vadd.f32 %v377_v31, %v1211_v21 }
 0x1dc   :  { %v463_v34 = vadd.f32 %v1218_v25, %v443_v29  ;;  %v444_v35 = vmul.f32 %v1214_v22, %v386_v30 }
 0x1dd   :  { %v461_v36 = vadd.f32 %v1218_v25, %v441_v32  ;;  %v442_v37 = vmul.f32 %v1214_v22, %v378_v33 }
 0x1de   :  { %v464_v38 = vadd.f32 %v1218_v25, %v444_v35  ;;  %v479_v40 = vmax.f32 %v463_v34, 0.0 }
 0x1df   :  { %v462_v39 = vadd.f32 %v1218_v25, %v442_v37  ;;  %v889_v45 = vpop.f32.mrb[4].mxu1  ;;  %v477_v54 = vmax.f32 %v461_v36, 0.0 }
 0x1e0   :  { %v480_v46 = vmax.f32 %v464_v38, 0.0  ;;  %v399_v48 = vadd.f32 %v889_v45, %v1211_v21  ;;  %v390_v53 = vpop.f32.mrb[5].mxu1 }
 0x1e1   :  { %v478_v56 = vmax.f32 %v462_v39, 0.0  ;;  %v391_v57 = vadd.f32 %v390_v53, %v1211_v21  ;;  %v890_v58 = vpop.f32.mrb[6].mxu1 }
 0x1e2   :  { %v513_v59 = vpack.c.bf16 %v480_v46, %v479_v40  ;;  %v447_v60 = vmul.f32 %v1214_v22, %v399_v48  ;;  %v402_v41 = vadd.f32 %v890_v58, %v1211_v21  ;;  %v393_v61 = vpop.f32.mrb[7].mxu1 }
 0x1e3   :  { %v445_v62 = vmul.f32 %v1214_v22, %v391_v57  ;;  %v394_v63 = vadd.f32 %v393_v61, %v1211_v21  ;;  %v512_v0 = vpack.c.bf16 %v478_v56, %v477_v54 }
 0x1e4   :  { %v467_v1 = vadd.f32 %v1218_v25, %v447_v60  ;;  %v448_v2 = vmul.f32 %v1214_v22, %v402_v41 }
 0x1e5   :  { %v465_v3 = vadd.f32 %v1218_v25, %v445_v62  ;;  %v446_v4 = vmul.f32 %v1214_v22, %v394_v63  ;;  %915 = vmatprep.mubr.bf16.mxu0 %v512_v0  ;;  %v778_v62 = vld [vmem:[%s1377_s2 + $0x8] sm:$0x7] }
 0x1e6   :  { %v468_v5 = vadd.f32 %v1218_v25, %v448_v2  ;;  %916 = vmatmul.mubr.bf16.vlgmr.msra.gmra.mrb[16].mxu0 %v513_v59  ;;  %v483_v42 = vmax.f32 %v467_v1, 0.0  ;;  %v1274_v63 = vrot.slane %v778_v62, %v1128_v49  ;;  %v1278_v1 = vrot.slane %v778_v62, %v1133_v51 }
 0x1e7   :  { %v466_v6 = vadd.f32 %v1218_v25, %v446_v4  ;;  %v893_v7 = vpop.f32.mrb[8].mxu1  ;;  %v481_v11 = vmax.f32 %v465_v3, 0.0 }
 0x1e8   :  { %v484_v8 = vmax.f32 %v468_v5, 0.0  ;;  %v415_v9 = vadd.f32 %v893_v7, %v1211_v21  ;;  %v406_v10 = vpop.f32.mrb[9].mxu1 }
 0x1e9   :  { %v482_v12 = vmax.f32 %v466_v6, 0.0  ;;  %v407_v13 = vadd.f32 %v406_v10, %v1211_v21  ;;  %v894_v14 = vpop.f32.mrb[10].mxu1 }
 0x1ea   :  { %v451_v15 = vmul.f32 %v1214_v22, %v415_v9  ;;  %v418_v50 = vadd.f32 %v894_v14, %v1211_v21  ;;  %v409_v43 = vpop.f32.mrb[11].mxu1  ;;  %v515_v16 = vpack.c.bf16 %v484_v8, %v483_v42 }
 0x1eb   :  { %v449_v17 = vmul.f32 %v1214_v22, %v407_v13  ;;  %v410_v18 = vadd.f32 %v409_v43, %v1211_v21  ;;  %v514_v19 = vpack.c.bf16 %v482_v12, %v481_v11 }
 0x1ec   :  { %v471_v52 = vadd.f32 %v1218_v25, %v451_v15  ;;  %v452_v44 = vmul.f32 %v1214_v22, %v418_v50 }
 0x1ed   :  { %v469_v55 = vadd.f32 %v1218_v25, %v449_v17  ;;  %v450_v20 = vmul.f32 %v1214_v22, %v410_v18  ;;  %919 = vmatprep.mubr.bf16.mxu0 %v514_v19 }
 0x1ee   :  { %v472_v23 = vadd.f32 %v1218_v25, %v452_v44  ;;  %920 = vmatmul.mubr.bf16.gmra.mrb[20].mxu0 %v515_v16  ;;  %v487_v27 = vmax.f32 %v471_v52, 0.0 }
 0x1ef   :  { %v470_v24 = vadd.f32 %v1218_v25, %v450_v20  ;;  %v897_v26 = vpop.f32.mrb[12].mxu1  ;;  %v485_v31 = vmax.f32 %v469_v55, 0.0 }
 0x1f0   :  { %v488_v28 = vmax.f32 %v472_v23, 0.0  ;;  %v431_v29 = vadd.f32 %v897_v26, %v1211_v21  ;;  %v422_v30 = vpop.f32.mrb[13].mxu1 }
 0x1f1   :  { %v486_v32 = vmax.f32 %v470_v24, 0.0  ;;  %v423_v33 = vadd.f32 %v422_v30, %v1211_v21  ;;  %v898_v34 = vpop.f32.mrb[14].mxu1 }
 0x1f2   :  { %v517_v35 = vpack.c.bf16 %v488_v28, %v487_v27  ;;  %v455_v36 = vmul.f32 %v1214_v22, %v431_v29  ;;  %v434_v37 = vadd.f32 %v898_v34, %v1211_v21  ;;  %v425_v38 = vpop.f32.mrb[15].mxu1 }
 0x1f3   :  { %v453_v39 = vmul.f32 %v1214_v22, %v423_v33  ;;  %v426_v45 = vadd.f32 %v425_v38, %v1211_v21  ;;  %v516_v40 = vpack.c.bf16 %v486_v32, %v485_v31 }
 0x1f4   :  { %v475_v46 = vadd.f32 %v1218_v25, %v455_v36  ;;  %v456_v48 = vmul.f32 %v1214_v22, %v434_v37 }
 0x1f5   :  { %v473_v53 = vadd.f32 %v1218_v25, %v453_v39  ;;  %v454_v54 = vmul.f32 %v1214_v22, %v426_v45  ;;  %923 = vmatprep.mubr.bf16.mxu1 %v516_v40  ;;  %v1271_v22 = vrot.slane %v778_v62, %v1123_v47 }
 0x1f6   :  { %v476_v56 = vadd.f32 %v1218_v25, %v456_v48  ;;  %924 = vmatmul.mubr.bf16.vlgmr.msra.gmra.mrb[16].mxu1 %v517_v35  ;;  %v491_v58 = vmax.f32 %v475_v46, 0.0 }
 0x1f7   :  { %v474_v57 = vadd.f32 %v1218_v25, %v454_v54  ;;  %v489_v60 = vmax.f32 %v473_v53, 0.0 }
 0x1f8   :  { %v492_v59 = vmax.f32 %v476_v56, 0.0 }
 0x1f9   :  { %v490_v41 = vmax.f32 %v474_v57, 0.0 }
 0x1fa   :  { %v519_v21 = vpack.c.bf16 %v492_v59, %v491_v58 }
 0x1fb   :  { %v518_v61 = vpack.c.bf16 %v490_v41, %v489_v60 }
 0x1fd   :  { %927 = vmatprep.mubr.bf16.mxu1 %v518_v61 }
 0x1fe   :  { %928 = vmatmul.mubr.bf16.gmra.mrb[20].mxu1 %v519_v21 }
 0x2b9   :  { %v917_v0 = vpop.f32.mrb[16].mxu0 }
 0x2ba   :  { %v615_v25 = vadd.f32 %v917_v0, %v1271_v22  ;;  %v606_v2 = vpop.f32.mrb[17].mxu0 }
 0x2bb   :  { %v607_v3 = vadd.f32 %v606_v2, %v1271_v22  ;;  %v918_v4 = vpop.f32.mrb[18].mxu0 }
 0x2bc   :  { %v675_v5 = vmul.f32 %v1274_v63, %v615_v25  ;;  %v618_v6 = vadd.f32 %v918_v4, %v1271_v22  ;;  %v609_v7 = vpop.f32.mrb[19].mxu0 }
 0x2bd   :  { %v673_v47 = vmul.f32 %v1274_v63, %v607_v3  ;;  %v610_v49 = vadd.f32 %v609_v7, %v1271_v22 }
 0x2be   :  { %v695_v42 = vadd.f32 %v1278_v1, %v675_v5  ;;  %v676_v8 = vmul.f32 %v1274_v63, %v618_v6 }
 0x2bf   :  { %v693_v51 = vadd.f32 %v1278_v1, %v673_v47  ;;  %v674_v9 = vmul.f32 %v1274_v63, %v610_v49 }
 0x2c0   :  { %711 = vst [vmem:[%s1378_s3 + $0x10] sm:$0xff] %v695_v42  ;;  %v696_v10 = vadd.f32 %v1278_v1, %v676_v8 }
 0x2c1   :  { %709 = vst [vmem:[%s1378_s3] sm:$0xff] %v693_v51  ;;  %v694_v11 = vadd.f32 %v1278_v1, %v674_v9  ;;  %v921_v12 = vpop.f32.mrb[20].mxu0 }
 0x2c2   :  { %712 = vst [vmem:[%s1378_s3 + $0x18] sm:$0xff] %v696_v10  ;;  %v631_v13 = vadd.f32 %v921_v12, %v1271_v22  ;;  %v622_v14 = vpop.f32.mrb[21].mxu0 }
 0x2c3   :  { %710 = vst [vmem:[%s1378_s3 + $0x8] sm:$0xff] %v694_v11  ;;  %v623_v15 = vadd.f32 %v622_v14, %v1271_v22  ;;  %v922_v50 = vpop.f32.mrb[22].mxu0 }
 0x2c4   :  { %v679_v43 = vmul.f32 %v1274_v63, %v631_v13  ;;  %v634_v16 = vadd.f32 %v922_v50, %v1271_v22  ;;  %v625_v17 = vpop.f32.mrb[23].mxu0 }
 0x2c5   :  { %v677_v18 = vmul.f32 %v1274_v63, %v623_v15  ;;  %v626_v19 = vadd.f32 %v625_v17, %v1271_v22 }
 0x2c6   :  { %v699_v52 = vadd.f32 %v1278_v1, %v679_v43  ;;  %v680_v44 = vmul.f32 %v1274_v63, %v634_v16 }
 0x2c7   :  { %v697_v55 = vadd.f32 %v1278_v1, %v677_v18  ;;  %v678_v20 = vmul.f32 %v1274_v63, %v626_v19 }
 0x2c8   :  { %715 = vst [vmem:[%s1378_s3 + $0x30] sm:$0xff] %v699_v52  ;;  %v700_v23 = vadd.f32 %v1278_v1, %v680_v44 }
 0x2c9   :  { %713 = vst [vmem:[%s1378_s3 + $0x20] sm:$0xff] %v697_v55  ;;  %v698_v24 = vadd.f32 %v1278_v1, %v678_v20  ;;  %v925_v26 = vpop.f32.mrb[16].mxu1 }
 0x2ca   :  { %716 = vst [vmem:[%s1378_s3 + $0x38] sm:$0xff] %v700_v23  ;;  %v647_v27 = vadd.f32 %v925_v26, %v1271_v22  ;;  %v638_v28 = vpop.f32.mrb[17].mxu1 }
 0x2cb   :  { %714 = vst [vmem:[%s1378_s3 + $0x28] sm:$0xff] %v698_v24  ;;  %v639_v29 = vadd.f32 %v638_v28, %v1271_v22  ;;  %v926_v30 = vpop.f32.mrb[18].mxu1 }
 0x2cc   :  { %v683_v31 = vmul.f32 %v1274_v63, %v647_v27  ;;  %v650_v32 = vadd.f32 %v926_v30, %v1271_v22  ;;  %v641_v33 = vpop.f32.mrb[19].mxu1 }
 0x2cd   :  { %v681_v34 = vmul.f32 %v1274_v63, %v639_v29  ;;  %v642_v35 = vadd.f32 %v641_v33, %v1271_v22 }
 0x2ce   :  { %v703_v36 = vadd.f32 %v1278_v1, %v683_v31  ;;  %v684_v37 = vmul.f32 %v1274_v63, %v650_v32 }
 0x2cf   :  { %v701_v38 = vadd.f32 %v1278_v1, %v681_v34  ;;  %v682_v39 = vmul.f32 %v1274_v63, %v642_v35 }
 0x2d0   :  { %719 = vst [vmem:[%s1378_s3 + $0x50] sm:$0xff] %v703_v36  ;;  %v704_v45 = vadd.f32 %v1278_v1, %v684_v37 }
 0x2d1   :  { %717 = vst [vmem:[%s1378_s3 + $0x40] sm:$0xff] %v701_v38  ;;  %v702_v40 = vadd.f32 %v1278_v1, %v682_v39  ;;  %v929_v46 = vpop.f32.mrb[20].mxu1 }
 0x2d2   :  { %720 = vst [vmem:[%s1378_s3 + $0x58] sm:$0xff] %v704_v45  ;;  %v663_v48 = vadd.f32 %v929_v46, %v1271_v22  ;;  %v654_v53 = vpop.f32.mrb[21].mxu1 }
 0x2d3   :  { %718 = vst [vmem:[%s1378_s3 + $0x48] sm:$0xff] %v702_v40  ;;  %v655_v54 = vadd.f32 %v654_v53, %v1271_v22  ;;  %v930_v56 = vpop.f32.mrb[22].mxu1 }
 0x2d4   :  { %v687_v57 = vmul.f32 %v1274_v63, %v663_v48  ;;  %v666_v58 = vadd.f32 %v930_v56, %v1271_v22  ;;  %v657_v59 = vpop.f32.mrb[23].mxu1 }
 0x2d5   :  { %v685_v60 = vmul.f32 %v1274_v63, %v655_v54  ;;  %v658_v41 = vadd.f32 %v657_v59, %v1271_v22 }
 0x2d6   :  { %v707_v21 = vadd.f32 %v1278_v1, %v687_v57  ;;  %v688_v61 = vmul.f32 %v1274_v63, %v666_v58 }
 0x2d7   :  { %v705_v62 = vadd.f32 %v1278_v1, %v685_v60  ;;  %v686_v0 = vmul.f32 %v1274_v63, %v658_v41 }
 0x2d8   :  { %723 = vst [vmem:[%s1378_s3 + $0x70] sm:$0xff] %v707_v21  ;;  %v708_v25 = vadd.f32 %v1278_v1, %v688_v61 }
 0x2d9   :  { %721 = vst [vmem:[%s1378_s3 + $0x60] sm:$0xff] %v705_v62  ;;  %v706_v22 = vadd.f32 %v1278_v1, %v686_v0 }
 0x2da   :  { %724 = vst [vmem:[%s1378_s3 + $0x78] sm:$0xff] %v708_v25 }
 0x2db   :  { %722 = vst [vmem:[%s1378_s3 + $0x68] sm:$0xff] %v706_v22 }

// kernel: net_forward.8
= control target key start
LH: loop header
LB: loop body
LE: loop exit
PB: predicated region body
PF: predicated region fallthrough
CT: control target
= control target key end

     0   :  { %v56_v45 = vlaneseq  ;;  %s1391_s1 = inlined_call_operand.vmem [shape: bf16[3,128,128], index: 1, kind: input, shape index: {}]   ;;  %s1392_s0 = inlined_call_operand.vmem [shape: f32[128,128], index: 0, kind: input, shape index: {}]   ;;  %s1393_s2 = inlined_call_operand.vmem [shape: f32[3,3,128], index: 2, kind: input, shape index: {}]   ;;  %s1394_s3 = inlined_call_operand.vmem [shape: f32[128,128], index: 3, kind: output, shape index: {}]  }
   0x1   :  { %v963_v0 = vld [vmem:[%s1391_s1] sm:$0xff]   ;;  %v964_v1 = vld [vmem:[%s1391_s1 + $0x8] sm:$0xff]   ;;  %v965_v2 = vld [vmem:[%s1391_s1 + $0x10] sm:$0xff]  }
   0x2   :  { %851 = vmatprep.subr.bf16.mxu0 %v963_v0  ;;  %v966_v3 = vld [vmem:[%s1391_s1 + $0x18] sm:$0xff]   ;;  %v15_v4 = vld [vmem:[%s1392_s0] sm:$0xff]  ;;  %v16_v5 = vld [vmem:[%s1392_s0 + $0x8] sm:$0xff]  ;;  %v57_v46 = vshrl.u32 %v56_v45, 7 }
   0x3   :  { %852 = vmatpush3.bf16.msra.mxu0 %v963_v0  ;;  %v48_v6 = vpack.c.bf16 %v16_v5, %v15_v4  ;;  %v967_v7 = vld [vmem:[%s1391_s1 + $0x20] sm:$0xff]   ;;  %v972_v9 = vld [vmem:[%s1391_s1 + $0x48] sm:$0xff]   ;;  %v969_v11 = vld [vmem:[%s1391_s1 + $0x30] sm:$0xff]  }
   0x4   :  { %853 = vmatprep.subr.bf16.mxu0 %v964_v1  ;;  %v971_v8 = vld [vmem:[%s1391_s1 + $0x40] sm:$0xff]   ;;  %v968_v10 = vld [vmem:[%s1391_s1 + $0x28] sm:$0xff]   ;;  %v973_v12 = vld [vmem:[%s1391_s1 + $0x50] sm:$0xff]   ;;  %v1139_v47 = vsub.s32 0, %v57_v46  ;;  %v1144_v49 = vsub.s32 1, %v57_v46  ;;  %v1149_v51 = vsub.s32 2, %v57_v46 }
   0x5   :  { %867 = vmatprep.mubr.bf16.mxu0 %v48_v6  ;;  %883 = vmatprep.subr.bf16.mxu1 %v971_v8  ;;  %v974_v13 = vld [vmem:[%s1391_s1 + $0x58] sm:$0xff]   ;;  %v975_v15 = vld [vmem:[%s1391_s1 + $0x60] sm:$0xff]   ;;  %v17_v16 = vld [vmem:[%s1392_s0 + $0x10] sm:$0xff] }
   0x6   :  { %884 = vmatpush3.bf16.msra.mxu1 %v971_v8  ;;  %v970_v14 = vld [vmem:[%s1391_s1 + $0x38] sm:$0xff]   ;;  %v19_v18 = vld [vmem:[%s1392_s0 + $0x20] sm:$0xff]  ;;  %v20_v19 = vld [vmem:[%s1392_s0 + $0x28] sm:$0xff] }
   0x7   :  { %854 = vmatpush3.bf16.msra.mxu0 %v964_v1  ;;  %885 = vmatprep.subr.bf16.mxu1 %v972_v9  ;;  %v18_v17 = vld [vmem:[%s1392_s0 + $0x18] sm:$0xff]  ;;  %v50_v21 = vpack.c.bf16 %v20_v19, %v19_v18  ;;  %v21_v22 = vld [vmem:[%s1392_s0 + $0x30] sm:$0xff]  ;;  %v23_v24 = vld [vmem:[%s1392_s0 + $0x40] sm:$0xff] }
   0x8   :  { %855 = vmatprep.subr.bf16.mxu0 %v965_v2  ;;  %v49_v20 = vpack.c.bf16 %v18_v17, %v17_v16  ;;  %v22_v23 = vld [vmem:[%s1392_s0 + $0x38] sm:$0xff]  ;;  %v24_v25 = vld [vmem:[%s1392_s0 + $0x48] sm:$0xff]  ;;  %v25_v28 = vld [vmem:[%s1392_s0 + $0x50] sm:$0xff] }
   0x9   :  { %v51_v26 = vpack.c.bf16 %v22_v23, %v21_v22  ;;  %v52_v27 = vpack.c.bf16 %v24_v25, %v23_v24  ;;  %v26_v29 = vld [vmem:[%s1392_s0 + $0x58] sm:$0xff]  ;;  %v27_v30 = vld [vmem:[%s1392_s0 + $0x60] sm:$0xff]  ;;  %v28_v31 = vld [vmem:[%s1392_s0 + $0x68] sm:$0xff] }
   0xa   :  { %886 = vmatpush3.bf16.msra.mxu1 %v972_v9  ;;  %v53_v32 = vpack.c.bf16 %v26_v29, %v25_v28  ;;  %v54_v33 = vpack.c.bf16 %v28_v31, %v27_v30  ;;  %v29_v34 = vld [vmem:[%s1392_s0 + $0x70] sm:$0xff]  ;;  %v30_v35 = vld [vmem:[%s1392_s0 + $0x78] sm:$0xff]  ;;  %v976_v37 = vld [vmem:[%s1391_s1 + $0x68] sm:$0xff]  }
   0xb   :  { %856 = vmatpush3.bf16.msra.mxu0 %v965_v2  ;;  %887 = vmatprep.subr.bf16.mxu1 %v973_v12  ;;  %v55_v36 = vpack.c.bf16 %v30_v35, %v29_v34  ;;  %v977_v38 = vld [vmem:[%s1391_s1 + $0x70] sm:$0xff]   ;;  %v978_v39 = vld [vmem:[%s1391_s1 + $0x78] sm:$0xff]   ;;  %v1106_v40 = vld [vmem:[%s1391_s1 + $0x80] sm:$0xff]  }
   0xc   :  { %857 = vmatprep.subr.bf16.mxu0 %v966_v3  ;;  %v1111_v41 = vld [vmem:[%s1391_s1 + $0x88] sm:$0xff]   ;;  %v1120_v42 = vld [vmem:[%s1391_s1 + $0x90] sm:$0xff]   ;;  %v1127_v43 = vld [vmem:[%s1391_s1 + $0x98] sm:$0xff]  }
   0xd   :  { %v1134_v44 = vld [vmem:[%s1391_s1 + $0xa0] sm:$0xff]  }
   0xe   :  { %888 = vmatpush3.bf16.msra.mxu1 %v973_v12  ;;  %v47_v48 = vld [vmem:[%s1393_s2] sm:$0x7] }
   0xf   :  { %858 = vmatpush3.bf16.msra.mxu0 %v966_v3  ;;  %889 = vmatprep.subr.bf16.mxu1 %v974_v13  ;;  %v1147_v50 = vrot.slane %v47_v48, %v1139_v47  ;;  %v1152_v52 = vrot.slane %v47_v48, %v1144_v49  ;;  %v1156_v55 = vrot.slane %v47_v48, %v1149_v51 }
  0x10   :  { %859 = vmatprep.subr.bf16.mxu0 %v967_v7 }
  0x12   :  { %890 = vmatpush3.bf16.msra.mxu1 %v974_v13 }
  0x13   :  { %860 = vmatpush3.bf16.msra.mxu0 %v967_v7  ;;  %891 = vmatprep.subr.bf16.mxu1 %v975_v15 }
  0x14   :  { %861 = vmatprep.subr.bf16.mxu0 %v968_v10 }
  0x16   :  { %892 = vmatpush3.bf16.msra.mxu1 %v975_v15 }
  0x17   :  { %862 = vmatpush3.bf16.msra.mxu0 %v968_v10  ;;  %893 = vmatprep.subr.bf16.mxu1 %v976_v37 }
  0x18   :  { %863 = vmatprep.subr.bf16.mxu0 %v969_v11 }
  0x1a   :  { %894 = vmatpush3.bf16.msra.mxu1 %v976_v37 }
  0x1b   :  { %864 = vmatpush3.bf16.msra.mxu0 %v969_v11  ;;  %895 = vmatprep.subr.bf16.mxu1 %v977_v38 }
  0x1c   :  { %865 = vmatprep.subr.bf16.mxu0 %v970_v14 }
  0x1e   :  { %896 = vmatpush3.bf16.msra.mxu1 %v977_v38 }
  0x1f   :  { %866 = vmatpush3.bf16.msra.mxu0 %v970_v14  ;;  %897 = vmatprep.subr.bf16.mxu1 %v978_v39 }
  0x20   :  { %915 = vmatprep.subr.bf16.mxu0 %v1106_v40 }
  0x22   :  { %868 = vmatmul.mubr.bf16.vlgmr.msra.gmra.mrb[0].mxu0 %v49_v20  ;;  %898 = vmatpush3.bf16.msra.mxu1 %v978_v39 }
  0x23   :  { %871 = vmatprep.mubr.bf16.mxu0 %v50_v21  ;;  %947 = vmatprep.subr.bf16.mxu1 %v1106_v40 }
  0x24   :  { %916 = vmatpush3.bf16.msra.mxu0 %v1106_v40 }
  0x25   :  { %917 = vmatprep.subr.bf16.mxu0 %v1111_v41 }
  0x28   :  { %918 = vmatpush3.bf16.msra.mxu0 %v1111_v41 }
  0x29   :  { %919 = vmatprep.subr.bf16.mxu0 %v1120_v42 }
  0x2a   :  { %872 = vmatmul.mubr.bf16.gmra.mrb[4].mxu0 %v51_v26 }
  0x2b   :  { %875 = vmatprep.mubr.bf16.mxu0 %v52_v27 }
  0x2c   :  { %920 = vmatpush3.bf16.msra.mxu0 %v1120_v42 }
  0x2d   :  { %921 = vmatprep.subr.bf16.mxu0 %v1127_v43 }
  0x30   :  { %922 = vmatpush3.bf16.msra.mxu0 %v1127_v43 }
  0x31   :  { %923 = vmatprep.subr.bf16.mxu0 %v1134_v44 }
  0x32   :  { %876 = vmatmul.mubr.bf16.gmra.mrb[8].mxu0 %v53_v32 }
  0x33   :  { %879 = vmatprep.mubr.bf16.mxu0 %v54_v33 }
  0x34   :  { %924 = vmatpush3.bf16.msra.mxu0 %v1134_v44 }
  0x3a   :  { %880 = vmatmul.mubr.bf16.gmra.mrb[12].mxu0 %v55_v36 }
  0xf5   :  { %v869_v53 = vpop.f32.mrb[0].mxu0 }
  0xf6   :  { %v151_v54 = vadd.f32 %v869_v53, %v1147_v50  ;;  %v142_v56 = vpop.f32.mrb[1].mxu0 }
  0xf7   :  { %v143_v57 = vadd.f32 %v142_v56, %v1147_v50  ;;  %v870_v58 = vpop.f32.mrb[2].mxu0 }
  0xf8   :  { %v211_v59 = vmul.f32 %v1152_v52, %v151_v54  ;;  %v154_v60 = vadd.f32 %v870_v58, %v1147_v50  ;;  %v145_v61 = vpop.f32.mrb[3].mxu0 }
  0xf9   :  { %v209_v62 = vmul.f32 %v1152_v52, %v143_v57  ;;  %v146_v63 = vadd.f32 %v145_v61, %v1147_v50 }
  0xfa   :  { %v231_v0 = vadd.f32 %v1156_v55, %v211_v59  ;;  %v212_v1 = vmul.f32 %v1152_v52, %v154_v60 }
  0xfb   :  { %v210_v2 = vmul.f32 %v1152_v52, %v146_v63  ;;  %v229_v3 = vadd.f32 %v1156_v55, %v209_v62 }
  0xfc   :  { %v232_v4 = vadd.f32 %v1156_v55, %v212_v1  ;;  %v247_v7 = vmax.f32 %v231_v0, 0.0 }
  0xfd   :  { %v873_v5 = vpop.f32.mrb[4].mxu0  ;;  %v230_v6 = vadd.f32 %v1156_v55, %v210_v2  ;;  %v245_v13 = vmax.f32 %v229_v3, 0.0 }
  0xfe   :  { %v248_v8 = vmax.f32 %v232_v4, 0.0  ;;  %v167_v9 = vadd.f32 %v873_v5, %v1147_v50  ;;  %v158_v10 = vpop.f32.mrb[5].mxu0 }
  0xff   :  { %v159_v11 = vadd.f32 %v158_v10, %v1147_v50  ;;  %v874_v12 = vpop.f32.mrb[6].mxu0  ;;  %v246_v14 = vmax.f32 %v230_v6, 0.0 }
 0x100   :  { %v215_v15 = vmul.f32 %v1152_v52, %v167_v9  ;;  %v170_v16 = vadd.f32 %v874_v12, %v1147_v50  ;;  %v161_v17 = vpop.f32.mrb[7].mxu0  ;;  %v281_v18 = vpack.c.bf16 %v248_v8, %v247_v7 }
 0x101   :  { %v213_v19 = vmul.f32 %v1152_v52, %v159_v11  ;;  %v162_v20 = vadd.f32 %v161_v17, %v1147_v50  ;;  %v280_v21 = vpack.c.bf16 %v246_v14, %v245_v13 }
 0x102   :  { %v235_v22 = vadd.f32 %v1156_v55, %v215_v15  ;;  %v216_v23 = vmul.f32 %v1152_v52, %v170_v16 }
 0x103   :  { %v233_v24 = vadd.f32 %v1156_v55, %v213_v19  ;;  %v214_v25 = vmul.f32 %v1152_v52, %v162_v20  ;;  %899 = vmatprep.mubr.bf16.mxu1 %v280_v21  ;;  %v769_v20 = vld [vmem:[%s1393_s2 + $0x4] sm:$0x7] }
 0x104   :  { %v236_v26 = vadd.f32 %v1156_v55, %v216_v23  ;;  %900 = vmatmul.mubr.bf16.vlgmr.msra.gmra.mrb[0].mxu1 %v281_v18  ;;  %v251_v29 = vmax.f32 %v235_v22, 0.0  ;;  %v1227_v21 = vrot.slane %v769_v20, %v1139_v47  ;;  %v1230_v22 = vrot.slane %v769_v20, %v1144_v49 }
 0x105   :  { %v234_v27 = vadd.f32 %v1156_v55, %v214_v25  ;;  %v877_v28 = vpop.f32.mrb[8].mxu0  ;;  %955 = vmatpush3.bf16.msra.mxu1 %v1106_v40  ;;  %v249_v33 = vmax.f32 %v233_v24, 0.0  ;;  %v1234_v25 = vrot.slane %v769_v20, %v1149_v51 }
 0x106   :  { %v252_v30 = vmax.f32 %v236_v26, 0.0  ;;  %v183_v31 = vadd.f32 %v877_v28, %v1147_v50  ;;  %v174_v32 = vpop.f32.mrb[9].mxu0  ;;  %948 = vmatprep.subr.bf16.mxu1 %v1111_v41 }
 0x107   :  { %v250_v34 = vmax.f32 %v234_v27, 0.0  ;;  %v175_v35 = vadd.f32 %v174_v32, %v1147_v50  ;;  %v878_v36 = vpop.f32.mrb[10].mxu0 }
 0x108   :  { %v219_v37 = vmul.f32 %v1152_v52, %v183_v31  ;;  %v186_v38 = vadd.f32 %v878_v36, %v1147_v50  ;;  %v177_v39 = vpop.f32.mrb[11].mxu0  ;;  %v283_v45 = vpack.c.bf16 %v252_v30, %v251_v29 }
 0x109   :  { %v217_v40 = vmul.f32 %v1152_v52, %v175_v35  ;;  %v178_v46 = vadd.f32 %v177_v39, %v1147_v50  ;;  %v282_v48 = vpack.c.bf16 %v250_v34, %v249_v33  ;;  %956 = vmatpush3.bf16.msra.mxu1 %v1111_v41 }
 0x10a   :  { %v239_v53 = vadd.f32 %v1156_v55, %v219_v37  ;;  %v220_v54 = vmul.f32 %v1152_v52, %v186_v38  ;;  %949 = vmatprep.subr.bf16.mxu1 %v1120_v42 }
 0x10b   :  { %v237_v56 = vadd.f32 %v1156_v55, %v217_v40  ;;  %v218_v57 = vmul.f32 %v1152_v52, %v178_v46  ;;  %903 = vmatprep.mubr.bf16.mxu1 %v282_v48 }
 0x10c   :  { %v240_v58 = vadd.f32 %v1156_v55, %v220_v54  ;;  %904 = vmatmul.mubr.bf16.gmra.mrb[4].mxu1 %v283_v45  ;;  %v255_v41 = vmax.f32 %v239_v53, 0.0 }
 0x10d   :  { %v238_v59 = vadd.f32 %v1156_v55, %v218_v57  ;;  %v881_v60 = vpop.f32.mrb[12].mxu0  ;;  %957 = vmatpush3.bf16.msra.mxu1 %v1120_v42  ;;  %v253_v0 = vmax.f32 %v237_v56, 0.0 }
 0x10e   :  { %v256_v61 = vmax.f32 %v240_v58, 0.0  ;;  %v199_v62 = vadd.f32 %v881_v60, %v1147_v50  ;;  %v190_v63 = vpop.f32.mrb[13].mxu0  ;;  %950 = vmatprep.subr.bf16.mxu1 %v1127_v43 }
 0x10f   :  { %v254_v1 = vmax.f32 %v238_v59, 0.0  ;;  %v191_v2 = vadd.f32 %v190_v63, %v1147_v50  ;;  %v882_v3 = vpop.f32.mrb[14].mxu0 }
 0x110   :  { %v223_v4 = vmul.f32 %v1152_v52, %v199_v62  ;;  %v202_v5 = vadd.f32 %v882_v3, %v1147_v50  ;;  %v193_v6 = vpop.f32.mrb[15].mxu0  ;;  %v285_v7 = vpack.c.bf16 %v256_v61, %v255_v41 }
 0x111   :  { %v221_v42 = vmul.f32 %v1152_v52, %v191_v2  ;;  %v194_v8 = vadd.f32 %v193_v6, %v1147_v50  ;;  %v284_v9 = vpack.c.bf16 %v254_v1, %v253_v0  ;;  %958 = vmatpush3.bf16.msra.mxu1 %v1127_v43 }
 0x112   :  { %v243_v10 = vadd.f32 %v1156_v55, %v223_v4  ;;  %v224_v11 = vmul.f32 %v1152_v52, %v202_v5  ;;  %951 = vmatprep.subr.bf16.mxu1 %v1134_v44 }
 0x113   :  { %v241_v12 = vadd.f32 %v1156_v55, %v221_v42  ;;  %v222_v13 = vmul.f32 %v1152_v52, %v194_v8  ;;  %907 = vmatprep.mubr.bf16.mxu1 %v284_v9  ;;  %v984_v52 = vld [vmem:[%s1391_s1 + $0xa8] sm:$0xff]  }
 0x114   :  { %v244_v14 = vadd.f32 %v1156_v55, %v224_v11  ;;  %908 = vmatmul.mubr.bf16.gmra.mrb[8].mxu1 %v285_v7  ;;  %v259_v50 = vmax.f32 %v243_v10, 0.0  ;;  %925 = vmatprep.subr.bf16.mxu0 %v984_v52 }
 0x115   :  { %v242_v15 = vadd.f32 %v1156_v55, %v222_v13  ;;  %959 = vmatpush3.bf16.msra.mxu1 %v1134_v44  ;;  %v257_v16 = vmax.f32 %v241_v12, 0.0  ;;  %926 = vmatpush3.bf16.msra.mxu0 %v984_v52  ;;  %v985_v44 = vld [vmem:[%s1391_s1 + $0xb0] sm:$0xff]   ;;  %v986_v55 = vld [vmem:[%s1391_s1 + $0xb8] sm:$0xff]  }
 0x116   :  { %v260_v43 = vmax.f32 %v244_v14, 0.0  ;;  %952 = vmatprep.subr.bf16.mxu1 %v984_v52  ;;  %927 = vmatprep.subr.bf16.mxu0 %v985_v44 }
 0x117   :  { %v258_v17 = vmax.f32 %v242_v15, 0.0 }
 0x118   :  { %v287_v18 = vpack.c.bf16 %v260_v43, %v259_v50 }
 0x119   :  { %v286_v19 = vpack.c.bf16 %v258_v17, %v257_v16  ;;  %960 = vmatpush3.bf16.msra.mxu1 %v984_v52  ;;  %928 = vmatpush3.bf16.msra.mxu0 %v985_v44 }
 0x11a   :  { %953 = vmatprep.subr.bf16.mxu1 %v985_v44  ;;  %929 = vmatprep.subr.bf16.mxu0 %v986_v55 }
 0x11b   :  { %911 = vmatprep.mubr.bf16.mxu1 %v286_v19 }
 0x11c   :  { %912 = vmatmul.mubr.bf16.gmra.mrb[12].mxu1 %v287_v18 }
 0x11d   :  { %961 = vmatpush3.bf16.msra.mxu1 %v985_v44  ;;  %930 = vmatpush3.bf16.msra.mxu0 %v986_v55 }
 0x11e   :  { %954 = vmatprep.subr.bf16.mxu1 %v986_v55 }
 0x121   :  { %962 = vmatpush3.bf16.msra.mxu1 %v986_v55 }
 0x1d7   :  { %v901_v23 = vpop.f32.mrb[0].mxu1 }
 0x1d8   :  { %v383_v24 = vadd.f32 %v901_v23, %v1227_v21  ;;  %v374_v26 = vpop.f32.mrb[1].mxu1 }
 0x1d9   :  { %v375_v27 = vadd.f32 %v374_v26, %v1227_v21  ;;  %v902_v28 = vpop.f32.mrb[2].mxu1 }
 0x1da   :  { %v443_v29 = vmul.f32 %v1230_v22, %v383_v24  ;;  %v386_v30 = vadd.f32 %v902_v28, %v1227_v21  ;;  %v377_v31 = vpop.f32.mrb[3].mxu1 }
 0x1db   :  { %v441_v32 = vmul.f32 %v1230_v22, %v375_v27  ;;  %v378_v33 = vadd.f32 %v377_v31, %v1227_v21 }
 0x1dc   :  { %v463_v34 = vadd.f32 %v1234_v25, %v443_v29  ;;  %v444_v35 = vmul.f32 %v1230_v22, %v386_v30 }
 0x1dd   :  { %v461_v36 = vadd.f32 %v1234_v25, %v441_v32  ;;  %v442_v37 = vmul.f32 %v1230_v22, %v378_v33 }
 0x1de   :  { %v464_v38 = vadd.f32 %v1234_v25, %v444_v35  ;;  %v479_v40 = vmax.f32 %v463_v34, 0.0 }
 0x1df   :  { %v462_v39 = vadd.f32 %v1234_v25, %v442_v37  ;;  %v905_v45 = vpop.f32.mrb[4].mxu1  ;;  %v477_v54 = vmax.f32 %v461_v36, 0.0 }
 0x1e0   :  { %v480_v46 = vmax.f32 %v464_v38, 0.0  ;;  %v399_v48 = vadd.f32 %v905_v45, %v1227_v21  ;;  %v390_v53 = vpop.f32.mrb[5].mxu1 }
 0x1e1   :  { %v478_v56 = vmax.f32 %v462_v39, 0.0  ;;  %v391_v57 = vadd.f32 %v390_v53, %v1227_v21  ;;  %v906_v58 = vpop.f32.mrb[6].mxu1 }
 0x1e2   :  { %v513_v59 = vpack.c.bf16 %v480_v46, %v479_v40  ;;  %v447_v60 = vmul.f32 %v1230_v22, %v399_v48  ;;  %v402_v41 = vadd.f32 %v906_v58, %v1227_v21  ;;  %v393_v61 = vpop.f32.mrb[7].mxu1 }
 0x1e3   :  { %v445_v62 = vmul.f32 %v1230_v22, %v391_v57  ;;  %v394_v63 = vadd.f32 %v393_v61, %v1227_v21  ;;  %v512_v0 = vpack.c.bf16 %v478_v56, %v477_v54 }
 0x1e4   :  { %v467_v1 = vadd.f32 %v1234_v25, %v447_v60  ;;  %v448_v2 = vmul.f32 %v1230_v22, %v402_v41 }
 0x1e5   :  { %v465_v3 = vadd.f32 %v1234_v25, %v445_v62  ;;  %v446_v4 = vmul.f32 %v1230_v22, %v394_v63  ;;  %931 = vmatprep.mubr.bf16.mxu0 %v512_v0  ;;  %v794_v62 = vld [vmem:[%s1393_s2 + $0x8] sm:$0x7] }
 0x1e6   :  { %v468_v5 = vadd.f32 %v1234_v25, %v448_v2  ;;  %932 = vmatmul.mubr.bf16.vlgmr.msra.gmra.mrb[16].mxu0 %v513_v59  ;;  %v483_v42 = vmax.f32 %v467_v1, 0.0  ;;  %v1290_v63 = vrot.slane %v794_v62, %v1144_v49  ;;  %v1294_v1 = vrot.slane %v794_v62, %v1149_v51 }
 0x1e7   :  { %v466_v6 = vadd.f32 %v1234_v25, %v446_v4  ;;  %v909_v7 = vpop.f32.mrb[8].mxu1  ;;  %v481_v11 = vmax.f32 %v465_v3, 0.0 }
 0x1e8   :  { %v484_v8 = vmax.f32 %v468_v5, 0.0  ;;  %v415_v9 = vadd.f32 %v909_v7, %v1227_v21  ;;  %v406_v10 = vpop.f32.mrb[9].mxu1 }
 0x1e9   :  { %v482_v12 = vmax.f32 %v466_v6, 0.0  ;;  %v407_v13 = vadd.f32 %v406_v10, %v1227_v21  ;;  %v910_v14 = vpop.f32.mrb[10].mxu1 }
 0x1ea   :  { %v451_v15 = vmul.f32 %v1230_v22, %v415_v9  ;;  %v418_v50 = vadd.f32 %v910_v14, %v1227_v21  ;;  %v409_v43 = vpop.f32.mrb[11].mxu1  ;;  %v515_v16 = vpack.c.bf16 %v484_v8, %v483_v42 }
 0x1eb   :  { %v449_v17 = vmul.f32 %v1230_v22, %v407_v13  ;;  %v410_v18 = vadd.f32 %v409_v43, %v1227_v21  ;;  %v514_v19 = vpack.c.bf16 %v482_v12, %v481_v11 }
 0x1ec   :  { %v471_v52 = vadd.f32 %v1234_v25, %v451_v15  ;;  %v452_v44 = vmul.f32 %v1230_v22, %v418_v50 }
 0x1ed   :  { %v469_v55 = vadd.f32 %v1234_v25, %v449_v17  ;;  %v450_v20 = vmul.f32 %v1230_v22, %v410_v18  ;;  %935 = vmatprep.mubr.bf16.mxu0 %v514_v19 }
 0x1ee   :  { %v472_v23 = vadd.f32 %v1234_v25, %v452_v44  ;;  %936 = vmatmul.mubr.bf16.gmra.mrb[20].mxu0 %v515_v16  ;;  %v487_v27 = vmax.f32 %v471_v52, 0.0 }
 0x1ef   :  { %v470_v24 = vadd.f32 %v1234_v25, %v450_v20  ;;  %v913_v26 = vpop.f32.mrb[12].mxu1  ;;  %v485_v31 = vmax.f32 %v469_v55, 0.0 }
 0x1f0   :  { %v488_v28 = vmax.f32 %v472_v23, 0.0  ;;  %v431_v29 = vadd.f32 %v913_v26, %v1227_v21  ;;  %v422_v30 = vpop.f32.mrb[13].mxu1 }
 0x1f1   :  { %v486_v32 = vmax.f32 %v470_v24, 0.0  ;;  %v423_v33 = vadd.f32 %v422_v30, %v1227_v21  ;;  %v914_v34 = vpop.f32.mrb[14].mxu1 }
 0x1f2   :  { %v517_v35 = vpack.c.bf16 %v488_v28, %v487_v27  ;;  %v455_v36 = vmul.f32 %v1230_v22, %v431_v29  ;;  %v434_v37 = vadd.f32 %v914_v34, %v1227_v21  ;;  %v425_v38 = vpop.f32.mrb[15].mxu1 }
 0x1f3   :  { %v453_v39 = vmul.f32 %v1230_v22, %v423_v33  ;;  %v426_v45 = vadd.f32 %v425_v38, %v1227_v21  ;;  %v516_v40 = vpack.c.bf16 %v486_v32, %v485_v31 }
 0x1f4   :  { %v475_v46 = vadd.f32 %v1234_v25, %v455_v36  ;;  %v456_v48 = vmul.f32 %v1230_v22, %v434_v37 }
 0x1f5   :  { %v473_v53 = vadd.f32 %v1234_v25, %v453_v39  ;;  %v454_v54 = vmul.f32 %v1230_v22, %v426_v45  ;;  %939 = vmatprep.mubr.bf16.mxu1 %v516_v40  ;;  %v1287_v22 = vrot.slane %v794_v62, %v1139_v47 }
 0x1f6   :  { %v476_v56 = vadd.f32 %v1234_v25, %v456_v48  ;;  %940 = vmatmul.mubr.bf16.vlgmr.msra.gmra.mrb[16].mxu1 %v517_v35  ;;  %v491_v58 = vmax.f32 %v475_v46, 0.0 }
 0x1f7   :  { %v474_v57 = vadd.f32 %v1234_v25, %v454_v54  ;;  %v489_v60 = vmax.f32 %v473_v53, 0.0 }
 0x1f8   :  { %v492_v59 = vmax.f32 %v476_v56, 0.0 }
 0x1f9   :  { %v490_v41 = vmax.f32 %v474_v57, 0.0 }
 0x1fa   :  { %v519_v21 = vpack.c.bf16 %v492_v59, %v491_v58 }
 0x1fb   :  { %v518_v61 = vpack.c.bf16 %v490_v41, %v489_v60 }
 0x1fd   :  { %943 = vmatprep.mubr.bf16.mxu1 %v518_v61 }
 0x1fe   :  { %944 = vmatmul.mubr.bf16.gmra.mrb[20].mxu1 %v519_v21 }
 0x2b9   :  { %v933_v0 = vpop.f32.mrb[16].mxu0 }
 0x2ba   :  { %v615_v25 = vadd.f32 %v933_v0, %v1287_v22  ;;  %v606_v2 = vpop.f32.mrb[17].mxu0 }
 0x2bb   :  { %v607_v3 = vadd.f32 %v606_v2, %v1287_v22  ;;  %v934_v4 = vpop.f32.mrb[18].mxu0 }
 0x2bc   :  { %v675_v5 = vmul.f32 %v1290_v63, %v615_v25  ;;  %v618_v6 = vadd.f32 %v934_v4, %v1287_v22  ;;  %v609_v7 = vpop.f32.mrb[19].mxu0 }
 0x2bd   :  { %v673_v47 = vmul.f32 %v1290_v63, %v607_v3  ;;  %v610_v49 = vadd.f32 %v609_v7, %v1287_v22 }
 0x2be   :  { %v695_v42 = vadd.f32 %v1294_v1, %v675_v5  ;;  %v676_v8 = vmul.f32 %v1290_v63, %v618_v6 }
 0x2bf   :  { %v693_v51 = vadd.f32 %v1294_v1, %v673_v47  ;;  %v674_v9 = vmul.f32 %v1290_v63, %v610_v49 }
 0x2c0   :  { %v711_v10 = vmax.f32 %v695_v42, 0.0  ;;  %v696_v11 = vadd.f32 %v1294_v1, %v676_v8 }
 0x2c1   :  { %v709_v12 = vmax.f32 %v693_v51, 0.0  ;;  %v694_v13 = vadd.f32 %v1294_v1, %v674_v9  ;;  %v937_v14 = vpop.f32.mrb[20].mxu0 }
 0x2c2   :  { %727 = vst [vmem:[%s1394_s3 + $0x10] sm:$0xff] %v711_v10  ;;  %v712_v15 = vmax.f32 %v696_v11, 0.0  ;;  %v631_v50 = vadd.f32 %v937_v14, %v1287_v22  ;;  %v622_v43 = vpop.f32.mrb[21].mxu0 }
 0x2c3   :  { %725 = vst [vmem:[%s1394_s3] sm:$0xff] %v709_v12  ;;  %v710_v16 = vmax.f32 %v694_v13, 0.0  ;;  %v623_v17 = vadd.f32 %v622_v43, %v1287_v22  ;;  %v938_v18 = vpop.f32.mrb[22].mxu0 }
 0x2c4   :  { %728 = vst [vmem:[%s1394_s3 + $0x18] sm:$0xff] %v712_v15  ;;  %v679_v19 = vmul.f32 %v1290_v63, %v631_v50  ;;  %v634_v52 = vadd.f32 %v938_v18, %v1287_v22  ;;  %v625_v44 = vpop.f32.mrb[23].mxu0 }
 0x2c5   :  { %726 = vst [vmem:[%s1394_s3 + $0x8] sm:$0xff] %v710_v16  ;;  %v677_v55 = vmul.f32 %v1290_v63, %v623_v17  ;;  %v626_v20 = vadd.f32 %v625_v44, %v1287_v22 }
 0x2c6   :  { %v699_v23 = vadd.f32 %v1294_v1, %v679_v19  ;;  %v680_v24 = vmul.f32 %v1290_v63, %v634_v52 }
 0x2c7   :  { %v697_v26 = vadd.f32 %v1294_v1, %v677_v55  ;;  %v678_v27 = vmul.f32 %v1290_v63, %v626_v20 }
 0x2c8   :  { %v715_v28 = vmax.f32 %v699_v23, 0.0  ;;  %v700_v29 = vadd.f32 %v1294_v1, %v680_v24 }
 0x2c9   :  { %v713_v30 = vmax.f32 %v697_v26, 0.0  ;;  %v698_v31 = vadd.f32 %v1294_v1, %v678_v27  ;;  %v941_v32 = vpop.f32.mrb[16].mxu1 }
 0x2ca   :  { %731 = vst [vmem:[%s1394_s3 + $0x30] sm:$0xff] %v715_v28  ;;  %v716_v33 = vmax.f32 %v700_v29, 0.0  ;;  %v647_v34 = vadd.f32 %v941_v32, %v1287_v22  ;;  %v638_v35 = vpop.f32.mrb[17].mxu1 }
 0x2cb   :  { %729 = vst [vmem:[%s1394_s3 + $0x20] sm:$0xff] %v713_v30  ;;  %v714_v36 = vmax.f32 %v698_v31, 0.0  ;;  %v639_v37 = vadd.f32 %v638_v35, %v1287_v22  ;;  %v942_v38 = vpop.f32.mrb[18].mxu1 }
 0x2cc   :  { %732 = vst [vmem:[%s1394_s3 + $0x38] sm:$0xff] %v716_v33  ;;  %v683_v39 = vmul.f32 %v1290_v63, %v647_v34  ;;  %v650_v45 = vadd.f32 %v942_v38, %v1287_v22  ;;  %v641_v40 = vpop.f32.mrb[19].mxu1 }
 0x2cd   :  { %730 = vst [vmem:[%s1394_s3 + $0x28] sm:$0xff] %v714_v36  ;;  %v681_v46 = vmul.f32 %v1290_v63, %v639_v37  ;;  %v642_v48 = vadd.f32 %v641_v40, %v1287_v22 }
 0x2ce   :  { %v703_v53 = vadd.f32 %v1294_v1, %v683_v39  ;;  %v684_v54 = vmul.f32 %v1290_v63, %v650_v45 }
 0x2cf   :  { %v701_v56 = vadd.f32 %v1294_v1, %v681_v46  ;;  %v682_v57 = vmul.f32 %v1290_v63, %v642_v48 }
 0x2d0   :  { %v719_v58 = vmax.f32 %v703_v53, 0.0  ;;  %v704_v59 = vadd.f32 %v1294_v1, %v684_v54 }
 0x2d1   :  { %v717_v60 = vmax.f32 %v701_v56, 0.0  ;;  %v702_v41 = vadd.f32 %v1294_v1, %v682_v57  ;;  %v945_v21 = vpop.f32.mrb[20].mxu1 }
 0x2d2   :  { %735 = vst [vmem:[%s1394_s3 + $0x50] sm:$0xff] %v719_v58  ;;  %v720_v61 = vmax.f32 %v704_v59, 0.0  ;;  %v663_v62 = vadd.f32 %v945_v21, %v1287_v22  ;;  %v654_v0 = vpop.f32.mrb[21].mxu1 }
 0x2d3   :  { %733 = vst [vmem:[%s1394_s3 + $0x40] sm:$0xff] %v717_v60  ;;  %v718_v25 = vmax.f32 %v702_v41, 0.0  ;;  %v655_v2 = vadd.f32 %v654_v0, %v1287_v22  ;;  %v946_v3 = vpop.f32.mrb[22].mxu1 }
 0x2d4   :  { %736 = vst [vmem:[%s1394_s3 + $0x58] sm:$0xff] %v720_v61  ;;  %v687_v4 = vmul.f32 %v1290_v63, %v663_v62  ;;  %v666_v5 = vadd.f32 %v946_v3, %v1287_v22  ;;  %v657_v6 = vpop.f32.mrb[23].mxu1 }
 0x2d5   :  { %734 = vst [vmem:[%s1394_s3 + $0x48] sm:$0xff] %v718_v25  ;;  %v685_v7 = vmul.f32 %v1290_v63, %v655_v2  ;;  %v658_v47 = vadd.f32 %v657_v6, %v1287_v22 }
 0x2d6   :  { %v707_v49 = vadd.f32 %v1294_v1, %v687_v4  ;;  %v688_v42 = vmul.f32 %v1290_v63, %v666_v5 }
 0x2d7   :  { %v705_v8 = vadd.f32 %v1294_v1, %v685_v7  ;;  %v686_v51 = vmul.f32 %v1290_v63, %v658_v47 }
 0x2d8   :  { %v723_v9 = vmax.f32 %v707_v49, 0.0  ;;  %v708_v10 = vadd.f32 %v1294_v1, %v688_v42 }
 0x2d9   :  { %v721_v11 = vmax.f32 %v705_v8, 0.0  ;;  %v706_v12 = vadd.f32 %v1294_v1, %v686_v51 }
 0x2da   :  { %739 = vst [vmem:[%s1394_s3 + $0x70] sm:$0xff] %v723_v9  ;;  %v724_v13 = vmax.f32 %v708_v10, 0.0 }
 0x2db   :  { %737 = vst [vmem:[%s1394_s3 + $0x60] sm:$0xff] %v721_v11  ;;  %v722_v22 = vmax.f32 %v706_v12, 0.0 }
 0x2dc   :  { %740 = vst [vmem:[%s1394_s3 + $0x78] sm:$0xff] %v724_v13 }
 0x2dd   :  { %738 = vst [vmem:[%s1394_s3 + $0x68] sm:$0xff] %v722_v22 }

// kernel: net_forward.10
= control target key start
LH: loop header
LB: loop body
LE: loop exit
PB: predicated region body
PF: predicated region fallthrough
CT: control target
= control target key end

     0   :  { %v56_v45 = vlaneseq  ;;  %s1510_s1 = inlined_call_operand.vmem [shape: bf16[3,128,128], index: 1, kind: input, shape index: {}]   ;;  %s1511_s0 = inlined_call_operand.vmem [shape: f32[128,128], index: 0, kind: input, shape index: {}]   ;;  %s1512_s2 = inlined_call_operand.vmem [shape: f32[3,3,128], index: 2, kind: input, shape index: {}]   ;;  %s1513_s3 = inlined_call_operand.vmem [shape: bf16[128,128], index: 3, kind: output, shape index: {}]  }
   0x1   :  { %v1106_v0 = vld [vmem:[%s1510_s1] sm:$0xff]   ;;  %v1107_v1 = vld [vmem:[%s1510_s1 + $0x8] sm:$0xff]   ;;  %v1108_v2 = vld [vmem:[%s1510_s1 + $0x10] sm:$0xff]  }
   0x2   :  { %994 = vmatprep.subr.bf16.mxu0 %v1106_v0  ;;  %v1109_v3 = vld [vmem:[%s1510_s1 + $0x18] sm:$0xff]   ;;  %v15_v4 = vld [vmem:[%s1511_s0] sm:$0xff]  ;;  %v16_v5 = vld [vmem:[%s1511_s0 + $0x8] sm:$0xff]  ;;  %v57_v46 = vshrl.u32 %v56_v45, 7 }
   0x3   :  { %995 = vmatpush3.bf16.msra.mxu0 %v1106_v0  ;;  %v48_v6 = vpack.c.bf16 %v16_v5, %v15_v4  ;;  %v1110_v7 = vld [vmem:[%s1510_s1 + $0x20] sm:$0xff]   ;;  %v1115_v9 = vld [vmem:[%s1510_s1 + $0x48] sm:$0xff]   ;;  %v1112_v11 = vld [vmem:[%s1510_s1 + $0x30] sm:$0xff]  }
   0x4   :  { %996 = vmatprep.subr.bf16.mxu0 %v1107_v1  ;;  %v1114_v8 = vld [vmem:[%s1510_s1 + $0x40] sm:$0xff]   ;;  %v1111_v10 = vld [vmem:[%s1510_s1 + $0x28] sm:$0xff]   ;;  %v1116_v12 = vld [vmem:[%s1510_s1 + $0x50] sm:$0xff]   ;;  %v1282_v47 = vsub.s32 0, %v57_v46  ;;  %v1287_v49 = vsub.s32 1, %v57_v46  ;;  %v1292_v51 = vsub.s32 2, %v57_v46 }
   0x5   :  { %1010 = vmatprep.mubr.bf16.mxu0 %v48_v6  ;;  %1026 = vmatprep.subr.bf16.mxu1 %v1114_v8  ;;  %v1117_v13 = vld [vmem:[%s1510_s1 + $0x58] sm:$0xff]   ;;  %v1118_v15 = vld [vmem:[%s1510_s1 + $0x60] sm:$0xff]   ;;  %v17_v16 = vld [vmem:[%s1511_s0 + $0x10] sm:$0xff] }
   0x6   :  { %1027 = vmatpush3.bf16.msra.mxu1 %v1114_v8  ;;  %v1113_v14 = vld [vmem:[%s1510_s1 + $0x38] sm:$0xff]   ;;  %v19_v18 = vld [vmem:[%s1511_s0 + $0x20] sm:$0xff]  ;;  %v20_v19 = vld [vmem:[%s1511_s0 + $0x28] sm:$0xff] }
   0x7   :  { %997 = vmatpush3.bf16.msra.mxu0 %v1107_v1  ;;  %1028 = vmatprep.subr.bf16.mxu1 %v1115_v9  ;;  %v18_v17 = vld [vmem:[%s1511_s0 + $0x18] sm:$0xff]  ;;  %v50_v21 = vpack.c.bf16 %v20_v19, %v19_v18  ;;  %v21_v22 = vld [vmem:[%s1511_s0 + $0x30] sm:$0xff]  ;;  %v23_v24 = vld [vmem:[%s1511_s0 + $0x40] sm:$0xff] }
   0x8   :  { %998 = vmatprep.subr.bf16.mxu0 %v1108_v2  ;;  %v49_v20 = vpack.c.bf16 %v18_v17, %v17_v16  ;;  %v22_v23 = vld [vmem:[%s1511_s0 + $0x38] sm:$0xff]  ;;  %v24_v25 = vld [vmem:[%s1511_s0 + $0x48] sm:$0xff]  ;;  %v25_v28 = vld [vmem:[%s1511_s0 + $0x50] sm:$0xff] }
   0x9   :  { %v51_v26 = vpack.c.bf16 %v22_v23, %v21_v22  ;;  %v52_v27 = vpack.c.bf16 %v24_v25, %v23_v24  ;;  %v26_v29 = vld [vmem:[%s1511_s0 + $0x58] sm:$0xff]  ;;  %v27_v30 = vld [vmem:[%s1511_s0 + $0x60] sm:$0xff]  ;;  %v28_v31 = vld [vmem:[%s1511_s0 + $0x68] sm:$0xff] }
   0xa   :  { %1029 = vmatpush3.bf16.msra.mxu1 %v1115_v9  ;;  %v53_v32 = vpack.c.bf16 %v26_v29, %v25_v28  ;;  %v54_v33 = vpack.c.bf16 %v28_v31, %v27_v30  ;;  %v29_v34 = vld [vmem:[%s1511_s0 + $0x70] sm:$0xff]  ;;  %v30_v35 = vld [vmem:[%s1511_s0 + $0x78] sm:$0xff]  ;;  %v1119_v37 = vld [vmem:[%s1510_s1 + $0x68] sm:$0xff]  }
   0xb   :  { %999 = vmatpush3.bf16.msra.mxu0 %v1108_v2  ;;  %1030 = vmatprep.subr.bf16.mxu1 %v1116_v12  ;;  %v55_v36 = vpack.c.bf16 %v30_v35, %v29_v34  ;;  %v1120_v38 = vld [vmem:[%s1510_s1 + $0x70] sm:$0xff]   ;;  %v1121_v39 = vld [vmem:[%s1510_s1 + $0x78] sm:$0xff]   ;;  %v1249_v40 = vld [vmem:[%s1510_s1 + $0x80] sm:$0xff]  }
   0xc   :  { %1000 = vmatprep.subr.bf16.mxu0 %v1109_v3  ;;  %v1254_v41 = vld [vmem:[%s1510_s1 + $0x88] sm:$0xff]   ;;  %v1263_v42 = vld [vmem:[%s1510_s1 + $0x90] sm:$0xff]   ;;  %v1270_v43 = vld [vmem:[%s1510_s1 + $0x98] sm:$0xff]  }
   0xd   :  { %v1277_v44 = vld [vmem:[%s1510_s1 + $0xa0] sm:$0xff]  }
   0xe   :  { %1031 = vmatpush3.bf16.msra.mxu1 %v1116_v12  ;;  %v47_v48 = vld [vmem:[%s1512_s2] sm:$0x7] }
   0xf   :  { %1001 = vmatpush3.bf16.msra.mxu0 %v1109_v3  ;;  %1032 = vmatprep.subr.bf16.mxu1 %v1117_v13  ;;  %v1290_v50 = vrot.slane %v47_v48, %v1282_v47  ;;  %v1295_v52 = vrot.slane %v47_v48, %v1287_v49  ;;  %v1299_v55 = vrot.slane %v47_v48, %v1292_v51 }
  0x10   :  { %1002 = vmatprep.subr.bf16.mxu0 %v1110_v7 }
  0x12   :  { %1033 = vmatpush3.bf16.msra.mxu1 %v1117_v13 }
  0x13   :  { %1003 = vmatpush3.bf16.msra.mxu0 %v1110_v7  ;;  %1034 = vmatprep.subr.bf16.mxu1 %v1118_v15 }
  0x14   :  { %1004 = vmatprep.subr.bf16.mxu0 %v1111_v10 }
  0x16   :  { %1035 = vmatpush3.bf16.msra.mxu1 %v1118_v15 }
  0x17   :  { %1005 = vmatpush3.bf16.msra.mxu0 %v1111_v10  ;;  %1036 = vmatprep.subr.bf16.mxu1 %v1119_v37 }
  0x18   :  { %1006 = vmatprep.subr.bf16.mxu0 %v1112_v11 }
  0x1a   :  { %1037 = vmatpush3.bf16.msra.mxu1 %v1119_v37 }
  0x1b   :  { %1007 = vmatpush3.bf16.msra.mxu0 %v1112_v11  ;;  %1038 = vmatprep.subr.bf16.mxu1 %v1120_v38 }
  0x1c   :  { %1008 = vmatprep.subr.bf16.mxu0 %v1113_v14 }
  0x1e   :  { %1039 = vmatpush3.bf16.msra.mxu1 %v1120_v38 }
  0x1f   :  { %1009 = vmatpush3.bf16.msra.mxu0 %v1113_v14  ;;  %1040 = vmatprep.subr.bf16.mxu1 %v1121_v39 }
  0x20   :  { %1058 = vmatprep.subr.bf16.mxu0 %v1249_v40 }
  0x22   :  { %1011 = vmatmul.mubr.bf16.vlgmr.msra.gmra.mrb[0].mxu0 %v49_v20  ;;  %1041 = vmatpush3.bf16.msra.mxu1 %v1121_v39 }
  0x23   :  { %1014 = vmatprep.mubr.bf16.mxu0 %v50_v21  ;;  %1090 = vmatprep.subr.bf16.mxu1 %v1249_v40 }
  0x24   :  { %1059 = vmatpush3.bf16.msra.mxu0 %v1249_v40 }
  0x25   :  { %1060 = vmatprep.subr.bf16.mxu0 %v1254_v41 }
  0x28   :  { %1061 = vmatpush3.bf16.msra.mxu0 %v1254_v41 }
  0x29   :  { %1062 = vmatprep.subr.bf16.mxu0 %v1263_v42 }
  0x2a   :  { %1015 = vmatmul.mubr.bf16.gmra.mrb[4].mxu0 %v51_v26 }
  0x2b   :  { %1018 = vmatprep.mubr.bf16.mxu0 %v52_v27 }
  0x2c   :  { %1063 = vmatpush3.bf16.msra.mxu0 %v1263_v42 }
  0x2d   :  { %1064 = vmatprep.subr.bf16.mxu0 %v1270_v43 }
  0x30   :  { %1065 = vmatpush3.bf16.msra.mxu0 %v1270_v43 }
  0x31   :  { %1066 = vmatprep.subr.bf16.mxu0 %v1277_v44 }
  0x32   :  { %1019 = vmatmul.mubr.bf16.gmra.mrb[8].mxu0 %v53_v32 }
  0x33   :  { %1022 = vmatprep.mubr.bf16.mxu0 %v54_v33 }
  0x34   :  { %1067 = vmatpush3.bf16.msra.mxu0 %v1277_v44 }
  0x3a   :  { %1023 = vmatmul.mubr.bf16.gmra.mrb[12].mxu0 %v55_v36 }
  0xf5   :  { %v1012_v53 = vpop.f32.mrb[0].mxu0 }
  0xf6   :  { %v151_v54 = vadd.f32 %v1012_v53, %v1290_v50  ;;  %v142_v56 = vpop.f32.mrb[1].mxu0 }
  0xf7   :  { %v143_v57 = vadd.f32 %v142_v56, %v1290_v50  ;;  %v1013_v58 = vpop.f32.mrb[2].mxu0 }
  0xf8   :  { %v211_v59 = vmul.f32 %v1295_v52, %v151_v54  ;;  %v154_v60 = vadd.f32 %v1013_v58, %v1290_v50  ;;  %v145_v61 = vpop.f32.mrb[3].mxu0 }
  0xf9   :  { %v209_v62 = vmul.f32 %v1295_v52, %v143_v57  ;;  %v146_v63 = vadd.f32 %v145_v61, %v1290_v50 }
  0xfa   :  { %v231_v0 = vadd.f32 %v1299_v55, %v211_v59  ;;  %v212_v1 = vmul.f32 %v1295_v52, %v154_v60 }
  0xfb   :  { %v210_v2 = vmul.f32 %v1295_v52, %v146_v63  ;;  %v229_v3 = vadd.f32 %v1299_v55, %v209_v62 }
  0xfc   :  { %v232_v4 = vadd.f32 %v1299_v55, %v212_v1  ;;  %v247_v7 = vmax.f32 %v231_v0, 0.0 }
  0xfd   :  { %v1016_v5 = vpop.f32.mrb[4].mxu0  ;;  %v230_v6 = vadd.f32 %v1299_v55, %v210_v2  ;;  %v245_v13 = vmax.f32 %v229_v3, 0.0 }
  0xfe   :  { %v248_v8 = vmax.f32 %v232_v4, 0.0  ;;  %v167_v9 = vadd.f32 %v1016_v5, %v1290_v50  ;;  %v158_v10 = vpop.f32.mrb[5].mxu0 }
  0xff   :  { %v159_v11 = vadd.f32 %v158_v10, %v1290_v50  ;;  %v1017_v12 = vpop.f32.mrb[6].mxu0  ;;  %v246_v14 = vmax.f32 %v230_v6, 0.0 }
 0x100   :  { %v215_v15 = vmul.f32 %v1295_v52, %v167_v9  ;;  %v170_v16 = vadd.f32 %v1017_v12, %v1290_v50  ;;  %v161_v17 = vpop.f32.mrb[7].mxu0  ;;  %v281_v18 = vpack.c.bf16 %v248_v8, %v247_v7 }
 0x101   :  { %v213_v19 = vmul.f32 %v1295_v52, %v159_v11  ;;  %v162_v20 = vadd.f32 %v161_v17, %v1290_v50  ;;  %v280_v21 = vpack.c.bf16 %v246_v14, %v245_v13 }
 0x102   :  { %v235_v22 = vadd.f32 %v1299_v55, %v215_v15  ;;  %v216_v23 = vmul.f32 %v1295_v52, %v170_v16 }
 0x103   :  { %v233_v24 = vadd.f32 %v1299_v55, %v213_v19  ;;  %v214_v25 = vmul.f32 %v1295_v52, %v162_v20  ;;  %1042 = vmatprep.mubr.bf16.mxu1 %v280_v21  ;;  %v833_v20 = vld [vmem:[%s1512_s2 + $0x4] sm:$0x7] }
 0x104   :  { %v236_v26 = vadd.f32 %v1299_v55, %v216_v23  ;;  %1043 = vmatmul.mubr.bf16.vlgmr.msra.gmra.mrb[0].mxu1 %v281_v18  ;;  %v251_v29 = vmax.f32 %v235_v22, 0.0  ;;  %v1370_v21 = vrot.slane %v833_v20, %v1282_v47  ;;  %v1373_v22 = vrot.slane %v833_v20, %v1287_v49 }
 0x105   :  { %v234_v27 = vadd.f32 %v1299_v55, %v214_v25  ;;  %v1020_v28 = vpop.f32.mrb[8].mxu0  ;;  %1098 = vmatpush3.bf16.msra.mxu1 %v1249_v40  ;;  %v249_v33 = vmax.f32 %v233_v24, 0.0  ;;  %v1377_v25 = vrot.slane %v833_v20, %v1292_v51 }
 0x106   :  { %v252_v30 = vmax.f32 %v236_v26, 0.0  ;;  %v183_v31 = vadd.f32 %v1020_v28, %v1290_v50  ;;  %v174_v32 = vpop.f32.mrb[9].mxu0  ;;  %1091 = vmatprep.subr.bf16.mxu1 %v1254_v41 }
 0x107   :  { %v250_v34 = vmax.f32 %v234_v27, 0.0  ;;  %v175_v35 = vadd.f32 %v174_v32, %v1290_v50  ;;  %v1021_v36 = vpop.f32.mrb[10].mxu0 }
 0x108   :  { %v219_v37 = vmul.f32 %v1295_v52, %v183_v31  ;;  %v186_v38 = vadd.f32 %v1021_v36, %v1290_v50  ;;  %v177_v39 = vpop.f32.mrb[11].mxu0  ;;  %v283_v45 = vpack.c.bf16 %v252_v30, %v251_v29 }
 0x109   :  { %v217_v40 = vmul.f32 %v1295_v52, %v175_v35  ;;  %v178_v46 = vadd.f32 %v177_v39, %v1290_v50  ;;  %v282_v48 = vpack.c.bf16 %v250_v34, %v249_v33  ;;  %1099 = vmatpush3.bf16.msra.mxu1 %v1254_v41 }
 0x10a   :  { %v239_v53 = vadd.f32 %v1299_v55, %v219_v37  ;;  %v220_v54 = vmul.f32 %v1295_v52, %v186_v38  ;;  %1092 = vmatprep.subr.bf16.mxu1 %v1263_v42 }
 0x10b   :  { %v237_v56 = vadd.f32 %v1299_v55, %v217_v40  ;;  %v218_v57 = vmul.f32 %v1295_v52, %v178_v46  ;;  %1046 = vmatprep.mubr.bf16.mxu1 %v282_v48 }
 0x10c   :  { %v240_v58 = vadd.f32 %v1299_v55, %v220_v54  ;;  %1047 = vmatmul.mubr.bf16.gmra.mrb[4].mxu1 %v283_v45  ;;  %v255_v41 = vmax.f32 %v239_v53, 0.0 }
 0x10d   :  { %v238_v59 = vadd.f32 %v1299_v55, %v218_v57  ;;  %v1024_v60 = vpop.f32.mrb[12].mxu0  ;;  %1100 = vmatpush3.bf16.msra.mxu1 %v1263_v42  ;;  %v253_v0 = vmax.f32 %v237_v56, 0.0 }
 0x10e   :  { %v256_v61 = vmax.f32 %v240_v58, 0.0  ;;  %v199_v62 = vadd.f32 %v1024_v60, %v1290_v50  ;;  %v190_v63 = vpop.f32.mrb[13].mxu0  ;;  %1093 = vmatprep.subr.bf16.mxu1 %v1270_v43 }
 0x10f   :  { %v254_v1 = vmax.f32 %v238_v59, 0.0  ;;  %v191_v2 = vadd.f32 %v190_v63, %v1290_v50  ;;  %v1025_v3 = vpop.f32.mrb[14].mxu0 }
 0x110   :  { %v223_v4 = vmul.f32 %v1295_v52, %v199_v62  ;;  %v202_v5 = vadd.f32 %v1025_v3, %v1290_v50  ;;  %v193_v6 = vpop.f32.mrb[15].mxu0  ;;  %v285_v7 = vpack.c.bf16 %v256_v61, %v255_v41 }
 0x111   :  { %v221_v42 = vmul.f32 %v1295_v52, %v191_v2  ;;  %v194_v8 = vadd.f32 %v193_v6, %v1290_v50  ;;  %v284_v9 = vpack.c.bf16 %v254_v1, %v253_v0  ;;  %1101 = vmatpush3.bf16.msra.mxu1 %v1270_v43 }
 0x112   :  { %v243_v10 = vadd.f32 %v1299_v55, %v223_v4  ;;  %v224_v11 = vmul.f32 %v1295_v52, %v202_v5  ;;  %1094 = vmatprep.subr.bf16.mxu1 %v1277_v44 }
 0x113   :  { %v241_v12 = vadd.f32 %v1299_v55, %v221_v42  ;;  %v222_v13 = vmul.f32 %v1295_v52, %v194_v8  ;;  %1050 = vmatprep.mubr.bf16.mxu1 %v284_v9  ;;  %v1127_v52 = vld [vmem:[%s1510_s1 + $0xa8] sm:$0xff]  }
 0x114   :  { %v244_v14 = vadd.f32 %v1299_v55, %v224_v11  ;;  %1051 = vmatmul.mubr.bf16.gmra.mrb[8].mxu1 %v285_v7  ;;  %v259_v50 = vmax.f32 %v243_v10, 0.0  ;;  %1068 = vmatprep.subr.bf16.mxu0 %v1127_v52 }
 0x115   :  { %v242_v15 = vadd.f32 %v1299_v55, %v222_v13  ;;  %1102 = vmatpush3.bf16.msra.mxu1 %v1277_v44  ;;  %v257_v16 = vmax.f32 %v241_v12, 0.0  ;;  %1069 = vmatpush3.bf16.msra.mxu0 %v1127_v52  ;;  %v1128_v44 = vld [vmem:[%s1510_s1 + $0xb0] sm:$0xff]   ;;  %v1129_v55 = vld [vmem:[%s1510_s1 + $0xb8] sm:$0xff]  }
 0x116   :  { %v260_v43 = vmax.f32 %v244_v14, 0.0  ;;  %1095 = vmatprep.subr.bf16.mxu1 %v1127_v52  ;;  %1070 = vmatprep.subr.bf16.mxu0 %v1128_v44 }
 0x117   :  { %v258_v17 = vmax.f32 %v242_v15, 0.0 }
 0x118   :  { %v287_v18 = vpack.c.bf16 %v260_v43, %v259_v50 }
 0x119   :  { %v286_v19 = vpack.c.bf16 %v258_v17, %v257_v16  ;;  %1103 = vmatpush3.bf16.msra.mxu1 %v1127_v52  ;;  %1071 = vmatpush3.bf16.msra.mxu0 %v1128_v44 }
 0x11a   :  { %1096 = vmatprep.subr.bf16.mxu1 %v1128_v44  ;;  %1072 = vmatprep.subr.bf16.mxu0 %v1129_v55 }
 0x11b   :  { %1054 = vmatprep.mubr.bf16.mxu1 %v286_v19 }
 0x11c   :  { %1055 = vmatmul.mubr.bf16.gmra.mrb[12].mxu1 %v287_v18 }
 0x11d   :  { %1104 = vmatpush3.bf16.msra.mxu1 %v1128_v44  ;;  %1073 = vmatpush3.bf16.msra.mxu0 %v1129_v55 }
 0x11e   :  { %1097 = vmatprep.subr.bf16.mxu1 %v1129_v55 }
 0x121   :  { %1105 = vmatpush3.bf16.msra.mxu1 %v1129_v55 }
 0x1d7   :  { %v1044_v23 = vpop.f32.mrb[0].mxu1 }
 0x1d8   :  { %v383_v24 = vadd.f32 %v1044_v23, %v1370_v21  ;;  %v374_v26 = vpop.f32.mrb[1].mxu1 }
 0x1d9   :  { %v375_v27 = vadd.f32 %v374_v26, %v1370_v21  ;;  %v1045_v28 = vpop.f32.mrb[2].mxu1 }
 0x1da   :  { %v443_v29 = vmul.f32 %v1373_v22, %v383_v24  ;;  %v386_v30 = vadd.f32 %v1045_v28, %v1370_v21  ;;  %v377_v31 = vpop.f32.mrb[3].mxu1 }
 0x1db   :  { %v441_v32 = vmul.f32 %v1373_v22, %v375_v27  ;;  %v378_v33 = vadd.f32 %v377_v31, %v1370_v21 }
 0x1dc   :  { %v463_v34 = vadd.f32 %v1377_v25, %v443_v29  ;;  %v444_v35 = vmul.f32 %v1373_v22, %v386_v30 }
 0x1dd   :  { %v461_v36 = vadd.f32 %v1377_v25, %v441_v32  ;;  %v442_v37 = vmul.f32 %v1373_v22, %v378_v33 }
 0x1de   :  { %v464_v38 = vadd.f32 %v1377_v25, %v444_v35  ;;  %v479_v40 = vmax.f32 %v463_v34, 0.0 }
 0x1df   :  { %v462_v39 = vadd.f32 %v1377_v25, %v442_v37  ;;  %v1048_v45 = vpop.f32.mrb[4].mxu1  ;;  %v477_v54 = vmax.f32 %v461_v36, 0.0 }
 0x1e0   :  { %v480_v46 = vmax.f32 %v464_v38, 0.0  ;;  %v399_v48 = vadd.f32 %v1048_v45, %v1370_v21  ;;  %v390_v53 = vpop.f32.mrb[5].mxu1 }
 0x1e1   :  { %v478_v56 = vmax.f32 %v462_v39, 0.0  ;;  %v391_v57 = vadd.f32 %v390_v53, %v1370_v21  ;;  %v1049_v58 = vpop.f32.mrb[6].mxu1 }
 0x1e2   :  { %v513_v59 = vpack.c.bf16 %v480_v46, %v479_v40  ;;  %v447_v60 = vmul.f32 %v1373_v22, %v399_v48  ;;  %v402_v41 = vadd.f32 %v1049_v58, %v1370_v21  ;;  %v393_v61 = vpop.f32.mrb[7].mxu1 }
 0x1e3   :  { %v445_v62 = vmul.f32 %v1373_v22, %v391_v57  ;;  %v394_v63 = vadd.f32 %v393_v61, %v1370_v21  ;;  %v512_v0 = vpack.c.bf16 %v478_v56, %v477_v54 }
 0x1e4   :  { %v467_v1 = vadd.f32 %v1377_v25, %v447_v60  ;;  %v448_v2 = vmul.f32 %v1373_v22, %v402_v41 }
 0x1e5   :  { %v465_v3 = vadd.f32 %v1377_v25, %v445_v62  ;;  %v446_v4 = vmul.f32 %v1373_v22, %v394_v63  ;;  %1074 = vmatprep.mubr.bf16.mxu0 %v512_v0  ;;  %v858_v62 = vld [vmem:[%s1512_s2 + $0x8] sm:$0x7] }
 0x1e6   :  { %v468_v5 = vadd.f32 %v1377_v25, %v448_v2  ;;  %1075 = vmatmul.mubr.bf16.vlgmr.msra.gmra.mrb[16].mxu0 %v513_v59  ;;  %v483_v42 = vmax.f32 %v467_v1, 0.0 }
 0x1e7   :  { %v466_v6 = vadd.f32 %v1377_v25, %v446_v4  ;;  %v1052_v7 = vpop.f32.mrb[8].mxu1  ;;  %v481_v11 = vmax.f32 %v465_v3, 0.0 }
 0x1e8   :  { %v484_v8 = vmax.f32 %v468_v5, 0.0  ;;  %v415_v9 = vadd.f32 %v1052_v7, %v1370_v21  ;;  %v406_v10 = vpop.f32.mrb[9].mxu1 }
 0x1e9   :  { %v482_v12 = vmax.f32 %v466_v6, 0.0  ;;  %v407_v13 = vadd.f32 %v406_v10, %v1370_v21  ;;  %v1053_v14 = vpop.f32.mrb[10].mxu1 }
 0x1ea   :  { %v451_v15 = vmul.f32 %v1373_v22, %v415_v9  ;;  %v418_v50 = vadd.f32 %v1053_v14, %v1370_v21  ;;  %v409_v43 = vpop.f32.mrb[11].mxu1  ;;  %v515_v16 = vpack.c.bf16 %v484_v8, %v483_v42  ;;  %v1441_v8 = vrot.slane %v858_v62, %v1292_v51 }
 0x1eb   :  { %v449_v17 = vmul.f32 %v1373_v22, %v407_v13  ;;  %v410_v18 = vadd.f32 %v409_v43, %v1370_v21  ;;  %v514_v19 = vpack.c.bf16 %v482_v12, %v481_v11 }
 0x1ec   :  { %v471_v52 = vadd.f32 %v1377_v25, %v451_v15  ;;  %v452_v44 = vmul.f32 %v1373_v22, %v418_v50 }
 0x1ed   :  { %v469_v55 = vadd.f32 %v1377_v25, %v449_v17  ;;  %v450_v20 = vmul.f32 %v1373_v22, %v410_v18  ;;  %1078 = vmatprep.mubr.bf16.mxu0 %v514_v19 }
 0x1ee   :  { %v472_v23 = vadd.f32 %v1377_v25, %v452_v44  ;;  %1079 = vmatmul.mubr.bf16.gmra.mrb[20].mxu0 %v515_v16  ;;  %v487_v27 = vmax.f32 %v471_v52, 0.0 }
 0x1ef   :  { %v470_v24 = vadd.f32 %v1377_v25, %v450_v20  ;;  %v1056_v26 = vpop.f32.mrb[12].mxu1  ;;  %v485_v31 = vmax.f32 %v469_v55, 0.0 }
 0x1f0   :  { %v488_v28 = vmax.f32 %v472_v23, 0.0  ;;  %v431_v29 = vadd.f32 %v1056_v26, %v1370_v21  ;;  %v422_v30 = vpop.f32.mrb[13].mxu1 }
 0x1f1   :  { %v486_v32 = vmax.f32 %v470_v24, 0.0  ;;  %v423_v33 = vadd.f32 %v422_v30, %v1370_v21  ;;  %v1057_v34 = vpop.f32.mrb[14].mxu1 }
 0x1f2   :  { %v517_v35 = vpack.c.bf16 %v488_v28, %v487_v27  ;;  %v455_v36 = vmul.f32 %v1373_v22, %v431_v29  ;;  %v434_v37 = vadd.f32 %v1057_v34, %v1370_v21  ;;  %v425_v38 = vpop.f32.mrb[15].mxu1 }
 0x1f3   :  { %v453_v39 = vmul.f32 %v1373_v22, %v423_v33  ;;  %v426_v45 = vadd.f32 %v425_v38, %v1370_v21  ;;  %v516_v40 = vpack.c.bf16 %v486_v32, %v485_v31 }
 0x1f4   :  { %v475_v46 = vadd.f32 %v1377_v25, %v455_v36  ;;  %v456_v48 = vmul.f32 %v1373_v22, %v434_v37 }
 0x1f5   :  { %v473_v53 = vadd.f32 %v1377_v25, %v453_v39  ;;  %v454_v54 = vmul.f32 %v1373_v22, %v426_v45  ;;  %1082 = vmatprep.mubr.bf16.mxu1 %v516_v40  ;;  %v1430_v22 = vrot.slane %v858_v62, %v1282_v47 }
 0x1f6   :  { %v476_v56 = vadd.f32 %v1377_v25, %v456_v48  ;;  %1083 = vmatmul.mubr.bf16.vlgmr.msra.gmra.mrb[16].mxu1 %v517_v35  ;;  %v491_v58 = vmax.f32 %v475_v46, 0.0 }
 0x1f7   :  { %v474_v57 = vadd.f32 %v1377_v25, %v454_v54  ;;  %v489_v60 = vmax.f32 %v473_v53, 0.0  ;;  %v1434_v25 = vrot.slane %v858_v62, %v1287_v49 }
 0x1f8   :  { %v492_v59 = vmax.f32 %v476_v56, 0.0 }
 0x1f9   :  { %v490_v41 = vmax.f32 %v474_v57, 0.0 }
 0x1fa   :  { %v519_v21 = vpack.c.bf16 %v492_v59, %v491_v58 }
 0x1fb   :  { %v518_v61 = vpack.c.bf16 %v490_v41, %v489_v60 }
 0x1fd   :  { %1086 = vmatprep.mubr.bf16.mxu1 %v518_v61 }
 0x1fe   :  { %1087 = vmatmul.mubr.bf16.gmra.mrb[20].mxu1 %v519_v21 }
 0x2b9   :  { %v1076_v63 = vpop.f32.mrb[16].mxu0 }
 0x2ba   :  { %v615_v0 = vadd.f32 %v1076_v63, %v1430_v22  ;;  %v606_v1 = vpop.f32.mrb[17].mxu0 }
 0x2bb   :  { %v607_v2 = vadd.f32 %v606_v1, %v1430_v22  ;;  %v1077_v3 = vpop.f32.mrb[18].mxu0 }
 0x2bc   :  { %v671_v4 = vmax.f32 %v615_v0, 0.0  ;;  %v618_v5 = vadd.f32 %v1077_v3, %v1430_v22  ;;  %v609_v6 = vpop.f32.mrb[19].mxu0 }
 0x2bd   :  { %v669_v7 = vmax.f32 %v607_v2, 0.0  ;;  %v610_v42 = vadd.f32 %v609_v6, %v1430_v22 }
 0x2be   :  { %v691_v47 = vmul.f32 %v1434_v25, %v671_v4  ;;  %v672_v9 = vmax.f32 %v618_v5, 0.0 }
 0x2bf   :  { %v689_v49 = vmul.f32 %v1434_v25, %v669_v7  ;;  %v670_v10 = vmax.f32 %v610_v42, 0.0 }
 0x2c0   :  { %v692_v11 = vmul.f32 %v1434_v25, %v672_v9  ;;  %v711_v14 = vadd.f32 %v1441_v8, %v691_v47 }
 0x2c1   :  { %v690_v12 = vmul.f32 %v1434_v25, %v670_v10  ;;  %v1080_v13 = vpop.f32.mrb[20].mxu0  ;;  %v709_v16 = vadd.f32 %v1441_v8, %v689_v49 }
 0x2c2   :  { %v712_v15 = vadd.f32 %v1441_v8, %v692_v11  ;;  %v631_v50 = vadd.f32 %v1080_v13, %v1430_v22  ;;  %v622_v43 = vpop.f32.mrb[21].mxu0 }
 0x2c3   :  { %v710_v51 = vadd.f32 %v1441_v8, %v690_v12  ;;  %v623_v17 = vadd.f32 %v622_v43, %v1430_v22  ;;  %v1081_v18 = vpop.f32.mrb[22].mxu0 }
 0x2c4   :  { %v907_v19 = vpack.c.bf16 %v712_v15, %v711_v14  ;;  %v675_v52 = vmax.f32 %v631_v50, 0.0  ;;  %v634_v44 = vadd.f32 %v1081_v18, %v1430_v22  ;;  %v625_v55 = vpop.f32.mrb[23].mxu0 }
 0x2c5   :  { %v902_v20 = vpack.c.bf16 %v710_v51, %v709_v16  ;;  %v673_v23 = vmax.f32 %v623_v17, 0.0  ;;  %v626_v24 = vadd.f32 %v625_v55, %v1430_v22 }
 0x2c6   :  { %939 = vst [vmem:[%s1513_s3 + $0x8] sm:$0xff] %v907_v19   ;;  %v695_v26 = vmul.f32 %v1434_v25, %v675_v52  ;;  %v676_v27 = vmax.f32 %v634_v44, 0.0 }
 0x2c7   :  { %903 = vst [vmem:[%s1513_s3] sm:$0xff] %v902_v20   ;;  %v693_v28 = vmul.f32 %v1434_v25, %v673_v23  ;;  %v674_v29 = vmax.f32 %v626_v24, 0.0 }
 0x2c8   :  { %v696_v30 = vmul.f32 %v1434_v25, %v676_v27  ;;  %v715_v33 = vadd.f32 %v1441_v8, %v695_v26 }
 0x2c9   :  { %v694_v31 = vmul.f32 %v1434_v25, %v674_v29  ;;  %v1084_v32 = vpop.f32.mrb[16].mxu1  ;;  %v713_v37 = vadd.f32 %v1441_v8, %v693_v28 }
 0x2ca   :  { %v716_v34 = vadd.f32 %v1441_v8, %v696_v30  ;;  %v647_v35 = vadd.f32 %v1084_v32, %v1430_v22  ;;  %v638_v36 = vpop.f32.mrb[17].mxu1 }
 0x2cb   :  { %v714_v38 = vadd.f32 %v1441_v8, %v694_v31  ;;  %v639_v39 = vadd.f32 %v638_v36, %v1430_v22  ;;  %v1085_v45 = vpop.f32.mrb[18].mxu1 }
 0x2cc   :  { %v917_v40 = vpack.c.bf16 %v716_v34, %v715_v33  ;;  %v679_v46 = vmax.f32 %v647_v35, 0.0  ;;  %v650_v48 = vadd.f32 %v1085_v45, %v1430_v22  ;;  %v641_v53 = vpop.f32.mrb[19].mxu1 }
 0x2cd   :  { %v912_v54 = vpack.c.bf16 %v714_v38, %v713_v37  ;;  %v677_v56 = vmax.f32 %v639_v39, 0.0  ;;  %v642_v57 = vadd.f32 %v641_v53, %v1430_v22 }
 0x2ce   :  { %941 = vst [vmem:[%s1513_s3 + $0x18] sm:$0xff] %v917_v40   ;;  %v699_v58 = vmul.f32 %v1434_v25, %v679_v46  ;;  %v680_v59 = vmax.f32 %v650_v48, 0.0 }
 0x2cf   :  { %940 = vst [vmem:[%s1513_s3 + $0x10] sm:$0xff] %v912_v54   ;;  %v697_v60 = vmul.f32 %v1434_v25, %v677_v56  ;;  %v678_v41 = vmax.f32 %v642_v57, 0.0 }
 0x2d0   :  { %v700_v21 = vmul.f32 %v1434_v25, %v680_v59  ;;  %v719_v63 = vadd.f32 %v1441_v8, %v699_v58 }
 0x2d1   :  { %v698_v61 = vmul.f32 %v1434_v25, %v678_v41  ;;  %v1088_v62 = vpop.f32.mrb[20].mxu1  ;;  %v717_v3 = vadd.f32 %v1441_v8, %v697_v60 }
 0x2d2   :  { %v720_v0 = vadd.f32 %v1441_v8, %v700_v21  ;;  %v663_v1 = vadd.f32 %v1088_v62, %v1430_v22  ;;  %v654_v2 = vpop.f32.mrb[21].mxu1 }
 0x2d3   :  { %v718_v4 = vadd.f32 %v1441_v8, %v698_v61  ;;  %v655_v5 = vadd.f32 %v654_v2, %v1430_v22  ;;  %v1089_v6 = vpop.f32.mrb[22].mxu1 }
 0x2d4   :  { %v927_v7 = vpack.c.bf16 %v720_v0, %v719_v63  ;;  %v683_v42 = vmax.f32 %v663_v1, 0.0  ;;  %v666_v47 = vadd.f32 %v1089_v6, %v1430_v22  ;;  %v657_v9 = vpop.f32.mrb[23].mxu1 }
 0x2d5   :  { %v922_v49 = vpack.c.bf16 %v718_v4, %v717_v3  ;;  %v681_v10 = vmax.f32 %v655_v5, 0.0  ;;  %v658_v11 = vadd.f32 %v657_v9, %v1430_v22 }
 0x2d6   :  { %943 = vst [vmem:[%s1513_s3 + $0x28] sm:$0xff] %v927_v7   ;;  %v703_v12 = vmul.f32 %v1434_v25, %v683_v42  ;;  %v684_v13 = vmax.f32 %v666_v47, 0.0 }
 0x2d7   :  { %942 = vst [vmem:[%s1513_s3 + $0x20] sm:$0xff] %v922_v49   ;;  %v701_v14 = vmul.f32 %v1434_v25, %v681_v10  ;;  %v682_v15 = vmax.f32 %v658_v11, 0.0 }
 0x2d8   :  { %v704_v50 = vmul.f32 %v1434_v25, %v684_v13  ;;  %v723_v22 = vadd.f32 %v1441_v8, %v703_v12 }
 0x2d9   :  { %v702_v43 = vmul.f32 %v1434_v25, %v682_v15  ;;  %v721_v51 = vadd.f32 %v1441_v8, %v701_v14 }
 0x2da   :  { %v724_v16 = vadd.f32 %v1441_v8, %v704_v50 }
 0x2db   :  { %v722_v17 = vadd.f32 %v1441_v8, %v702_v43 }
 0x2dc   :  { %v937_v18 = vpack.c.bf16 %v724_v16, %v723_v22 }
 0x2dd   :  { %v932_v19 = vpack.c.bf16 %v722_v17, %v721_v51 }
 0x2de   :  { %945 = vst [vmem:[%s1513_s3 + $0x38] sm:$0xff] %v937_v18  }
 0x2df   :  { %944 = vst [vmem:[%s1513_s3 + $0x30] sm:$0xff] %v932_v19  }

// kernel: net_forward.9
= control target key start
LH: loop header
LB: loop body
LE: loop exit
PB: predicated region body
PF: predicated region fallthrough
CT: control target
= control target key end

     0   :  { %v355_v48 = vlaneseq  ;;  %s910_s1 = inlined_call_operand.vmem [shape: bf16[128,128], index: 1, kind: input, shape index: {}]   ;;  %s911_s0 = inlined_call_operand.vmem [shape: bf16[128,128], index: 0, kind: input, shape index: {}]   ;;  %s912_s2 = inlined_call_operand.vmem [shape: bf16[128,128], index: 2, kind: input, shape index: {}]   ;;  %s913_s3 = inlined_call_operand.vmem [shape: f32[3,128], index: 3, kind: input, shape index: {}]   ;;  %s914_s4 = inlined_call_operand.vmem [shape: f32[128,128], index: 4, kind: output, shape index: {}]  }
   0x1   :  { %v684_v0 = vld [vmem:[%s910_s1] sm:$0xff]   ;;  %v685_v1 = vld [vmem:[%s910_s1 + $0x8] sm:$0xff]   ;;  %v686_v2 = vld [vmem:[%s910_s1 + $0x10] sm:$0xff]  }
   0x2   :  { %620 = vmatprep.subr.bf16.mxu0 %v684_v0  ;;  %v687_v3 = vld [vmem:[%s910_s1 + $0x18] sm:$0xff]   ;;  %v692_v4 = vld [vmem:[%s911_s0] sm:$0xff]   ;;  %v689_v6 = vld [vmem:[%s910_s1 + $0x28] sm:$0xff]   ;;  %v356_v49 = vshrl.u32 %v355_v48, 7 }
   0x3   :  { %621 = vmatpush3.bf16.msra.mxu0 %v684_v0  ;;  %636 = vmatprep.mubr.bf16.mxu0 %v692_v4  ;;  %v688_v5 = vld [vmem:[%s910_s1 + $0x20] sm:$0xff]   ;;  %v701_v8 = vld [vmem:[%s912_s2 + $0x8] sm:$0xff]   ;;  %v690_v9 = vld [vmem:[%s910_s1 + $0x30] sm:$0xff]  }
   0x4   :  { %622 = vmatprep.subr.bf16.mxu0 %v685_v1  ;;  %v700_v7 = vld [vmem:[%s912_s2] sm:$0xff]   ;;  %v702_v10 = vld [vmem:[%s912_s2 + $0x10] sm:$0xff]   ;;  %v691_v11 = vld [vmem:[%s910_s1 + $0x38] sm:$0xff]   ;;  %v357_v50 = vsub.s32 0, %v356_v49  ;;  %v506_v52 = vsub.s32 1, %v356_v49  ;;  %v526_v54 = vsub.s32 2, %v356_v49 }
   0x5   :  { %652 = vmatprep.subr.bf16.mxu1 %v700_v7  ;;  %v703_v12 = vld [vmem:[%s912_s2 + $0x18] sm:$0xff]   ;;  %v704_v13 = vld [vmem:[%s912_s2 + $0x20] sm:$0xff]   ;;  %v693_v14 = vld [vmem:[%s911_s0 + $0x8] sm:$0xff]  }
   0x6   :  { %653 = vmatpush3.bf16.msra.mxu1 %v700_v7  ;;  %v694_v15 = vld [vmem:[%s911_s0 + $0x10] sm:$0xff]   ;;  %v705_v16 = vld [vmem:[%s912_s2 + $0x28] sm:$0xff]   ;;  %v695_v18 = vld [vmem:[%s911_s0 + $0x18] sm:$0xff]  }
   0x7   :  { %623 = vmatpush3.bf16.msra.mxu0 %v685_v1  ;;  %654 = vmatprep.subr.bf16.mxu1 %v701_v8  ;;  %v706_v17 = vld [vmem:[%s912_s2 + $0x30] sm:$0xff]   ;;  %v696_v19 = vld [vmem:[%s911_s0 + $0x20] sm:$0xff]   ;;  %v697_v20 = vld [vmem:[%s911_s0 + $0x28] sm:$0xff]  }
   0x8   :  { %624 = vmatprep.subr.bf16.mxu0 %v686_v2  ;;  %v698_v21 = vld [vmem:[%s911_s0 + $0x30] sm:$0xff]   ;;  %v699_v22 = vld [vmem:[%s911_s0 + $0x38] sm:$0xff]   ;;  %v314_v51 = vld [vmem:[%s913_s3] sm:$0x7] }
   0x9   :  { %v707_v23 = vld [vmem:[%s912_s2 + $0x38] sm:$0xff]   ;;  %v808_v53 = vrot.slane %v314_v51, %v357_v50  ;;  %v810_v55 = vrot.slane %v314_v51, %v506_v52  ;;  %v813_v58 = vrot.slane %v314_v51, %v526_v54 }
   0xa   :  { %655 = vmatpush3.bf16.msra.mxu1 %v701_v8 }
   0xb   :  { %625 = vmatpush3.bf16.msra.mxu0 %v686_v2  ;;  %656 = vmatprep.subr.bf16.mxu1 %v702_v10 }
   0xc   :  { %626 = vmatprep.subr.bf16.mxu0 %v687_v3 }
   0xe   :  { %657 = vmatpush3.bf16.msra.mxu1 %v702_v10 }
   0xf   :  { %627 = vmatpush3.bf16.msra.mxu0 %v687_v3  ;;  %658 = vmatprep.subr.bf16.mxu1 %v703_v12 }
  0x10   :  { %628 = vmatprep.subr.bf16.mxu0 %v688_v5 }
  0x12   :  { %659 = vmatpush3.bf16.msra.mxu1 %v703_v12 }
  0x13   :  { %629 = vmatpush3.bf16.msra.mxu0 %v688_v5  ;;  %660 = vmatprep.subr.bf16.mxu1 %v704_v13 }
  0x14   :  { %630 = vmatprep.subr.bf16.mxu0 %v689_v6 }
  0x16   :  { %661 = vmatpush3.bf16.msra.mxu1 %v704_v13 }
  0x17   :  { %631 = vmatpush3.bf16.msra.mxu0 %v689_v6  ;;  %662 = vmatprep.subr.bf16.mxu1 %v705_v16 }
  0x18   :  { %632 = vmatprep.subr.bf16.mxu0 %v690_v9 }
  0x1a   :  { %663 = vmatpush3.bf16.msra.mxu1 %v705_v16 }
  0x1b   :  { %633 = vmatpush3.bf16.msra.mxu0 %v690_v9  ;;  %664 = vmatprep.subr.bf16.mxu1 %v706_v17 }
  0x1c   :  { %634 = vmatprep.subr.bf16.mxu0 %v691_v11 }
  0x1e   :  { %665 = vmatpush3.bf16.msra.mxu1 %v706_v17 }
  0x1f   :  { %635 = vmatpush3.bf16.msra.mxu0 %v691_v11  ;;  %666 = vmatprep.subr.bf16.mxu1 %v707_v23 }
  0x22   :  { %637 = vmatmul.mubr.bf16.vlgmr.msra.gmra.mrb[0].mxu0 %v693_v14  ;;  %667 = vmatpush3.bf16.msra.mxu1 %v707_v23 }
  0x23   :  { %640 = vmatprep.mubr.bf16.mxu0 %v694_v15 }
  0x2a   :  { %641 = vmatmul.mubr.bf16.gmra.mrb[4].mxu0 %v695_v18 }
  0x2b   :  { %644 = vmatprep.mubr.bf16.mxu0 %v696_v19 }
  0x32   :  { %645 = vmatmul.mubr.bf16.gmra.mrb[8].mxu0 %v697_v20 }
  0x33   :  { %648 = vmatprep.mubr.bf16.mxu0 %v698_v21 }
  0x3a   :  { %649 = vmatmul.mubr.bf16.gmra.mrb[12].mxu0 %v699_v22 }
  0xf5   :  { %v638_v24 = vpop.f32.mrb[0].mxu0 }
  0xf6   :  { %v216_v25 = vpop.f32.mrb[1].mxu0 }
  0xf7   :  { %v639_v26 = vpop.f32.mrb[2].mxu0 }
  0xf8   :  { %v332_v27 = vpack.c.bf16 %v639_v26, %v638_v24  ;;  %v219_v28 = vpop.f32.mrb[3].mxu0 }
  0xf9   :  { %v331_v29 = vpack.c.bf16 %v219_v28, %v216_v25 }
  0xfb   :  { %668 = vmatprep.mubr.bf16.mxu1 %v331_v29 }
  0xfc   :  { %669 = vmatmul.mubr.bf16.vlgmr.msra.gmra.mrb[0].mxu1 %v332_v27 }
  0xfd   :  { %v642_v30 = vpop.f32.mrb[4].mxu0 }
  0xfe   :  { %v232_v31 = vpop.f32.mrb[5].mxu0 }
  0xff   :  { %v643_v32 = vpop.f32.mrb[6].mxu0 }
 0x100   :  { %v334_v33 = vpack.c.bf16 %v643_v32, %v642_v30  ;;  %v235_v34 = vpop.f32.mrb[7].mxu0 }
 0x101   :  { %v333_v35 = vpack.c.bf16 %v235_v34, %v232_v31 }
 0x103   :  { %672 = vmatprep.mubr.bf16.mxu1 %v333_v35 }
 0x104   :  { %673 = vmatmul.mubr.bf16.gmra.mrb[4].mxu1 %v334_v33 }
 0x105   :  { %v646_v36 = vpop.f32.mrb[8].mxu0 }
 0x106   :  { %v248_v37 = vpop.f32.mrb[9].mxu0 }
 0x107   :  { %v647_v38 = vpop.f32.mrb[10].mxu0 }
 0x108   :  { %v336_v39 = vpack.c.bf16 %v647_v38, %v646_v36  ;;  %v251_v40 = vpop.f32.mrb[11].mxu0 }
 0x109   :  { %v335_v41 = vpack.c.bf16 %v251_v40, %v248_v37 }
 0x10b   :  { %676 = vmatprep.mubr.bf16.mxu1 %v335_v41 }
 0x10c   :  { %677 = vmatmul.mubr.bf16.gmra.mrb[8].mxu1 %v336_v39 }
 0x10d   :  { %v650_v42 = vpop.f32.mrb[12].mxu0 }
 0x10e   :  { %v264_v43 = vpop.f32.mrb[13].mxu0 }
 0x10f   :  { %v651_v44 = vpop.f32.mrb[14].mxu0 }
 0x110   :  { %v338_v45 = vpack.c.bf16 %v651_v44, %v650_v42  ;;  %v267_v46 = vpop.f32.mrb[15].mxu0 }
 0x111   :  { %v337_v47 = vpack.c.bf16 %v267_v46, %v264_v43 }
 0x113   :  { %680 = vmatprep.mubr.bf16.mxu1 %v337_v47 }
 0x114   :  { %681 = vmatmul.mubr.bf16.gmra.mrb[12].mxu1 %v338_v45 }
 0x1cf   :  { %v670_v56 = vpop.f32.mrb[0].mxu1 }
 0x1d0   :  { %v450_v57 = vadd.f32 %v670_v56, %v808_v53  ;;  %v441_v59 = vpop.f32.mrb[1].mxu1 }
 0x1d1   :  { %v442_v60 = vadd.f32 %v441_v59, %v808_v53  ;;  %v671_v61 = vpop.f32.mrb[2].mxu1 }
 0x1d2   :  { %v510_v62 = vmul.f32 %v810_v55, %v450_v57  ;;  %v453_v63 = vadd.f32 %v671_v61, %v808_v53  ;;  %v444_v0 = vpop.f32.mrb[3].mxu1 }
 0x1d3   :  { %v508_v1 = vmul.f32 %v810_v55, %v442_v60  ;;  %v445_v2 = vadd.f32 %v444_v0, %v808_v53 }
 0x1d4   :  { %v530_v3 = vadd.f32 %v813_v58, %v510_v62  ;;  %v511_v4 = vmul.f32 %v810_v55, %v453_v63 }
 0x1d5   :  { %v528_v5 = vadd.f32 %v813_v58, %v508_v1  ;;  %v509_v6 = vmul.f32 %v810_v55, %v445_v2 }
 0x1d6   :  { %546 = vst [vmem:[%s914_s4 + $0x10] sm:$0xff] %v530_v3  ;;  %v531_v7 = vadd.f32 %v813_v58, %v511_v4 }
 0x1d7   :  { %544 = vst [vmem:[%s914_s4] sm:$0xff] %v528_v5  ;;  %v529_v8 = vadd.f32 %v813_v58, %v509_v6  ;;  %v674_v9 = vpop.f32.mrb[4].mxu1 }
 0x1d8   :  { %547 = vst [vmem:[%s914_s4 + $0x18] sm:$0xff] %v531_v7  ;;  %v466_v10 = vadd.f32 %v674_v9, %v808_v53  ;;  %v457_v11 = vpop.f32.mrb[5].mxu1 }
 0x1d9   :  { %545 = vst [vmem:[%s914_s4 + $0x8] sm:$0xff] %v529_v8  ;;  %v458_v12 = vadd.f32 %v457_v11, %v808_v53  ;;  %v675_v13 = vpop.f32.mrb[6].mxu1 }
 0x1da   :  { %v514_v14 = vmul.f32 %v810_v55, %v466_v10  ;;  %v469_v15 = vadd.f32 %v675_v13, %v808_v53  ;;  %v460_v16 = vpop.f32.mrb[7].mxu1 }
 0x1db   :  { %v512_v17 = vmul.f32 %v810_v55, %v458_v12  ;;  %v461_v18 = vadd.f32 %v460_v16, %v808_v53 }
 0x1dc   :  { %v534_v19 = vadd.f32 %v813_v58, %v514_v14  ;;  %v515_v20 = vmul.f32 %v810_v55, %v469_v15 }
 0x1dd   :  { %v532_v21 = vadd.f32 %v813_v58, %v512_v17  ;;  %v513_v22 = vmul.f32 %v810_v55, %v461_v18 }
 0x1de   :  { %550 = vst [vmem:[%s914_s4 + $0x30] sm:$0xff] %v534_v19  ;;  %v535_v23 = vadd.f32 %v813_v58, %v515_v20 }
 0x1df   :  { %548 = vst [vmem:[%s914_s4 + $0x20] sm:$0xff] %v532_v21  ;;  %v533_v24 = vadd.f32 %v813_v58, %v513_v22  ;;  %v678_v25 = vpop.f32.mrb[8].mxu1 }
 0x1e0   :  { %551 = vst [vmem:[%s914_s4 + $0x38] sm:$0xff] %v535_v23  ;;  %v482_v26 = vadd.f32 %v678_v25, %v808_v53  ;;  %v473_v27 = vpop.f32.mrb[9].mxu1 }
 0x1e1   :  { %549 = vst [vmem:[%s914_s4 + $0x28] sm:$0xff] %v533_v24  ;;  %v474_v28 = vadd.f32 %v473_v27, %v808_v53  ;;  %v679_v29 = vpop.f32.mrb[10].mxu1 }
 0x1e2   :  { %v518_v30 = vmul.f32 %v810_v55, %v482_v26  ;;  %v485_v31 = vadd.f32 %v679_v29, %v808_v53  ;;  %v476_v32 = vpop.f32.mrb[11].mxu1 }
 0x1e3   :  { %v516_v33 = vmul.f32 %v810_v55, %v474_v28  ;;  %v477_v34 = vadd.f32 %v476_v32, %v808_v53 }
 0x1e4   :  { %v538_v35 = vadd.f32 %v813_v58, %v518_v30  ;;  %v519_v36 = vmul.f32 %v810_v55, %v485_v31 }
 0x1e5   :  { %v536_v37 = vadd.f32 %v813_v58, %v516_v33  ;;  %v517_v38 = vmul.f32 %v810_v55, %v477_v34 }
 0x1e6   :  { %554 = vst [vmem:[%s914_s4 + $0x50] sm:$0xff] %v538_v35  ;;  %v539_v39 = vadd.f32 %v813_v58, %v519_v36 }
 0x1e7   :  { %552 = vst [vmem:[%s914_s4 + $0x40] sm:$0xff] %v536_v37  ;;  %v537_v40 = vadd.f32 %v813_v58, %v517_v38  ;;  %v682_v41 = vpop.f32.mrb[12].mxu1 }
 0x1e8   :  { %555 = vst [vmem:[%s914_s4 + $0x58] sm:$0xff] %v539_v39  ;;  %v498_v42 = vadd.f32 %v682_v41, %v808_v53  ;;  %v489_v43 = vpop.f32.mrb[13].mxu1 }
 0x1e9   :  { %553 = vst [vmem:[%s914_s4 + $0x48] sm:$0xff] %v537_v40  ;;  %v490_v44 = vadd.f32 %v489_v43, %v808_v53  ;;  %v683_v45 = vpop.f32.mrb[14].mxu1 }
 0x1ea   :  { %v522_v46 = vmul.f32 %v810_v55, %v498_v42  ;;  %v501_v47 = vadd.f32 %v683_v45, %v808_v53  ;;  %v492_v48 = vpop.f32.mrb[15].mxu1 }
 0x1eb   :  { %v520_v49 = vmul.f32 %v810_v55, %v490_v44  ;;  %v493_v50 = vadd.f32 %v492_v48, %v808_v53 }
 0x1ec   :  { %v542_v51 = vadd.f32 %v813_v58, %v522_v46  ;;  %v523_v52 = vmul.f32 %v810_v55, %v501_v47 }
 0x1ed   :  { %v540_v54 = vadd.f32 %v813_v58, %v520_v49  ;;  %v521_v56 = vmul.f32 %v810_v55, %v493_v50 }
 0x1ee   :  { %558 = vst [vmem:[%s914_s4 + $0x70] sm:$0xff] %v542_v51  ;;  %v543_v57 = vadd.f32 %v813_v58, %v523_v52 }
 0x1ef   :  { %556 = vst [vmem:[%s914_s4 + $0x60] sm:$0xff] %v540_v54  ;;  %v541_v53 = vadd.f32 %v813_v58, %v521_v56 }
 0x1f0   :  { %559 = vst [vmem:[%s914_s4 + $0x78] sm:$0xff] %v543_v57 }
 0x1f1   :  { %557 = vst [vmem:[%s914_s4 + $0x68] sm:$0xff] %v541_v53 }

// kernel: net_forward.12
= control target key start
LH: loop header
LB: loop body
LE: loop exit
PB: predicated region body
PF: predicated region fallthrough
CT: control target
= control target key end

     0   :  { %v56_v45 = vlaneseq  ;;  %s1391_s1 = inlined_call_operand.vmem [shape: bf16[3,128,128], index: 1, kind: input, shape index: {}]   ;;  %s1392_s0 = inlined_call_operand.vmem [shape: f32[128,128], index: 0, kind: input, shape index: {}]   ;;  %s1393_s2 = inlined_call_operand.vmem [shape: f32[3,3,128], index: 2, kind: input, shape index: {}]   ;;  %s1394_s3 = inlined_call_operand.vmem [shape: f32[128,128], index: 3, kind: output, shape index: {}]  }
   0x1   :  { %v963_v0 = vld [vmem:[%s1391_s1] sm:$0xff]   ;;  %v964_v1 = vld [vmem:[%s1391_s1 + $0x8] sm:$0xff]   ;;  %v965_v2 = vld [vmem:[%s1391_s1 + $0x10] sm:$0xff]  }
   0x2   :  { %851 = vmatprep.subr.bf16.mxu0 %v963_v0  ;;  %v966_v3 = vld [vmem:[%s1391_s1 + $0x18] sm:$0xff]   ;;  %v15_v4 = vld [vmem:[%s1392_s0] sm:$0xff]  ;;  %v16_v5 = vld [vmem:[%s1392_s0 + $0x8] sm:$0xff]  ;;  %v57_v46 = vshrl.u32 %v56_v45, 7 }
   0x3   :  { %852 = vmatpush3.bf16.msra.mxu0 %v963_v0  ;;  %v48_v6 = vpack.c.bf16 %v16_v5, %v15_v4  ;;  %v967_v7 = vld [vmem:[%s1391_s1 + $0x20] sm:$0xff]   ;;  %v972_v9 = vld [vmem:[%s1391_s1 + $0x48] sm:$0xff]   ;;  %v969_v11 = vld [vmem:[%s1391_s1 + $0x30] sm:$0xff]  }
   0x4   :  { %853 = vmatprep.subr.bf16.mxu0 %v964_v1  ;;  %v971_v8 = vld [vmem:[%s1391_s1 + $0x40] sm:$0xff]   ;;  %v968_v10 = vld [vmem:[%s1391_s1 + $0x28] sm:$0xff]   ;;  %v973_v12 = vld [vmem:[%s1391_s1 + $0x50] sm:$0xff]   ;;  %v1139_v47 = vsub.s32 0, %v57_v46  ;;  %v1144_v49 = vsub.s32 1, %v57_v46  ;;  %v1149_v51 = vsub.s32 2, %v57_v46 }
   0x5   :  { %867 = vmatprep.mubr.bf16.mxu0 %v48_v6  ;;  %883 = vmatprep.subr.bf16.mxu1 %v971_v8  ;;  %v974_v13 = vld [vmem:[%s1391_s1 + $0x58] sm:$0xff]   ;;  %v975_v15 = vld [vmem:[%s1391_s1 + $0x60] sm:$0xff]   ;;  %v17_v16 = vld [vmem:[%s1392_s0 + $0x10] sm:$0xff] }
   0x6   :  { %884 = vmatpush3.bf16.msra.mxu1 %v971_v8  ;;  %v970_v14 = vld [vmem:[%s1391_s1 + $0x38] sm:$0xff]   ;;  %v19_v18 = vld [vmem:[%s1392_s0 + $0x20] sm:$0xff]  ;;  %v20_v19 = vld [vmem:[%s1392_s0 + $0x28] sm:$0xff] }
   0x7   :  { %854 = vmatpush3.bf16.msra.mxu0 %v964_v1  ;;  %885 = vmatprep.subr.bf16.mxu1 %v972_v9  ;;  %v18_v17 = vld [vmem:[%s1392_s0 + $0x18] sm:$0xff]  ;;  %v50_v21 = vpack.c.bf16 %v20_v19, %v19_v18  ;;  %v21_v22 = vld [vmem:[%s1392_s0 + $0x30] sm:$0xff]  ;;  %v23_v24 = vld [vmem:[%s1392_s0 + $0x40] sm:$0xff] }
   0x8   :  { %855 = vmatprep.subr.bf16.mxu0 %v965_v2  ;;  %v49_v20 = vpack.c.bf16 %v18_v17, %v17_v16  ;;  %v22_v23 = vld [vmem:[%s1392_s0 + $0x38] sm:$0xff]  ;;  %v24_v25 = vld [vmem:[%s1392_s0 + $0x48] sm:$0xff]  ;;  %v25_v28 = vld [vmem:[%s1392_s0 + $0x50] sm:$0xff] }
   0x9   :  { %v51_v26 = vpack.c.bf16 %v22_v23, %v21_v22  ;;  %v52_v27 = vpack.c.bf16 %v24_v25, %v23_v24  ;;  %v26_v29 = vld [vmem:[%s1392_s0 + $0x58] sm:$0xff]  ;;  %v27_v30 = vld [vmem:[%s1392_s0 + $0x60] sm:$0xff]  ;;  %v28_v31 = vld [vmem:[%s1392_s0 + $0x68] sm:$0xff] }
   0xa   :  { %886 = vmatpush3.bf16.msra.mxu1 %v972_v9  ;;  %v53_v32 = vpack.c.bf16 %v26_v29, %v25_v28  ;;  %v54_v33 = vpack.c.bf16 %v28_v31, %v27_v30  ;;  %v29_v34 = vld [vmem:[%s1392_s0 + $0x70] sm:$0xff]  ;;  %v30_v35 = vld [vmem:[%s1392_s0 + $0x78] sm:$0xff]  ;;  %v976_v37 = vld [vmem:[%s1391_s1 + $0x68] sm:$0xff]  }
   0xb   :  { %856 = vmatpush3.bf16.msra.mxu0 %v965_v2  ;;  %887 = vmatprep.subr.bf16.mxu1 %v973_v12  ;;  %v55_v36 = vpack.c.bf16 %v30_v35, %v29_v34  ;;  %v977_v38 = vld [vmem:[%s1391_s1 + $0x70] sm:$0xff]   ;;  %v978_v39 = vld [vmem:[%s1391_s1 + $0x78] sm:$0xff]   ;;  %v1106_v40 = vld [vmem:[%s1391_s1 + $0x80] sm:$0xff]  }
   0xc   :  { %857 = vmatprep.subr.bf16.mxu0 %v966_v3  ;;  %v1111_v41 = vld [vmem:[%s1391_s1 + $0x88] sm:$0xff]   ;;  %v1120_v42 = vld [vmem:[%s1391_s1 + $0x90] sm:$0xff]   ;;  %v1127_v43 = vld [vmem:[%s1391_s1 + $0x98] sm:$0xff]  }
   0xd   :  { %v1134_v44 = vld [vmem:[%s1391_s1 + $0xa0] sm:$0xff]  }
   0xe   :  { %888 = vmatpush3.bf16.msra.mxu1 %v973_v12  ;;  %v47_v48 = vld [vmem:[%s1393_s2] sm:$0x7] }
   0xf   :  { %858 = vmatpush3.bf16.msra.mxu0 %v966_v3  ;;  %889 = vmatprep.subr.bf16.mxu1 %v974_v13  ;;  %v1147_v50 = vrot.slane %v47_v48, %v1139_v47  ;;  %v1152_v52 = vrot.slane %v47_v48, %v1144_v49  ;;  %v1156_v55 = vrot.slane %v47_v48, %v1149_v51 }
  0x10   :  { %859 = vmatprep.subr.bf16.mxu0 %v967_v7 }
  0x12   :  { %890 = vmatpush3.bf16.msra.mxu1 %v974_v13 }
  0x13   :  { %860 = vmatpush3.bf16.msra.mxu0 %v967_v7  ;;  %891 = vmatprep.subr.bf16.mxu1 %v975_v15 }
  0x14   :  { %861 = vmatprep.subr.bf16.mxu0 %v968_v10 }
  0x16   :  { %892 = vmatpush3.bf16.msra.mxu1 %v975_v15 }
  0x17   :  { %862 = vmatpush3.bf16.msra.mxu0 %v968_v10  ;;  %893 = vmatprep.subr.bf16.mxu1 %v976_v37 }
  0x18   :  { %863 = vmatprep.subr.bf16.mxu0 %v969_v11 }
  0x1a   :  { %894 = vmatpush3.bf16.msra.mxu1 %v976_v37 }
  0x1b   :  { %864 = vmatpush3.bf16.msra.mxu0 %v969_v11  ;;  %895 = vmatprep.subr.bf16.mxu1 %v977_v38 }
  0x1c   :  { %865 = vmatprep.subr.bf16.mxu0 %v970_v14 }
  0x1e   :  { %896 = vmatpush3.bf16.msra.mxu1 %v977_v38 }
  0x1f   :  { %866 = vmatpush3.bf16.msra.mxu0 %v970_v14  ;;  %897 = vmatprep.subr.bf16.mxu1 %v978_v39 }
  0x20   :  { %915 = vmatprep.subr.bf16.mxu0 %v1106_v40 }
  0x22   :  { %868 = vmatmul.mubr.bf16.vlgmr.msra.gmra.mrb[0].mxu0 %v49_v20  ;;  %898 = vmatpush3.bf16.msra.mxu1 %v978_v39 }
  0x23   :  { %871 = vmatprep.mubr.bf16.mxu0 %v50_v21  ;;  %947 = vmatprep.subr.bf16.mxu1 %v1106_v40 }
  0x24   :  { %916 = vmatpush3.bf16.msra.mxu0 %v1106_v40 }
  0x25   :  { %917 = vmatprep.subr.bf16.mxu0 %v1111_v41 }
  0x28   :  { %918 = vmatpush3.bf16.msra.mxu0 %v1111_v41 }
  0x29   :  { %919 = vmatprep.subr.bf16.mxu0 %v1120_v42 }
  0x2a   :  { %872 = vmatmul.mubr.bf16.gmra.mrb[4].mxu0 %v51_v26 }
  0x2b   :  { %875 = vmatprep.mubr.bf16.mxu0 %v52_v27 }
  0x2c   :  { %920 = vmatpush3.bf16.msra.mxu0 %v1120_v42 }
  0x2d   :  { %921 = vmatprep.subr.bf16.mxu0 %v1127_v43 }
  0x30   :  { %922 = vmatpush3.bf16.msra.mxu0 %v1127_v43 }
  0x31   :  { %923 = vmatprep.subr.bf16.mxu0 %v1134_v44 }
  0x32   :  { %876 = vmatmul.mubr.bf16.gmra.mrb[8].mxu0 %v53_v32 }
  0x33   :  { %879 = vmatprep.mubr.bf16.mxu0 %v54_v33 }
  0x34   :  { %924 = vmatpush3.bf16.msra.mxu0 %v1134_v44 }
  0x3a   :  { %880 = vmatmul.mubr.bf16.gmra.mrb[12].mxu0 %v55_v36 }
  0xf5   :  { %v869_v53 = vpop.f32.mrb[0].mxu0 }
  0xf6   :  { %v151_v54 = vadd.f32 %v869_v53, %v1147_v50  ;;  %v142_v56 = vpop.f32.mrb[1].mxu0 }
  0xf7   :  { %v143_v57 = vadd.f32 %v142_v56, %v1147_v50  ;;  %v870_v58 = vpop.f32.mrb[2].mxu0 }
  0xf8   :  { %v211_v59 = vmul.f32 %v1152_v52, %v151_v54  ;;  %v154_v60 = vadd.f32 %v870_v58, %v1147_v50  ;;  %v145_v61 = vpop.f32.mrb[3].mxu0 }
  0xf9   :  { %v209_v62 = vmul.f32 %v1152_v52, %v143_v57  ;;  %v146_v63 = vadd.f32 %v145_v61, %v1147_v50 }
  0xfa   :  { %v231_v0 = vadd.f32 %v1156_v55, %v211_v59  ;;  %v212_v1 = vmul.f32 %v1152_v52, %v154_v60 }
  0xfb   :  { %v210_v2 = vmul.f32 %v1152_v52, %v146_v63  ;;  %v229_v3 = vadd.f32 %v1156_v55, %v209_v62 }
  0xfc   :  { %v232_v4 = vadd.f32 %v1156_v55, %v212_v1  ;;  %v247_v7 = vmax.f32 %v231_v0, 0.0 }
  0xfd   :  { %v873_v5 = vpop.f32.mrb[4].mxu0  ;;  %v230_v6 = vadd.f32 %v1156_v55, %v210_v2  ;;  %v245_v13 = vmax.f32 %v229_v3, 0.0 }
  0xfe   :  { %v248_v8 = vmax.f32 %v232_v4, 0.0  ;;  %v167_v9 = vadd.f32 %v873_v5, %v1147_v50  ;;  %v158_v10 = vpop.f32.mrb[5].mxu0 }
  0xff   :  { %v159_v11 = vadd.f32 %v158_v10, %v1147_v50  ;;  %v874_v12 = vpop.f32.mrb[6].mxu0  ;;  %v246_v14 = vmax.f32 %v230_v6, 0.0 }
 0x100   :  { %v215_v15 = vmul.f32 %v1152_v52, %v167_v9  ;;  %v170_v16 = vadd.f32 %v874_v12, %v1147_v50  ;;  %v161_v17 = vpop.f32.mrb[7].mxu0  ;;  %v281_v18 = vpack.c.bf16 %v248_v8, %v247_v7 }
 0x101   :  { %v213_v19 = vmul.f32 %v1152_v52, %v159_v11  ;;  %v162_v20 = vadd.f32 %v161_v17, %v1147_v50  ;;  %v280_v21 = vpack.c.bf16 %v246_v14, %v245_v13 }
 0x102   :  { %v235_v22 = vadd.f32 %v1156_v55, %v215_v15  ;;  %v216_v23 = vmul.f32 %v1152_v52, %v170_v16 }
 0x103   :  { %v233_v24 = vadd.f32 %v1156_v55, %v213_v19  ;;  %v214_v25 = vmul.f32 %v1152_v52, %v162_v20  ;;  %899 = vmatprep.mubr.bf16.mxu1 %v280_v21  ;;  %v769_v20 = vld [vmem:[%s1393_s2 + $0x4] sm:$0x7] }
 0x104   :  { %v236_v26 = vadd.f32 %v1156_v55, %v216_v23  ;;  %900 = vmatmul.mubr.bf16.vlgmr.msra.gmra.mrb[0].mxu1 %v281_v18  ;;  %v251_v29 = vmax.f32 %v235_v22, 0.0  ;;  %v1227_v21 = vrot.slane %v769_v20, %v1139_v47  ;;  %v1230_v22 = vrot.slane %v769_v20, %v1144_v49 }
 0x105   :  { %v234_v27 = vadd.f32 %v1156_v55, %v214_v25  ;;  %v877_v28 = vpop.f32.mrb[8].mxu0  ;;  %955 = vmatpush3.bf16.msra.mxu1 %v1106_v40  ;;  %v249_v33 = vmax.f32 %v233_v24, 0.0  ;;  %v1234_v25 = vrot.slane %v769_v20, %v1149_v51 }
 0x106   :  { %v252_v30 = vmax.f32 %v236_v26, 0.0  ;;  %v183_v31 = vadd.f32 %v877_v28, %v1147_v50  ;;  %v174_v32 = vpop.f32.mrb[9].mxu0  ;;  %948 = vmatprep.subr.bf16.mxu1 %v1111_v41 }
 0x107   :  { %v250_v34 = vmax.f32 %v234_v27, 0.0  ;;  %v175_v35 = vadd.f32 %v174_v32, %v1147_v50  ;;  %v878_v36 = vpop.f32.mrb[10].mxu0 }
 0x108   :  { %v219_v37 = vmul.f32 %v1152_v52, %v183_v31  ;;  %v186_v38 = vadd.f32 %v878_v36, %v1147_v50  ;;  %v177_v39 = vpop.f32.mrb[11].mxu0  ;;  %v283_v45 = vpack.c.bf16 %v252_v30, %v251_v29 }
 0x109   :  { %v217_v40 = vmul.f32 %v1152_v52, %v175_v35  ;;  %v178_v46 = vadd.f32 %v177_v39, %v1147_v50  ;;  %v282_v48 = vpack.c.bf16 %v250_v34, %v249_v33  ;;  %956 = vmatpush3.bf16.msra.mxu1 %v1111_v41 }
 0x10a   :  { %v239_v53 = vadd.f32 %v1156_v55, %v219_v37  ;;  %v220_v54 = vmul.f32 %v1152_v52, %v186_v38  ;;  %949 = vmatprep.subr.bf16.mxu1 %v1120_v42 }
 0x10b   :  { %v237_v56 = vadd.f32 %v1156_v55, %v217_v40  ;;  %v218_v57 = vmul.f32 %v1152_v52, %v178_v46  ;;  %903 = vmatprep.mubr.bf16.mxu1 %v282_v48 }
 0x10c   :  { %v240_v58 = vadd.f32 %v1156_v55, %v220_v54  ;;  %904 = vmatmul.mubr.bf16.gmra.mrb[4].mxu1 %v283_v45  ;;  %v255_v41 = vmax.f32 %v239_v53, 0.0 }
 0x10d   :  { %v238_v59 = vadd.f32 %v1156_v55, %v218_v57  ;;  %v881_v60 = vpop.f32.mrb[12].mxu0  ;;  %957 = vmatpush3.bf16.msra.mxu1 %v1120_v42  ;;  %v253_v0 = vmax.f32 %v237_v56, 0.0 }
 0x10e   :  { %v256_v61 = vmax.f32 %v240_v58, 0.0  ;;  %v199_v62 = vadd.f32 %v881_v60, %v1147_v50  ;;  %v190_v63 = vpop.f32.mrb[13].mxu0  ;;  %950 = vmatprep.subr.bf16.mxu1 %v1127_v43 }
 0x10f   :  { %v254_v1 = vmax.f32 %v238_v59, 0.0  ;;  %v191_v2 = vadd.f32 %v190_v63, %v1147_v50  ;;  %v882_v3 = vpop.f32.mrb[14].mxu0 }
 0x110   :  { %v223_v4 = vmul.f32 %v1152_v52, %v199_v62  ;;  %v202_v5 = vadd.f32 %v882_v3, %v1147_v50  ;;  %v193_v6 = vpop.f32.mrb[15].mxu0  ;;  %v285_v7 = vpack.c.bf16 %v256_v61, %v255_v41 }
 0x111   :  { %v221_v42 = vmul.f32 %v1152_v52, %v191_v2  ;;  %v194_v8 = vadd.f32 %v193_v6, %v1147_v50  ;;  %v284_v9 = vpack.c.bf16 %v254_v1, %v253_v0  ;;  %958 = vmatpush3.bf16.msra.mxu1 %v1127_v43 }
 0x112   :  { %v243_v10 = vadd.f32 %v1156_v55, %v223_v4  ;;  %v224_v11 = vmul.f32 %v1152_v52, %v202_v5  ;;  %951 = vmatprep.subr.bf16.mxu1 %v1134_v44 }
 0x113   :  { %v241_v12 = vadd.f32 %v1156_v55, %v221_v42  ;;  %v222_v13 = vmul.f32 %v1152_v52, %v194_v8  ;;  %907 = vmatprep.mubr.bf16.mxu1 %v284_v9  ;;  %v984_v52 = vld [vmem:[%s1391_s1 + $0xa8] sm:$0xff]  }
 0x114   :  { %v244_v14 = vadd.f32 %v1156_v55, %v224_v11  ;;  %908 = vmatmul.mubr.bf16.gmra.mrb[8].mxu1 %v285_v7  ;;  %v259_v50 = vmax.f32 %v243_v10, 0.0  ;;  %925 = vmatprep.subr.bf16.mxu0 %v984_v52 }
 0x115   :  { %v242_v15 = vadd.f32 %v1156_v55, %v222_v13  ;;  %959 = vmatpush3.bf16.msra.mxu1 %v1134_v44  ;;  %v257_v16 = vmax.f32 %v241_v12, 0.0  ;;  %926 = vmatpush3.bf16.msra.mxu0 %v984_v52  ;;  %v985_v44 = vld [vmem:[%s1391_s1 + $0xb0] sm:$0xff]   ;;  %v986_v55 = vld [vmem:[%s1391_s1 + $0xb8] sm:$0xff]  }
 0x116   :  { %v260_v43 = vmax.f32 %v244_v14, 0.0  ;;  %952 = vmatprep.subr.bf16.mxu1 %v984_v52  ;;  %927 = vmatprep.subr.bf16.mxu0 %v985_v44 }
 0x117   :  { %v258_v17 = vmax.f32 %v242_v15, 0.0 }
 0x118   :  { %v287_v18 = vpack.c.bf16 %v260_v43, %v259_v50 }
 0x119   :  { %v286_v19 = vpack.c.bf16 %v258_v17, %v257_v16  ;;  %960 = vmatpush3.bf16.msra.mxu1 %v984_v52  ;;  %928 = vmatpush3.bf16.msra.mxu0 %v985_v44 }
 0x11a   :  { %953 = vmatprep.subr.bf16.mxu1 %v985_v44  ;;  %929 = vmatprep.subr.bf16.mxu0 %v986_v55 }
 0x11b   :  { %911 = vmatprep.mubr.bf16.mxu1 %v286_v19 }
 0x11c   :  { %912 = vmatmul.mubr.bf16.gmra.mrb[12].mxu1 %v287_v18 }
 0x11d   :  { %961 = vmatpush3.bf16.msra.mxu1 %v985_v44  ;;  %930 = vmatpush3.bf16.msra.mxu0 %v986_v55 }
 0x11e   :  { %954 = vmatprep.subr.bf16.mxu1 %v986_v55 }
 0x121   :  { %962 = vmatpush3.bf16.msra.mxu1 %v986_v55 }
 0x1d7   :  { %v901_v23 = vpop.f32.mrb[0].mxu1 }
 0x1d8   :  { %v383_v24 = vadd.f32 %v901_v23, %v1227_v21  ;;  %v374_v26 = vpop.f32.mrb[1].mxu1 }
 0x1d9   :  { %v375_v27 = vadd.f32 %v374_v26, %v1227_v21  ;;  %v902_v28 = vpop.f32.mrb[2].mxu1 }
 0x1da   :  { %v443_v29 = vmul.f32 %v1230_v22, %v383_v24  ;;  %v386_v30 = vadd.f32 %v902_v28, %v1227_v21  ;;  %v377_v31 = vpop.f32.mrb[3].mxu1 }
 0x1db   :  { %v441_v32 = vmul.f32 %v1230_v22, %v375_v27  ;;  %v378_v33 = vadd.f32 %v377_v31, %v1227_v21 }
 0x1dc   :  { %v463_v34 = vadd.f32 %v1234_v25, %v443_v29  ;;  %v444_v35 = vmul.f32 %v1230_v22, %v386_v30 }
 0x1dd   :  { %v461_v36 = vadd.f32 %v1234_v25, %v441_v32  ;;  %v442_v37 = vmul.f32 %v1230_v22, %v378_v33 }
 0x1de   :  { %v464_v38 = vadd.f32 %v1234_v25, %v444_v35  ;;  %v479_v40 = vmax.f32 %v463_v34, 0.0 }
 0x1df   :  { %v462_v39 = vadd.f32 %v1234_v25, %v442_v37  ;;  %v905_v45 = vpop.f32.mrb[4].mxu1  ;;  %v477_v54 = vmax.f32 %v461_v36, 0.0 }
 0x1e0   :  { %v480_v46 = vmax.f32 %v464_v38, 0.0  ;;  %v399_v48 = vadd.f32 %v905_v45, %v1227_v21  ;;  %v390_v53 = vpop.f32.mrb[5].mxu1 }
 0x1e1   :  { %v478_v56 = vmax.f32 %v462_v39, 0.0  ;;  %v391_v57 = vadd.f32 %v390_v53, %v1227_v21  ;;  %v906_v58 = vpop.f32.mrb[6].mxu1 }
 0x1e2   :  { %v513_v59 = vpack.c.bf16 %v480_v46, %v479_v40  ;;  %v447_v60 = vmul.f32 %v1230_v22, %v399_v48  ;;  %v402_v41 = vadd.f32 %v906_v58, %v1227_v21  ;;  %v393_v61 = vpop.f32.mrb[7].mxu1 }
 0x1e3   :  { %v445_v62 = vmul.f32 %v1230_v22, %v391_v57  ;;  %v394_v63 = vadd.f32 %v393_v61, %v1227_v21  ;;  %v512_v0 = vpack.c.bf16 %v478_v56, %v477_v54 }
 0x1e4   :  { %v467_v1 = vadd.f32 %v1234_v25, %v447_v60  ;;  %v448_v2 = vmul.f32 %v1230_v22, %v402_v41 }
 0x1e5   :  { %v465_v3 = vadd.f32 %v1234_v25, %v445_v62  ;;  %v446_v4 = vmul.f32 %v1230_v22, %v394_v63  ;;  %931 = vmatprep.mubr.bf16.mxu0 %v512_v0  ;;  %v794_v62 = vld [vmem:[%s1393_s2 + $0x8] sm:$0x7] }
 0x1e6   :  { %v468_v5 = vadd.f32 %v1234_v25, %v448_v2  ;;  %932 = vmatmul.mubr.bf16.vlgmr.msra.gmra.mrb[16].mxu0 %v513_v59  ;;  %v483_v42 = vmax.f32 %v467_v1, 0.0 }
 0x1e7   :  { %v466_v6 = vadd.f32 %v1234_v25, %v446_v4  ;;  %v909_v7 = vpop.f32.mrb[8].mxu1  ;;  %v481_v11 = vmax.f32 %v465_v3, 0.0 }
 0x1e8   :  { %v484_v8 = vmax.f32 %v468_v5, 0.0  ;;  %v415_v9 = vadd.f32 %v909_v7, %v1227_v21  ;;  %v406_v10 = vpop.f32.mrb[9].mxu1  ;;  %v1295_v5 = vrot.slane %v794_v62, %v1149_v51 }
 0x1e9   :  { %v482_v12 = vmax.f32 %v466_v6, 0.0  ;;  %v407_v13 = vadd.f32 %v406_v10, %v1227_v21  ;;  %v910_v14 = vpop.f32.mrb[10].mxu1 }
 0x1ea   :  { %v451_v15 = vmul.f32 %v1230_v22, %v415_v9  ;;  %v418_v50 = vadd.f32 %v910_v14, %v1227_v21  ;;  %v409_v43 = vpop.f32.mrb[11].mxu1  ;;  %v515_v16 = vpack.c.bf16 %v484_v8, %v483_v42 }
 0x1eb   :  { %v449_v17 = vmul.f32 %v1230_v22, %v407_v13  ;;  %v410_v18 = vadd.f32 %v409_v43, %v1227_v21  ;;  %v514_v19 = vpack.c.bf16 %v482_v12, %v481_v11 }
 0x1ec   :  { %v471_v52 = vadd.f32 %v1234_v25, %v451_v15  ;;  %v452_v44 = vmul.f32 %v1230_v22, %v418_v50 }
 0x1ed   :  { %v469_v55 = vadd.f32 %v1234_v25, %v449_v17  ;;  %v450_v20 = vmul.f32 %v1230_v22, %v410_v18  ;;  %935 = vmatprep.mubr.bf16.mxu0 %v514_v19 }
 0x1ee   :  { %v472_v23 = vadd.f32 %v1234_v25, %v452_v44  ;;  %936 = vmatmul.mubr.bf16.gmra.mrb[20].mxu0 %v515_v16  ;;  %v487_v27 = vmax.f32 %v471_v52, 0.0 }
 0x1ef   :  { %v470_v24 = vadd.f32 %v1234_v25, %v450_v20  ;;  %v913_v26 = vpop.f32.mrb[12].mxu1  ;;  %v485_v31 = vmax.f32 %v469_v55, 0.0 }
 0x1f0   :  { %v488_v28 = vmax.f32 %v472_v23, 0.0  ;;  %v431_v29 = vadd.f32 %v913_v26, %v1227_v21  ;;  %v422_v30 = vpop.f32.mrb[13].mxu1 }
 0x1f1   :  { %v486_v32 = vmax.f32 %v470_v24, 0.0  ;;  %v423_v33 = vadd.f32 %v422_v30, %v1227_v21  ;;  %v914_v34 = vpop.f32.mrb[14].mxu1 }
 0x1f2   :  { %v517_v35 = vpack.c.bf16 %v488_v28, %v487_v27  ;;  %v455_v36 = vmul.f32 %v1230_v22, %v431_v29  ;;  %v434_v37 = vadd.f32 %v914_v34, %v1227_v21  ;;  %v425_v38 = vpop.f32.mrb[15].mxu1 }
 0x1f3   :  { %v453_v39 = vmul.f32 %v1230_v22, %v423_v33  ;;  %v426_v45 = vadd.f32 %v425_v38, %v1227_v21  ;;  %v516_v40 = vpack.c.bf16 %v486_v32, %v485_v31 }
 0x1f4   :  { %v475_v46 = vadd.f32 %v1234_v25, %v455_v36  ;;  %v456_v48 = vmul.f32 %v1230_v22, %v434_v37 }
 0x1f5   :  { %v473_v53 = vadd.f32 %v1234_v25, %v453_v39  ;;  %v454_v54 = vmul.f32 %v1230_v22, %v426_v45  ;;  %939 = vmatprep.mubr.bf16.mxu1 %v516_v40  ;;  %v1287_v22 = vrot.slane %v794_v62, %v1139_v47 }
 0x1f6   :  { %v476_v56 = vadd.f32 %v1234_v25, %v456_v48  ;;  %940 = vmatmul.mubr.bf16.vlgmr.msra.gmra.mrb[16].mxu1 %v517_v35  ;;  %v491_v58 = vmax.f32 %v475_v46, 0.0 }
 0x1f7   :  { %v474_v57 = vadd.f32 %v1234_v25, %v454_v54  ;;  %v489_v60 = vmax.f32 %v473_v53, 0.0  ;;  %v1291_v25 = vrot.slane %v794_v62, %v1144_v49 }
 0x1f8   :  { %v492_v59 = vmax.f32 %v476_v56, 0.0 }
 0x1f9   :  { %v490_v41 = vmax.f32 %v474_v57, 0.0 }
 0x1fa   :  { %v519_v21 = vpack.c.bf16 %v492_v59, %v491_v58 }
 0x1fb   :  { %v518_v61 = vpack.c.bf16 %v490_v41, %v489_v60 }
 0x1fd   :  { %943 = vmatprep.mubr.bf16.mxu1 %v518_v61 }
 0x1fe   :  { %944 = vmatmul.mubr.bf16.gmra.mrb[20].mxu1 %v519_v21 }
 0x2b9   :  { %v933_v63 = vpop.f32.mrb[16].mxu0 }
 0x2ba   :  { %v615_v0 = vadd.f32 %v933_v63, %v1287_v22  ;;  %v606_v1 = vpop.f32.mrb[17].mxu0 }
 0x2bb   :  { %v607_v2 = vadd.f32 %v606_v1, %v1287_v22  ;;  %v934_v3 = vpop.f32.mrb[18].mxu0 }
 0x2bc   :  { %v671_v4 = vmax.f32 %v615_v0, 0.0  ;;  %v618_v6 = vadd.f32 %v934_v3, %v1287_v22  ;;  %v609_v7 = vpop.f32.mrb[19].mxu0 }
 0x2bd   :  { %v669_v42 = vmax.f32 %v607_v2, 0.0  ;;  %v610_v47 = vadd.f32 %v609_v7, %v1287_v22 }
 0x2be   :  { %v691_v8 = vmul.f32 %v1291_v25, %v671_v4  ;;  %v672_v9 = vmax.f32 %v618_v6, 0.0 }
 0x2bf   :  { %v689_v49 = vmul.f32 %v1291_v25, %v669_v42  ;;  %v670_v10 = vmax.f32 %v610_v47, 0.0 }
 0x2c0   :  { %v711_v11 = vadd.f32 %v1295_v5, %v691_v8  ;;  %v692_v12 = vmul.f32 %v1291_v25, %v672_v9 }
 0x2c1   :  { %v709_v13 = vadd.f32 %v1295_v5, %v689_v49  ;;  %v690_v51 = vmul.f32 %v1291_v25, %v670_v10  ;;  %v937_v14 = vpop.f32.mrb[20].mxu0 }
 0x2c2   :  { %727 = vst [vmem:[%s1394_s3 + $0x10] sm:$0xff] %v711_v11  ;;  %v712_v15 = vadd.f32 %v1295_v5, %v692_v12  ;;  %v631_v50 = vadd.f32 %v937_v14, %v1287_v22  ;;  %v622_v43 = vpop.f32.mrb[21].mxu0 }
 0x2c3   :  { %725 = vst [vmem:[%s1394_s3] sm:$0xff] %v709_v13  ;;  %v710_v16 = vadd.f32 %v1295_v5, %v690_v51  ;;  %v623_v17 = vadd.f32 %v622_v43, %v1287_v22  ;;  %v938_v18 = vpop.f32.mrb[22].mxu0 }
 0x2c4   :  { %728 = vst [vmem:[%s1394_s3 + $0x18] sm:$0xff] %v712_v15  ;;  %v675_v19 = vmax.f32 %v631_v50, 0.0  ;;  %v634_v52 = vadd.f32 %v938_v18, %v1287_v22  ;;  %v625_v44 = vpop.f32.mrb[23].mxu0 }
 0x2c5   :  { %726 = vst [vmem:[%s1394_s3 + $0x8] sm:$0xff] %v710_v16  ;;  %v673_v55 = vmax.f32 %v623_v17, 0.0  ;;  %v626_v20 = vadd.f32 %v625_v44, %v1287_v22 }
 0x2c6   :  { %v695_v23 = vmul.f32 %v1291_v25, %v675_v19  ;;  %v676_v24 = vmax.f32 %v634_v52, 0.0 }
 0x2c7   :  { %v693_v26 = vmul.f32 %v1291_v25, %v673_v55  ;;  %v674_v27 = vmax.f32 %v626_v20, 0.0 }
 0x2c8   :  { %v715_v28 = vadd.f32 %v1295_v5, %v695_v23  ;;  %v696_v29 = vmul.f32 %v1291_v25, %v676_v24 }
 0x2c9   :  { %v713_v30 = vadd.f32 %v1295_v5, %v693_v26  ;;  %v694_v31 = vmul.f32 %v1291_v25, %v674_v27  ;;  %v941_v32 = vpop.f32.mrb[16].mxu1 }
 0x2ca   :  { %731 = vst [vmem:[%s1394_s3 + $0x30] sm:$0xff] %v715_v28  ;;  %v716_v33 = vadd.f32 %v1295_v5, %v696_v29  ;;  %v647_v34 = vadd.f32 %v941_v32, %v1287_v22  ;;  %v638_v35 = vpop.f32.mrb[17].mxu1 }
 0x2cb   :  { %729 = vst [vmem:[%s1394_s3 + $0x20] sm:$0xff] %v713_v30  ;;  %v714_v36 = vadd.f32 %v1295_v5, %v694_v31  ;;  %v639_v37 = vadd.f32 %v638_v35, %v1287_v22  ;;  %v942_v38 = vpop.f32.mrb[18].mxu1 }
 0x2cc   :  { %732 = vst [vmem:[%s1394_s3 + $0x38] sm:$0xff] %v716_v33  ;;  %v679_v39 = vmax.f32 %v647_v34, 0.0  ;;  %v650_v45 = vadd.f32 %v942_v38, %v1287_v22  ;;  %v641_v40 = vpop.f32.mrb[19].mxu1 }
 0x2cd   :  { %730 = vst [vmem:[%s1394_s3 + $0x28] sm:$0xff] %v714_v36  ;;  %v677_v46 = vmax.f32 %v639_v37, 0.0  ;;  %v642_v48 = vadd.f32 %v641_v40, %v1287_v22 }
 0x2ce   :  { %v699_v53 = vmul.f32 %v1291_v25, %v679_v39  ;;  %v680_v54 = vmax.f32 %v650_v45, 0.0 }
 0x2cf   :  { %v697_v56 = vmul.f32 %v1291_v25, %v677_v46  ;;  %v678_v57 = vmax.f32 %v642_v48, 0.0 }
 0x2d0   :  { %v719_v58 = vadd.f32 %v1295_v5, %v699_v53  ;;  %v700_v59 = vmul.f32 %v1291_v25, %v680_v54 }
 0x2d1   :  { %v717_v60 = vadd.f32 %v1295_v5, %v697_v56  ;;  %v698_v41 = vmul.f32 %v1291_v25, %v678_v57  ;;  %v945_v21 = vpop.f32.mrb[20].mxu1 }
 0x2d2   :  { %735 = vst [vmem:[%s1394_s3 + $0x50] sm:$0xff] %v719_v58  ;;  %v720_v61 = vadd.f32 %v1295_v5, %v700_v59  ;;  %v663_v62 = vadd.f32 %v945_v21, %v1287_v22  ;;  %v654_v63 = vpop.f32.mrb[21].mxu1 }
 0x2d3   :  { %733 = vst [vmem:[%s1394_s3 + $0x40] sm:$0xff] %v717_v60  ;;  %v718_v0 = vadd.f32 %v1295_v5, %v698_v41  ;;  %v655_v1 = vadd.f32 %v654_v63, %v1287_v22  ;;  %v946_v2 = vpop.f32.mrb[22].mxu1 }
 0x2d4   :  { %736 = vst [vmem:[%s1394_s3 + $0x58] sm:$0xff] %v720_v61  ;;  %v683_v3 = vmax.f32 %v663_v62, 0.0  ;;  %v666_v4 = vadd.f32 %v946_v2, %v1287_v22  ;;  %v657_v6 = vpop.f32.mrb[23].mxu1 }
 0x2d5   :  { %734 = vst [vmem:[%s1394_s3 + $0x48] sm:$0xff] %v718_v0  ;;  %v681_v7 = vmax.f32 %v655_v1, 0.0  ;;  %v658_v42 = vadd.f32 %v657_v6, %v1287_v22 }
 0x2d6   :  { %v703_v47 = vmul.f32 %v1291_v25, %v683_v3  ;;  %v684_v8 = vmax.f32 %v666_v4, 0.0 }
 0x2d7   :  { %v701_v9 = vmul.f32 %v1291_v25, %v681_v7  ;;  %v682_v49 = vmax.f32 %v658_v42, 0.0 }
 0x2d8   :  { %v723_v10 = vadd.f32 %v1295_v5, %v703_v47  ;;  %v704_v11 = vmul.f32 %v1291_v25, %v684_v8 }
 0x2d9   :  { %v721_v12 = vadd.f32 %v1295_v5, %v701_v9  ;;  %v702_v13 = vmul.f32 %v1291_v25, %v682_v49 }
 0x2da   :  { %739 = vst [vmem:[%s1394_s3 + $0x70] sm:$0xff] %v723_v10  ;;  %v724_v22 = vadd.f32 %v1295_v5, %v704_v11 }
 0x2db   :  { %737 = vst [vmem:[%s1394_s3 + $0x60] sm:$0xff] %v721_v12  ;;  %v722_v51 = vadd.f32 %v1295_v5, %v702_v13 }
 0x2dc   :  { %740 = vst [vmem:[%s1394_s3 + $0x78] sm:$0xff] %v724_v22 }
 0x2dd   :  { %738 = vst [vmem:[%s1394_s3 + $0x68] sm:$0xff] %v722_v51 }

// kernel: net_forward.13
= control target key start
LH: loop header
LB: loop body
LE: loop exit
PB: predicated region body
PF: predicated region fallthrough
CT: control target
= control target key end

     0   :  { %v56_v32 = vlaneseq  ;;  %s718_s1 = inlined_call_operand.vmem [shape: bf16[1,128,128], index: 1, kind: input, shape index: {}]   ;;  %s719_s0 = inlined_call_operand.vmem [shape: f32[128,128], index: 0, kind: input, shape index: {}]   ;;  %s720_s2 = inlined_call_operand.vmem [shape: f32[1,3,128], index: 2, kind: input, shape index: {}]   ;;  %s721_s3 = inlined_call_operand.vmem [shape: f32[128,128], index: 3, kind: output, shape index: {}]  }
   0x1   :  { %v449_v0 = vld [vmem:[%s718_s1] sm:$0xff]   ;;  %v450_v1 = vld [vmem:[%s718_s1 + $0x8] sm:$0xff]   ;;  %v451_v2 = vld [vmem:[%s718_s1 + $0x10] sm:$0xff]  }
   0x2   :  { %401 = vmatprep.subr.bf16.mxu0 %v449_v0  ;;  %433 = vmatprep.subr.bf16.mxu1 %v449_v0  ;;  %v452_v3 = vld [vmem:[%s718_s1 + $0x18] sm:$0xff]   ;;  %v15_v4 = vld [vmem:[%s719_s0] sm:$0xff]  ;;  %v16_v5 = vld [vmem:[%s719_s0 + $0x8] sm:$0xff]  ;;  %v57_v33 = vshrl.u32 %v56_v32, 7 }
   0x3   :  { %402 = vmatpush3.bf16.msra.mxu0 %v449_v0  ;;  %441 = vmatpush3.bf16.msra.mxu1 %v449_v0  ;;  %v23_v6 = vld [vmem:[%s719_s0 + $0x40] sm:$0xff]  ;;  %v48_v7 = vpack.c.bf16 %v16_v5, %v15_v4  ;;  %v24_v8 = vld [vmem:[%s719_s0 + $0x48] sm:$0xff]  ;;  %v455_v12 = vld [vmem:[%s718_s1 + $0x30] sm:$0xff]  }
   0x4   :  { %403 = vmatprep.subr.bf16.mxu0 %v450_v1  ;;  %434 = vmatprep.subr.bf16.mxu1 %v450_v1  ;;  %v52_v9 = vpack.c.bf16 %v24_v8, %v23_v6  ;;  %v453_v10 = vld [vmem:[%s718_s1 + $0x20] sm:$0xff]   ;;  %v454_v11 = vld [vmem:[%s718_s1 + $0x28] sm:$0xff]   ;;  %v456_v13 = vld [vmem:[%s718_s1 + $0x38] sm:$0xff]   ;;  %v58_v34 = vsub.s32 0, %v57_v33  ;;  %v207_v36 = vsub.s32 1, %v57_v33  ;;  %v227_v38 = vsub.s32 2, %v57_v33 }
   0x5   :  { %417 = vmatprep.mubr.bf16.mxu0 %v48_v7  ;;  %v17_v14 = vld [vmem:[%s719_s0 + $0x10] sm:$0xff]  ;;  %v18_v15 = vld [vmem:[%s719_s0 + $0x18] sm:$0xff]  ;;  %v19_v18 = vld [vmem:[%s719_s0 + $0x20] sm:$0xff] }
   0x6   :  { %425 = vmatprep.mubr.bf16.mxu1 %v52_v9  ;;  %v25_v16 = vld [vmem:[%s719_s0 + $0x50] sm:$0xff]  ;;  %v26_v17 = vld [vmem:[%s719_s0 + $0x58] sm:$0xff]  ;;  %v20_v19 = vld [vmem:[%s719_s0 + $0x28] sm:$0xff]  ;;  %v49_v22 = vpack.c.bf16 %v18_v15, %v17_v14 }
   0x7   :  { %404 = vmatpush3.bf16.msra.mxu0 %v450_v1  ;;  %442 = vmatpush3.bf16.msra.mxu1 %v450_v1  ;;  %v27_v20 = vld [vmem:[%s719_s0 + $0x60] sm:$0xff]  ;;  %v28_v21 = vld [vmem:[%s719_s0 + $0x68] sm:$0xff]  ;;  %v53_v23 = vpack.c.bf16 %v26_v17, %v25_v16  ;;  %v50_v24 = vpack.c.bf16 %v20_v19, %v19_v18  ;;  %v21_v26 = vld [vmem:[%s719_s0 + $0x30] sm:$0xff] }
   0x8   :  { %405 = vmatprep.subr.bf16.mxu0 %v451_v2  ;;  %435 = vmatprep.subr.bf16.mxu1 %v451_v2  ;;  %v54_v25 = vpack.c.bf16 %v28_v21, %v27_v20  ;;  %v22_v27 = vld [vmem:[%s719_s0 + $0x38] sm:$0xff]  ;;  %v29_v28 = vld [vmem:[%s719_s0 + $0x70] sm:$0xff]  ;;  %v47_v35 = vld [vmem:[%s720_s2] sm:$0x7] }
   0x9   :  { %v30_v29 = vld [vmem:[%s719_s0 + $0x78] sm:$0xff]  ;;  %v51_v30 = vpack.c.bf16 %v22_v27, %v21_v26  ;;  %v616_v37 = vrot.slane %v47_v35, %v58_v34  ;;  %v618_v39 = vrot.slane %v47_v35, %v207_v36  ;;  %v621_v43 = vrot.slane %v47_v35, %v227_v38 }
   0xa   :  { %v55_v31 = vpack.c.bf16 %v30_v29, %v29_v28 }
   0xb   :  { %406 = vmatpush3.bf16.msra.mxu0 %v451_v2  ;;  %443 = vmatpush3.bf16.msra.mxu1 %v451_v2 }
   0xc   :  { %407 = vmatprep.subr.bf16.mxu0 %v452_v3  ;;  %436 = vmatprep.subr.bf16.mxu1 %v452_v3 }
   0xf   :  { %408 = vmatpush3.bf16.msra.mxu0 %v452_v3  ;;  %444 = vmatpush3.bf16.msra.mxu1 %v452_v3 }
  0x10   :  { %409 = vmatprep.subr.bf16.mxu0 %v453_v10  ;;  %437 = vmatprep.subr.bf16.mxu1 %v453_v10 }
  0x13   :  { %410 = vmatpush3.bf16.msra.mxu0 %v453_v10  ;;  %445 = vmatpush3.bf16.msra.mxu1 %v453_v10 }
  0x14   :  { %411 = vmatprep.subr.bf16.mxu0 %v454_v11  ;;  %438 = vmatprep.subr.bf16.mxu1 %v454_v11 }
  0x17   :  { %412 = vmatpush3.bf16.msra.mxu0 %v454_v11  ;;  %446 = vmatpush3.bf16.msra.mxu1 %v454_v11 }
  0x18   :  { %413 = vmatprep.subr.bf16.mxu0 %v455_v12  ;;  %439 = vmatprep.subr.bf16.mxu1 %v455_v12 }
  0x1b   :  { %414 = vmatpush3.bf16.msra.mxu0 %v455_v12  ;;  %447 = vmatpush3.bf16.msra.mxu1 %v455_v12 }
  0x1c   :  { %415 = vmatprep.subr.bf16.mxu0 %v456_v13  ;;  %440 = vmatprep.subr.bf16.mxu1 %v456_v13 }
  0x1f   :  { %416 = vmatpush3.bf16.msra.mxu0 %v456_v13  ;;  %448 = vmatpush3.bf16.msra.mxu1 %v456_v13 }
  0x22   :  { %418 = vmatmul.mubr.bf16.vlgmr.msra.gmra.mrb[0].mxu0 %v49_v22  ;;  %426 = vmatmul.mubr.bf16.vlgmr.msra.gmra.mrb[0].mxu1 %v53_v23 }
  0x23   :  { %421 = vmatprep.mubr.bf16.mxu0 %v50_v24  ;;  %429 = vmatprep.mubr.bf16.mxu1 %v54_v25 }
  0x2a   :  { %422 = vmatmul.mubr.bf16.gmra.mrb[4].mxu0 %v51_v30  ;;  %430 = vmatmul.mubr.bf16.gmra.mrb[4].mxu1 %v55_v31 }
  0xf5   :  { %v419_v40 = vpop.f32.mrb[0].mxu0  ;;  %v427_v41 = vpop.f32.mrb[0].mxu1 }
  0xf6   :  { %v151_v42 = vadd.f32 %v419_v40, %v616_v37  ;;  %v183_v44 = vadd.f32 %v427_v41, %v616_v37  ;;  %v142_v45 = vpop.f32.mrb[1].mxu0  ;;  %v174_v46 = vpop.f32.mrb[1].mxu1 }
  0xf7   :  { %v143_v47 = vadd.f32 %v142_v45, %v616_v37  ;;  %v175_v48 = vadd.f32 %v174_v46, %v616_v37  ;;  %v420_v49 = vpop.f32.mrb[2].mxu0  ;;  %v428_v50 = vpop.f32.mrb[2].mxu1 }
  0xf8   :  { %v211_v51 = vmul.f32 %v618_v39, %v151_v42  ;;  %v219_v52 = vmul.f32 %v618_v39, %v183_v44  ;;  %v154_v53 = vadd.f32 %v420_v49, %v616_v37  ;;  %v186_v54 = vadd.f32 %v428_v50, %v616_v37  ;;  %v145_v55 = vpop.f32.mrb[3].mxu0  ;;  %v177_v56 = vpop.f32.mrb[3].mxu1 }
  0xf9   :  { %v209_v57 = vmul.f32 %v618_v39, %v143_v47  ;;  %v217_v58 = vmul.f32 %v618_v39, %v175_v48  ;;  %v146_v59 = vadd.f32 %v145_v55, %v616_v37  ;;  %v178_v60 = vadd.f32 %v177_v56, %v616_v37 }
  0xfa   :  { %v231_v61 = vadd.f32 %v621_v43, %v211_v51  ;;  %v239_v62 = vadd.f32 %v621_v43, %v219_v52  ;;  %v212_v63 = vmul.f32 %v618_v39, %v154_v53  ;;  %v220_v0 = vmul.f32 %v618_v39, %v186_v54 }
  0xfb   :  { %v229_v1 = vadd.f32 %v621_v43, %v209_v57  ;;  %v237_v2 = vadd.f32 %v621_v43, %v217_v58  ;;  %v210_v3 = vmul.f32 %v618_v39, %v146_v59  ;;  %v218_v4 = vmul.f32 %v618_v39, %v178_v60 }
  0xfc   :  { %v371_v5 = vmul.f32 -1.442695, %v231_v61  ;;  %v379_v6 = vmul.f32 -1.442695, %v239_v62  ;;  %v232_v7 = vadd.f32 %v621_v43, %v212_v63  ;;  %v240_v8 = vadd.f32 %v621_v43, %v220_v0 }
  0xfd   :  { %v369_v9 = vmul.f32 -1.442695, %v229_v1  ;;  %v377_v10 = vmul.f32 -1.442695, %v237_v2  ;;  %v230_v11 = vadd.f32 %v621_v43, %v210_v3  ;;  %v238_v12 = vadd.f32 %v621_v43, %v218_v4  ;;  %v423_v13 = vpop.f32.mrb[4].mxu0  ;;  %v431_v14 = vpop.f32.mrb[4].mxu1 }
  0xfe   :  { %457 = vpow2.f32 %v371_v5  ;;  %v372_v15 = vmul.f32 -1.442695, %v232_v7  ;;  %v167_v16 = vadd.f32 %v423_v13, %v616_v37  ;;  %v158_v17 = vpop.f32.mrb[5].mxu0  ;;  %v190_v18 = vpop.f32.mrb[5].mxu1  ;;  %v380_v19 = vmul.f32 -1.442695, %v240_v8 }
  0xff   :  { %459 = vpow2.f32 %v379_v6  ;;  %v370_v20 = vmul.f32 -1.442695, %v230_v11  ;;  %v199_v21 = vadd.f32 %v431_v14, %v616_v37  ;;  %v424_v22 = vpop.f32.mrb[6].mxu0  ;;  %v432_v23 = vpop.f32.mrb[6].mxu1  ;;  %v159_v25 = vadd.f32 %v158_v17, %v616_v37 }
 0x100   :  { %461 = vpow2.f32 %v369_v9  ;;  %v215_v24 = vmul.f32 %v618_v39, %v167_v16  ;;  %v191_v26 = vadd.f32 %v190_v18, %v616_v37  ;;  %v161_v27 = vpop.f32.mrb[7].mxu0  ;;  %v193_v28 = vpop.f32.mrb[7].mxu1  ;;  %v378_v29 = vmul.f32 -1.442695, %v238_v12 }
 0x101   :  { %463 = vpow2.f32 %v377_v10  ;;  %v223_v30 = vmul.f32 %v618_v39, %v199_v21  ;;  %v170_v31 = vadd.f32 %v424_v22, %v616_v37  ;;  %v213_v33 = vmul.f32 %v618_v39, %v159_v25 }
 0x102   :  { %465 = vpow2.f32 %v372_v15  ;;  %v235_v32 = vadd.f32 %v621_v43, %v215_v24  ;;  %v221_v34 = vmul.f32 %v618_v39, %v191_v26  ;;  %v202_v49 = vadd.f32 %v432_v23, %v616_v37 }
 0x103   :  { %467 = vpow2.f32 %v380_v19  ;;  %v243_v35 = vadd.f32 %v621_v43, %v223_v30  ;;  %v216_v36 = vmul.f32 %v618_v39, %v170_v31  ;;  %v233_v40 = vadd.f32 %v621_v43, %v213_v33 }
 0x104   :  { %469 = vpow2.f32 %v370_v20  ;;  %v375_v38 = vmul.f32 -1.442695, %v235_v32  ;;  %v241_v41 = vadd.f32 %v621_v43, %v221_v34  ;;  %v162_v52 = vadd.f32 %v161_v27, %v616_v37 }
 0x105   :  { %471 = vpow2.f32 %v378_v29  ;;  %v383_v42 = vmul.f32 -1.442695, %v243_v35  ;;  %v236_v44 = vadd.f32 %v621_v43, %v216_v36  ;;  %v373_v45 = vmul.f32 -1.442695, %v233_v40 }
 0x106   :  { %473 = vpow2.f32 %v375_v38  ;;  %v381_v46 = vmul.f32 -1.442695, %v241_v41  ;;  %v194_v55 = vadd.f32 %v193_v28, %v616_v37  ;;  %v224_v60 = vmul.f32 %v618_v39, %v202_v49 }
 0x107   :  { %475 = vpow2.f32 %v383_v42  ;;  %v376_v47 = vmul.f32 -1.442695, %v236_v44  ;;  %v214_v63 = vmul.f32 %v618_v39, %v162_v52 }
 0x108   :  { %v458_v48 = vpop.eup %457  ;;  %477 = vpow2.f32 %v373_v45  ;;  %v222_v2 = vmul.f32 %v618_v39, %v194_v55  ;;  %v244_v6 = vadd.f32 %v621_v43, %v224_v60 }
 0x109   :  { %v460_v50 = vpop.eup %459  ;;  %v295_v51 = vadd.f32 1.0, %v458_v48  ;;  %479 = vpow2.f32 %v381_v46  ;;  %v234_v9 = vadd.f32 %v621_v43, %v214_v63 }
 0x10a   :  { %v462_v53 = vpop.eup %461  ;;  %v303_v54 = vadd.f32 1.0, %v460_v50  ;;  %481 = vpow2.f32 %v376_v47  ;;  %v242_v12 = vadd.f32 %v621_v43, %v222_v2  ;;  %v384_v16 = vmul.f32 -1.442695, %v244_v6 }
 0x10b   :  { %v464_v56 = vpop.eup %463  ;;  %483 = vrcp.f32 %v295_v51  ;;  %v293_v57 = vadd.f32 1.0, %v462_v53  ;;  %v374_v19 = vmul.f32 -1.442695, %v234_v9 }
 0x10c   :  { %v466_v58 = vpop.eup %465  ;;  %485 = vrcp.f32 %v303_v54  ;;  %v301_v59 = vadd.f32 1.0, %v464_v56  ;;  %v382_v21 = vmul.f32 -1.442695, %v242_v12 }
 0x10d   :  { %v468_v61 = vpop.eup %467  ;;  %487 = vrcp.f32 %v293_v57  ;;  %v296_v62 = vadd.f32 1.0, %v466_v58 }
 0x10e   :  { %v470_v0 = vpop.eup %469  ;;  %489 = vrcp.f32 %v301_v59  ;;  %v304_v1 = vadd.f32 1.0, %v468_v61 }
 0x10f   :  { %v472_v3 = vpop.eup %471  ;;  %491 = vrcp.f32 %v296_v62  ;;  %v294_v37 = vadd.f32 1.0, %v470_v0 }
 0x110   :  { %v474_v4 = vpop.eup %473  ;;  %493 = vrcp.f32 %v304_v1  ;;  %v302_v5 = vadd.f32 1.0, %v472_v3 }
 0x111   :  { %v476_v7 = vpop.eup %475  ;;  %495 = vrcp.f32 %v294_v37  ;;  %v299_v8 = vadd.f32 1.0, %v474_v4 }
 0x112   :  { %v478_v10 = vpop.eup %477  ;;  %497 = vrcp.f32 %v302_v5  ;;  %v307_v11 = vadd.f32 1.0, %v476_v7 }
 0x113   :  { %v480_v13 = vpop.eup %479  ;;  %499 = vrcp.f32 %v299_v8  ;;  %v297_v39 = vadd.f32 1.0, %v478_v10 }
 0x114   :  { %v482_v14 = vpop.eup %481  ;;  %501 = vrcp.f32 %v307_v11  ;;  %v305_v15 = vadd.f32 1.0, %v480_v13 }
 0x115   :  { %v484_v17 = vpop.eup %483  ;;  %503 = vrcp.f32 %v297_v39  ;;  %v300_v18 = vadd.f32 1.0, %v482_v14 }
 0x116   :  { %v486_v20 = vpop.eup %485  ;;  %343 = vst [vmem:[%s721_s3 + $0x10] sm:$0xff] %v484_v17  ;;  %505 = vrcp.f32 %v305_v15 }
 0x117   :  { %v488_v22 = vpop.eup %487  ;;  %351 = vst [vmem:[%s721_s3 + $0x50] sm:$0xff] %v486_v20  ;;  %507 = vrcp.f32 %v300_v18 }
 0x118   :  { %v490_v43 = vpop.eup %489  ;;  %341 = vst [vmem:[%s721_s3] sm:$0xff] %v488_v22  ;;  %509 = vpow2.f32 %v384_v16 }
 0x119   :  { %v492_v23 = vpop.eup %491  ;;  %349 = vst [vmem:[%s721_s3 + $0x40] sm:$0xff] %v490_v43  ;;  %511 = vpow2.f32 %v374_v19 }
 0x11a   :  { %v494_v24 = vpop.eup %493  ;;  %344 = vst [vmem:[%s721_s3 + $0x18] sm:$0xff] %v492_v23  ;;  %513 = vpow2.f32 %v382_v21 }
 0x11b   :  { %v496_v25 = vpop.eup %495  ;;  %352 = vst [vmem:[%s721_s3 + $0x58] sm:$0xff] %v494_v24 }
 0x11c   :  { %v498_v26 = vpop.eup %497  ;;  %342 = vst [vmem:[%s721_s3 + $0x8] sm:$0xff] %v496_v25 }
 0x11d   :  { %v500_v27 = vpop.eup %499  ;;  %350 = vst [vmem:[%s721_s3 + $0x48] sm:$0xff] %v498_v26 }
 0x11e   :  { %v502_v28 = vpop.eup %501  ;;  %347 = vst [vmem:[%s721_s3 + $0x30] sm:$0xff] %v500_v27 }
 0x11f   :  { %v504_v29 = vpop.eup %503  ;;  %355 = vst [vmem:[%s721_s3 + $0x70] sm:$0xff] %v502_v28 }
 0x120   :  { %v506_v30 = vpop.eup %505  ;;  %345 = vst [vmem:[%s721_s3 + $0x20] sm:$0xff] %v504_v29 }
 0x121   :  { %v508_v31 = vpop.eup %507  ;;  %353 = vst [vmem:[%s721_s3 + $0x60] sm:$0xff] %v506_v30 }
 0x122   :  { %v510_v32 = vpop.eup %509  ;;  %348 = vst [vmem:[%s721_s3 + $0x38] sm:$0xff] %v508_v31 }
 0x123   :  { %v512_v33 = vpop.eup %511  ;;  %v308_v34 = vadd.f32 1.0, %v510_v32 }
 0x124   :  { %v514_v35 = vpop.eup %513  ;;  %v298_v36 = vadd.f32 1.0, %v512_v33 }
 0x125   :  { %515 = vrcp.f32 %v308_v34  ;;  %v306_v38 = vadd.f32 1.0, %v514_v35 }
 0x126   :  { %517 = vrcp.f32 %v298_v36 }
 0x127   :  { %519 = vrcp.f32 %v306_v38 }
 0x12f   :  { %v516_v40 = vpop.eup %515 }
 0x130   :  { %v518_v41 = vpop.eup %517  ;;  %356 = vst [vmem:[%s721_s3 + $0x78] sm:$0xff] %v516_v40 }
 0x131   :  { %v520_v42 = vpop.eup %519  ;;  %346 = vst [vmem:[%s721_s3 + $0x28] sm:$0xff] %v518_v41 }
 0x132   :  { %354 = vst [vmem:[%s721_s3 + $0x68] sm:$0xff] %v520_v42 }

</bundles_post_ra>
